<compile_context>
chip_gen: v7x
topology: tpu7x:2x2x1
jax: 0.10.0
libtpu: 0.0.40
codegen_flags: <defaults>
</compile_context>

<pallas_src>
import functools

import jax
import jax.numpy as jnp
from jax import lax
from jax.experimental import pallas as pl
from jax.experimental.pallas import tpu as pltpu


def _round_up(x, m):
    return (x + m - 1) // m * m


# ---------------------------------------------------------------------------
# Kernel
# ---------------------------------------------------------------------------
def _decoder_kernel(x_ref, wih_ref, whh_ref, bias_ref,
                    wd_ref, bd_ref, gamma_ref, beta_ref,
                    wfc_ref, bfc_ref,
                    out_ref,
                    seq_ref, gx_ref,
                    *, num_layers, seq_len, b_tile, hidden2, ln_dim, eps,
                    unroll):
    T, B, H2 = seq_len, b_tile, hidden2
    TB = T * B

    # Stage the (padded, time-major) input block as a flat (T*B, H2) f32
    # working buffer; each LSTM layer overwrites it in place.
    seq_ref[...] = x_ref[...].reshape(TB, H2).astype(jnp.float32)

    for l in range(num_layers):                      # static, small
        # ---- hoisted input projection: one big MXU matmul per layer ----
        # gates_x[t*B:(t+1)*B, :] = x_t @ W_ih^T + (b_ih + b_hh)
        gx_ref[...] = (
            jnp.dot(seq_ref[...], wih_ref[l],
                    preferred_element_type=jnp.float32)
            + bias_ref[l])

        def step(t, carry):
            h, c = carry
            row = pl.multiple_of(t * B, B)
            gates = gx_ref[pl.ds(row, B), :] + jnp.dot(
                h, whh_ref[l], preferred_element_type=jnp.float32)
            # PyTorch LSTM gate order: i, f, g, o (each lane-padded to H2)
            i = jax.nn.sigmoid(gates[:, 0 * H2:1 * H2])
            f = jax.nn.sigmoid(gates[:, 1 * H2:2 * H2])
            g = jnp.tanh(gates[:, 2 * H2:3 * H2])
            o = jax.nn.sigmoid(gates[:, 3 * H2:4 * H2])
            c_new = f * c + i * g
            h_new = o * jnp.tanh(c_new)
            seq_ref[pl.ds(row, B), :] = h_new
            return (h_new, c_new)

        h0 = jnp.zeros((B, H2), jnp.float32)
        c0 = jnp.zeros((B, H2), jnp.float32)
        lax.fori_loop(0, T, step, (h0, c0), unroll=unroll)

    # ---- input_decoder: one (T*B, H2) x (H2, Hp) matmul ----
    y = jnp.dot(seq_ref[...], wd_ref[...],
                preferred_element_type=jnp.float32) + bd_ref[...]

    # ---- LayerNorm over the REAL hidden dim (padded columns of y are 0) ----
    inv_n = 1.0 / float(ln_dim)
    mean = jnp.sum(y, axis=-1, keepdims=True) * inv_n
    lane = lax.broadcasted_iota(jnp.int32, (1, y.shape[-1]), 1)
    d = jnp.where(lane < ln_dim, y - mean, 0.0)
    var = jnp.sum(d * d, axis=-1, keepdims=True) * inv_n
    y = d * lax.rsqrt(var + eps)
    y = y * gamma_ref[...] + beta_ref[...]

    # ---- fc: one (T*B, Hp) x (Hp, Op) matmul ----
    y = jnp.dot(y, wfc_ref[...], preferred_element_type=jnp.float32)
    y = y + bfc_ref[...]
    out_ref[...] = y.reshape(T, B, -1).astype(out_ref.dtype)


# ---------------------------------------------------------------------------
# Wrapper-side layout plumbing (transpose + zero-pad; free for XLA)
# ---------------------------------------------------------------------------
def _pad_lstm_weight(w, H2, H2p):
    # w: (L, 4*H2, H2), PyTorch (out, in) layout, gates stacked [i; f; g; o].
    # -> (L, H2p, 4*H2p), per-gate zero-padded, ready for x @ W (no in-kernel T).
    L = w.shape[0]
    w = w.reshape(L, 4, H2, H2)                                  # (L, gate, out, in)
    w = jnp.pad(w, ((0, 0), (0, 0), (0, H2p - H2), (0, H2p - H2)))
    w = jnp.transpose(w, (0, 3, 1, 2))                           # (L, in, gate, out)
    return w.reshape(L, H2p, 4 * H2p)


def _pad_lstm_bias(b, H2, H2p):
    # b: (L, 4*H2) -> (L, 1, 4*H2p), per-gate zero-padded.
    L = b.shape[0]
    b = b.reshape(L, 4, H2)
    b = jnp.pad(b, ((0, 0), (0, 0), (0, H2p - H2)))
    return b.reshape(L, 1, 4 * H2p)


def decoder_forward(x, params, *, num_layers, hidden_size, output_size,
                    b_tile=8, param_dtype=jnp.float32):
    """x: (B, T, 2*hidden_size), batch-first like the PyTorch module."""
    B, T, H2 = x.shape
    assert H2 == 2 * hidden_size
    H, O = hidden_size, output_size
    f32 = jnp.float32

    # Lane/sublane padding targets.
    H2p = _round_up(H2, 128)
    Hp = _round_up(H, 128)
    Op = _round_up(O, 128)
    Bp = _round_up(max(B, b_tile), b_tile)

    # Weights: pre-transposed + zero-padded (padded LSTM units stay exactly 0
    # through the recurrence; padded LN/fc columns stay 0 because gamma/beta
    # and all padded weight rows/cols/biases are 0).
    # TODO(synk): set param_dtype=jnp.bfloat16 on v6e/v7x for full MXU rate.
    wih = _pad_lstm_weight(params['w_ih'].astype(f32), H2, H2p).astype(param_dtype)
    whh = _pad_lstm_weight(params['w_hh'].astype(f32), H2, H2p).astype(param_dtype)
    bias = _pad_lstm_bias((params['b_ih'] + params['b_hh']).astype(f32), H2, H2p)

    wd = jnp.pad(params['w_dec'].astype(f32).T,
                 ((0, H2p - H2), (0, Hp - H))).astype(param_dtype)
    bd = jnp.pad(params['b_dec'].astype(f32), (0, Hp - H)).reshape(1, Hp)
    gamma = jnp.pad(params['gamma'].astype(f32), (0, Hp - H)).reshape(1, Hp)
    beta = jnp.pad(params['beta'].astype(f32), (0, Hp - H)).reshape(1, Hp)
    wfc = jnp.pad(params['w_fc'].astype(f32).T,
                  ((0, Hp - H), (0, Op - O))).astype(param_dtype)
    bfc = jnp.pad(params['b_fc'].astype(f32), (0, Op - O)).reshape(1, Op)

    # Time-major, batch- and lane-padded input.
    x_tm = jnp.transpose(x.astype(f32), (1, 0, 2))               # (T, B, 2H)
    x_tm = jnp.pad(x_tm, ((0, 0), (0, Bp - B), (0, H2p - H2)))   # (T, Bp, H2p)

    unroll = True if T <= 16 else 4
    kernel = functools.partial(
        _decoder_kernel, num_layers=num_layers, seq_len=T, b_tile=b_tile,
        hidden2=H2p, ln_dim=H, eps=1e-5, unroll=unroll)

    grid = (Bp // b_tile,)

    def full_spec(arr):
        ndim = arr.ndim
        return pl.BlockSpec(arr.shape, lambda b, _n=ndim: (0,) * _n)

    # Rough per-core VMEM budget; raise the scoped limit only when needed.
    vmem_need = 4 * (
        2 * T * b_tile * (H2p + Op)                   # in/out blocks (dbl-buffered)
        + T * b_tile * (H2p + 4 * H2p)                # seq + gates scratch
        + wih.size + whh.size + bias.size
        + wd.size + wfc.size + 4 * Hp + Op)
    compiler_kwargs = dict(dimension_semantics=("parallel",))
    if vmem_need > 24 * 1024 * 1024:
        compiler_kwargs["vmem_limit_bytes"] = min(
            int(1.5 * vmem_need), 100 * 1024 * 1024)

    out_tm = pl.pallas_call(
        kernel,
        out_shape=jax.ShapeDtypeStruct((T, Bp, Op), jnp.float32),
        grid=grid,
        in_specs=[
            pl.BlockSpec((T, b_tile, H2p), lambda b: (0, b, 0)),   # x (batch-tiled)
            full_spec(wih), full_spec(whh), full_spec(bias),
            full_spec(wd), full_spec(bd), full_spec(gamma), full_spec(beta),
            full_spec(wfc), full_spec(bfc),
        ],
        out_specs=pl.BlockSpec((T, b_tile, Op), lambda b: (0, b, 0)),
        scratch_shapes=[
            pltpu.VMEM((T * b_tile, H2p), jnp.float32),            # seq buffer
            pltpu.VMEM((T * b_tile, 4 * H2p), jnp.float32),        # gates_x buffer
        ],
        compiler_params=pltpu.CompilerParams(**compiler_kwargs),
    )(x_tm, wih, whh, bias, wd, bd, gamma, beta, wfc, bfc)

    return jnp.transpose(out_tm[:, :B, :O], (1, 0, 2))             # (B, T, O)


# ---------------------------------------------------------------------------
# Parameters + pure-JAX reference (mirrors the PyTorch forward)
# ---------------------------------------------------------------------------
def make_params(key, hidden_size, num_layers, output_size):
    H2 = 2 * hidden_size
    k = 1.0 / jnp.sqrt(jnp.float32(H2))
    keys = jax.random.split(key, 10)

    def u(rk, shape, scale):
        return jax.random.uniform(rk, shape, jnp.float32, -scale, scale)

    return {
        # stacked LSTM params; input size == hidden size == 2H for every layer
        'w_ih': u(keys[0], (num_layers, 4 * H2, H2), k),
        'w_hh': u(keys[1], (num_layers, 4 * H2, H2), k),
        'b_ih': u(keys[2], (num_layers, 4 * H2), k),
        'b_hh': u(keys[3], (num_layers, 4 * H2), k),
        # input_decoder: Linear(2H -> H), PyTorch weight layout (out, in)
        'w_dec': u(keys[4], (hidden_size, H2), k),
        'b_dec': u(keys[5], (hidden_size,), k),
        # LayerNorm(H)
        'gamma': jnp.ones((hidden_size,), jnp.float32),
        'beta': jnp.zeros((hidden_size,), jnp.float32),
        # fc: Linear(H -> O)
        'w_fc': u(keys[6], (output_size, hidden_size),
                  1.0 / jnp.sqrt(jnp.float32(hidden_size))),
        'b_fc': u(keys[7], (output_size,),
                  1.0 / jnp.sqrt(jnp.float32(hidden_size))),
    }


def decoder_reference(x, params, *, num_layers, hidden_size, output_size):
    B, T, H2 = x.shape
    seq = x.astype(jnp.float32)
    for l in range(num_layers):
        w_ih, w_hh = params['w_ih'][l], params['w_hh'][l]
        bias = params['b_ih'][l] + params['b_hh'][l]
        h = jnp.zeros((B, H2), jnp.float32)
        c = jnp.zeros((B, H2), jnp.float32)
        outs = []
        for t in range(T):
            gates = seq[:, t, :] @ w_ih.T + h @ w_hh.T + bias
            i = jax.nn.sigmoid(gates[:, :H2])
            f = jax.nn.sigmoid(gates[:, H2:2 * H2])
            g = jnp.tanh(gates[:, 2 * H2:3 * H2])
            o = jax.nn.sigmoid(gates[:, 3 * H2:])
            c = f * c + i * g
            h = o * jnp.tanh(c)
            outs.append(h)
        seq = jnp.stack(outs, axis=1)
    y = seq @ params['w_dec'].T + params['b_dec']
    mean = jnp.mean(y, axis=-1, keepdims=True)
    var = jnp.mean((y - mean) ** 2, axis=-1, keepdims=True)
    y = (y - mean) * lax.rsqrt(var + 1e-5)
    y = y * params['gamma'] + params['beta']
    return y @ params['w_fc'].T + params['b_fc']


if __name__ == "__main__":
    hidden_size = 16
    num_layers = 2
    output_size = 8
    B, T = 2, 8

    key = jax.random.PRNGKey(0)
    kx, kp = jax.random.split(key)
    x = jax.random.normal(kx, (B, T, 2 * hidden_size), jnp.float32)
    params = make_params(kp, hidden_size, num_layers, output_size)

    out = decoder_forward(x, params, num_layers=num_layers,
                          hidden_size=hidden_size, output_size=output_size)
    out = jax.block_until_ready(out)

    ref = decoder_reference(x, params, num_layers=num_layers,
                            hidden_size=hidden_size, output_size=output_size)
    assert out.shape == (B, T, output_size)
    assert jnp.allclose(out, ref, atol=1e-4, rtol=1e-4), "mismatch vs reference"
    print("KERNEL_OK")
</pallas_src>

<mosaic_0001>
module attributes {stable_mosaic.version = 11 : i64} {
  func.func @_decoder_kernel(%arg0: i32, %arg1: memref<8x8x128xf32, #tpu.memory_space<vmem>>, %arg2: memref<2x128x512xf32, #tpu.memory_space<vmem>>, %arg3: memref<2x128x512xf32, #tpu.memory_space<vmem>>, %arg4: memref<2x1x512xf32, #tpu.memory_space<vmem>>, %arg5: memref<128x128xf32, #tpu.memory_space<vmem>>, %arg6: memref<1x128xf32, #tpu.memory_space<vmem>>, %arg7: memref<1x128xf32, #tpu.memory_space<vmem>>, %arg8: memref<1x128xf32, #tpu.memory_space<vmem>>, %arg9: memref<128x128xf32, #tpu.memory_space<vmem>>, %arg10: memref<1x128xf32, #tpu.memory_space<vmem>>, %arg11: memref<8x8x128xf32, #tpu.memory_space<vmem>>, %arg12: memref<64x128xf32, #tpu.memory_space<vmem>>, %arg13: memref<64x512xf32, #tpu.memory_space<vmem>>) attributes {dimension_semantics = [#tpu.dimension_semantics<parallel>], iteration_bounds = array<i64: 1>, scalar_prefetch = 0 : i64, scratch_operands = 2 : i64, tpu.core_type = #tpu.core_type<tc>, window_params = [{transform_indices = @transform_0, window_bounds = array<i64: 8, 8, 128>}, {pipeline_mode = #tpu.pipeline_mode<synchronous>, transform_indices = @transform_1, window_bounds = array<i64: 2, 128, 512>}, {pipeline_mode = #tpu.pipeline_mode<synchronous>, transform_indices = @transform_2, window_bounds = array<i64: 2, 128, 512>}, {pipeline_mode = #tpu.pipeline_mode<synchronous>, transform_indices = @transform_3, window_bounds = array<i64: 2, 1, 512>}, {pipeline_mode = #tpu.pipeline_mode<synchronous>, transform_indices = @transform_4, window_bounds = array<i64: 128, 128>}, {pipeline_mode = #tpu.pipeline_mode<synchronous>, transform_indices = @transform_5, window_bounds = array<i64: 1, 128>}, {pipeline_mode = #tpu.pipeline_mode<synchronous>, transform_indices = @transform_6, window_bounds = array<i64: 1, 128>}, {pipeline_mode = #tpu.pipeline_mode<synchronous>, transform_indices = @transform_7, window_bounds = array<i64: 1, 128>}, {pipeline_mode = #tpu.pipeline_mode<synchronous>, transform_indices = @transform_8, window_bounds = array<i64: 128, 128>}, {pipeline_mode = #tpu.pipeline_mode<synchronous>, transform_indices = @transform_9, window_bounds = array<i64: 1, 128>}, {transform_indices = @transform_10, window_bounds = array<i64: 8, 8, 128>}]} {
    %c0 = arith.constant 0 : index
    %c0_0 = arith.constant 0 : index
    %c0_1 = arith.constant 0 : index
    %0 = vector.load %arg1[%c0, %c0_0, %c0_1] : memref<8x8x128xf32, #tpu.memory_space<vmem>>, vector<8x8x128xf32>
    %1 = vector.shape_cast %0 : vector<8x8x128xf32> to vector<64x128xf32>
    %c0_2 = arith.constant 0 : index
    %c0_3 = arith.constant 0 : index
    %2 = vector.load %arg12[%c0_2, %c0_3] : memref<64x128xf32, #tpu.memory_space<vmem>>, vector<64x128xf32>
    tpu.vector_store %arg12[%c0_2, %c0_3], %1 {strides = array<i32>} : memref<64x128xf32, #tpu.memory_space<vmem>>, vector<64x128xf32>,
    %c0_4 = arith.constant 0 : index
    %c0_5 = arith.constant 0 : index
    %3 = vector.load %arg12[%c0_4, %c0_5] : memref<64x128xf32, #tpu.memory_space<vmem>>, vector<64x128xf32>
    %c0_6 = arith.constant 0 : index
    %c0_7 = arith.constant 0 : index
    %c0_8 = arith.constant 0 : index
    %4 = vector.load %arg2[%c0_6, %c0_7, %c0_8] : memref<2x128x512xf32, #tpu.memory_space<vmem>>, vector<1x128x512xf32>
    %5 = vector.shape_cast %4 : vector<1x128x512xf32> to vector<128x512xf32>
    %cst = arith.constant dense<0.000000e+00> : vector<64x512xf32>
    %6 = tpu.matmul %3, %5, %cst {dimension_numbers = #tpu.dot_dimension_numbers<[1], [0], [0], [1], [0, 0, 1, 1], [], []>} : vector<64x128xf32>, vector<128x512xf32>, vector<64x512xf32> -> vector<64x512xf32>
    %c0_9 = arith.constant 0 : index
    %c0_10 = arith.constant 0 : index
    %c0_11 = arith.constant 0 : index
    %7 = vector.load %arg4[%c0_9, %c0_10, %c0_11] : memref<2x1x512xf32, #tpu.memory_space<vmem>>, vector<1x1x512xf32>
    %8 = vector.shape_cast %7 : vector<1x1x512xf32> to vector<1x512xf32>
    %9 = vector.broadcast %8 : vector<1x512xf32> to vector<64x512xf32>
    %10 = arith.addf %6, %9 : vector<64x512xf32>
    %c0_12 = arith.constant 0 : index
    %c0_13 = arith.constant 0 : index
    %11 = vector.load %arg13[%c0_12, %c0_13] : memref<64x512xf32, #tpu.memory_space<vmem>>, vector<64x512xf32>
    tpu.vector_store %arg13[%c0_12, %c0_13], %10 {strides = array<i32>} : memref<64x512xf32, #tpu.memory_space<vmem>>, vector<64x512xf32>,
    %cst_14 = arith.constant 0.000000e+00 : f32
    %12 = vector.broadcast %cst_14 : f32 to vector<8x128xf32>
    %cst_15 = arith.constant 0.000000e+00 : f32
    %13 = vector.broadcast %cst_15 : f32 to vector<8x128xf32>
    %c0_i32 = arith.constant 0 : i32
    %c8_i32 = arith.constant 8 : i32
    %14 = arith.muli %c0_i32, %c8_i32 : i32
    %15 = tpu.assume_multiple %14, 8 : i32
    %16 = arith.index_cast %15 : i32 to index
    %c0_16 = arith.constant 0 : index
    %17 = vector.load %arg13[%16, %c0_16] : memref<64x512xf32, #tpu.memory_space<vmem>>, vector<8x512xf32>
    %c0_17 = arith.constant 0 : index
    %c0_18 = arith.constant 0 : index
    %c0_19 = arith.constant 0 : index
    %18 = vector.load %arg3[%c0_17, %c0_18, %c0_19] : memref<2x128x512xf32, #tpu.memory_space<vmem>>, vector<1x128x512xf32>
    %19 = vector.shape_cast %18 : vector<1x128x512xf32> to vector<128x512xf32>
    %cst_20 = arith.constant dense<0.000000e+00> : vector<8x512xf32>
    %20 = tpu.matmul %12, %19, %cst_20 {dimension_numbers = #tpu.dot_dimension_numbers<[1], [0], [0], [1], [0, 0, 1, 1], [], []>} : vector<8x128xf32>, vector<128x512xf32>, vector<8x512xf32> -> vector<8x512xf32>
    %21 = arith.addf %17, %20 : vector<8x512xf32>
    %22 = vector.extract_strided_slice %21 {offsets = [0, 0], sizes = [8, 128], strides = [1, 1]} : vector<8x512xf32> to vector<8x128xf32>
    %23 = arith.negf %22 : vector<8x128xf32>
    %24 = math.exp %23 : vector<8x128xf32>
    %cst_21 = arith.constant 1.000000e+00 : f32
    %25 = vector.broadcast %cst_21 : f32 to vector<8x128xf32>
    %26 = arith.addf %25, %24 : vector<8x128xf32>
    %27 = arith.divf %25, %26 : vector<8x128xf32>
    %28 = vector.extract_strided_slice %21 {offsets = [0, 128], sizes = [8, 128], strides = [1, 1]} : vector<8x512xf32> to vector<8x128xf32>
    %29 = arith.negf %28 : vector<8x128xf32>
    %30 = math.exp %29 : vector<8x128xf32>
    %cst_22 = arith.constant 1.000000e+00 : f32
    %31 = vector.broadcast %cst_22 : f32 to vector<8x128xf32>
    %32 = arith.addf %31, %30 : vector<8x128xf32>
    %33 = arith.divf %31, %32 : vector<8x128xf32>
    %34 = vector.extract_strided_slice %21 {offsets = [0, 256], sizes = [8, 128], strides = [1, 1]} : vector<8x512xf32> to vector<8x128xf32>
    %35 = math.tanh %34 : vector<8x128xf32>
    %36 = vector.extract_strided_slice %21 {offsets = [0, 384], sizes = [8, 128], strides = [1, 1]} : vector<8x512xf32> to vector<8x128xf32>
    %37 = arith.negf %36 : vector<8x128xf32>
    %38 = math.exp %37 : vector<8x128xf32>
    %cst_23 = arith.constant 1.000000e+00 : f32
    %39 = vector.broadcast %cst_23 : f32 to vector<8x128xf32>
    %40 = arith.addf %39, %38 : vector<8x128xf32>
    %41 = arith.divf %39, %40 : vector<8x128xf32>
    %42 = arith.mulf %33, %13 : vector<8x128xf32>
    %43 = arith.mulf %27, %35 : vector<8x128xf32>
    %44 = arith.addf %42, %43 : vector<8x128xf32>
    %45 = math.tanh %44 : vector<8x128xf32>
    %46 = arith.mulf %41, %45 : vector<8x128xf32>
    %47 = arith.index_cast %15 : i32 to index
    %c0_24 = arith.constant 0 : index
    %48 = vector.load %arg12[%47, %c0_24] : memref<64x128xf32, #tpu.memory_space<vmem>>, vector<8x128xf32>
    tpu.vector_store %arg12[%47, %c0_24], %46 {strides = array<i32>} : memref<64x128xf32, #tpu.memory_space<vmem>>, vector<8x128xf32>,
    %c1_i32 = arith.constant 1 : i32
    %c8_i32_25 = arith.constant 8 : i32
    %49 = arith.muli %c1_i32, %c8_i32_25 : i32
    %50 = tpu.assume_multiple %49, 8 : i32
    %51 = arith.index_cast %50 : i32 to index
    %c0_26 = arith.constant 0 : index
    %52 = vector.load %arg13[%51, %c0_26] : memref<64x512xf32, #tpu.memory_space<vmem>>, vector<8x512xf32>
    %c0_27 = arith.constant 0 : index
    %c0_28 = arith.constant 0 : index
    %c0_29 = arith.constant 0 : index
    %53 = vector.load %arg3[%c0_27, %c0_28, %c0_29] : memref<2x128x512xf32, #tpu.memory_space<vmem>>, vector<1x128x512xf32>
    %54 = vector.shape_cast %53 : vector<1x128x512xf32> to vector<128x512xf32>
    %cst_30 = arith.constant dense<0.000000e+00> : vector<8x512xf32>
    %55 = tpu.matmul %46, %54, %cst_30 {dimension_numbers = #tpu.dot_dimension_numbers<[1], [0], [0], [1], [0, 0, 1, 1], [], []>} : vector<8x128xf32>, vector<128x512xf32>, vector<8x512xf32> -> vector<8x512xf32>
    %56 = arith.addf %52, %55 : vector<8x512xf32>
    %57 = vector.extract_strided_slice %56 {offsets = [0, 0], sizes = [8, 128], strides = [1, 1]} : vector<8x512xf32> to vector<8x128xf32>
    %58 = arith.negf %57 : vector<8x128xf32>
    %59 = math.exp %58 : vector<8x128xf32>
    %cst_31 = arith.constant 1.000000e+00 : f32
    %60 = vector.broadcast %cst_31 : f32 to vector<8x128xf32>
    %61 = arith.addf %60, %59 : vector<8x128xf32>
    %62 = arith.divf %60, %61 : vector<8x128xf32>
    %63 = vector.extract_strided_slice %56 {offsets = [0, 128], sizes = [8, 128], strides = [1, 1]} : vector<8x512xf32> to vector<8x128xf32>
    %64 = arith.negf %63 : vector<8x128xf32>
    %65 = math.exp %64 : vector<8x128xf32>
    %cst_32 = arith.constant 1.000000e+00 : f32
    %66 = vector.broadcast %cst_32 : f32 to vector<8x128xf32>
    %67 = arith.addf %66, %65 : vector<8x128xf32>
    %68 = arith.divf %66, %67 : vector<8x128xf32>
    %69 = vector.extract_strided_slice %56 {offsets = [0, 256], sizes = [8, 128], strides = [1, 1]} : vector<8x512xf32> to vector<8x128xf32>
    %70 = math.tanh %69 : vector<8x128xf32>
    %71 = vector.extract_strided_slice %56 {offsets = [0, 384], sizes = [8, 128], strides = [1, 1]} : vector<8x512xf32> to vector<8x128xf32>
    %72 = arith.negf %71 : vector<8x128xf32>
    %73 = math.exp %72 : vector<8x128xf32>
    %cst_33 = arith.constant 1.000000e+00 : f32
    %74 = vector.broadcast %cst_33 : f32 to vector<8x128xf32>
    %75 = arith.addf %74, %73 : vector<8x128xf32>
    %76 = arith.divf %74, %75 : vector<8x128xf32>
    %77 = arith.mulf %68, %44 : vector<8x128xf32>
    %78 = arith.mulf %62, %70 : vector<8x128xf32>
    %79 = arith.addf %77, %78 : vector<8x128xf32>
    %80 = math.tanh %79 : vector<8x128xf32>
    %81 = arith.mulf %76, %80 : vector<8x128xf32>
    %82 = arith.index_cast %50 : i32 to index
    %c0_34 = arith.constant 0 : index
    %83 = vector.load %arg12[%82, %c0_34] : memref<64x128xf32, #tpu.memory_space<vmem>>, vector<8x128xf32>
    tpu.vector_store %arg12[%82, %c0_34], %81 {strides = array<i32>} : memref<64x128xf32, #tpu.memory_space<vmem>>, vector<8x128xf32>,
    %c2_i32 = arith.constant 2 : i32
    %c8_i32_35 = arith.constant 8 : i32
    %84 = arith.muli %c2_i32, %c8_i32_35 : i32
    %85 = tpu.assume_multiple %84, 8 : i32
    %86 = arith.index_cast %85 : i32 to index
    %c0_36 = arith.constant 0 : index
    %87 = vector.load %arg13[%86, %c0_36] : memref<64x512xf32, #tpu.memory_space<vmem>>, vector<8x512xf32>
    %c0_37 = arith.constant 0 : index
    %c0_38 = arith.constant 0 : index
    %c0_39 = arith.constant 0 : index
    %88 = vector.load %arg3[%c0_37, %c0_38, %c0_39] : memref<2x128x512xf32, #tpu.memory_space<vmem>>, vector<1x128x512xf32>
    %89 = vector.shape_cast %88 : vector<1x128x512xf32> to vector<128x512xf32>
    %cst_40 = arith.constant dense<0.000000e+00> : vector<8x512xf32>
    %90 = tpu.matmul %81, %89, %cst_40 {dimension_numbers = #tpu.dot_dimension_numbers<[1], [0], [0], [1], [0, 0, 1, 1], [], []>} : vector<8x128xf32>, vector<128x512xf32>, vector<8x512xf32> -> vector<8x512xf32>
    %91 = arith.addf %87, %90 : vector<8x512xf32>
    %92 = vector.extract_strided_slice %91 {offsets = [0, 0], sizes = [8, 128], strides = [1, 1]} : vector<8x512xf32> to vector<8x128xf32>
    %93 = arith.negf %92 : vector<8x128xf32>
    %94 = math.exp %93 : vector<8x128xf32>
    %cst_41 = arith.constant 1.000000e+00 : f32
    %95 = vector.broadcast %cst_41 : f32 to vector<8x128xf32>
    %96 = arith.addf %95, %94 : vector<8x128xf32>
    %97 = arith.divf %95, %96 : vector<8x128xf32>
    %98 = vector.extract_strided_slice %91 {offsets = [0, 128], sizes = [8, 128], strides = [1, 1]} : vector<8x512xf32> to vector<8x128xf32>
    %99 = arith.negf %98 : vector<8x128xf32>
    %100 = math.exp %99 : vector<8x128xf32>
    %cst_42 = arith.constant 1.000000e+00 : f32
    %101 = vector.broadcast %cst_42 : f32 to vector<8x128xf32>
    %102 = arith.addf %101, %100 : vector<8x128xf32>
    %103 = arith.divf %101, %102 : vector<8x128xf32>
    %104 = vector.extract_strided_slice %91 {offsets = [0, 256], sizes = [8, 128], strides = [1, 1]} : vector<8x512xf32> to vector<8x128xf32>
    %105 = math.tanh %104 : vector<8x128xf32>
    %106 = vector.extract_strided_slice %91 {offsets = [0, 384], sizes = [8, 128], strides = [1, 1]} : vector<8x512xf32> to vector<8x128xf32>
    %107 = arith.negf %106 : vector<8x128xf32>
    %108 = math.exp %107 : vector<8x128xf32>
    %cst_43 = arith.constant 1.000000e+00 : f32
    %109 = vector.broadcast %cst_43 : f32 to vector<8x128xf32>
    %110 = arith.addf %109, %108 : vector<8x128xf32>
    %111 = arith.divf %109, %110 : vector<8x128xf32>
    %112 = arith.mulf %103, %79 : vector<8x128xf32>
    %113 = arith.mulf %97, %105 : vector<8x128xf32>
    %114 = arith.addf %112, %113 : vector<8x128xf32>
    %115 = math.tanh %114 : vector<8x128xf32>
    %116 = arith.mulf %111, %115 : vector<8x128xf32>
    %117 = arith.index_cast %85 : i32 to index
    %c0_44 = arith.constant 0 : index
    %118 = vector.load %arg12[%117, %c0_44] : memref<64x128xf32, #tpu.memory_space<vmem>>, vector<8x128xf32>
    tpu.vector_store %arg12[%117, %c0_44], %116 {strides = array<i32>} : memref<64x128xf32, #tpu.memory_space<vmem>>, vector<8x128xf32>,
    %c3_i32 = arith.constant 3 : i32
    %c8_i32_45 = arith.constant 8 : i32
    %119 = arith.muli %c3_i32, %c8_i32_45 : i32
    %120 = tpu.assume_multiple %119, 8 : i32
    %121 = arith.index_cast %120 : i32 to index
    %c0_46 = arith.constant 0 : index
    %122 = vector.load %arg13[%121, %c0_46] : memref<64x512xf32, #tpu.memory_space<vmem>>, vector<8x512xf32>
    %c0_47 = arith.constant 0 : index
    %c0_48 = arith.constant 0 : index
    %c0_49 = arith.constant 0 : index
    %123 = vector.load %arg3[%c0_47, %c0_48, %c0_49] : memref<2x128x512xf32, #tpu.memory_space<vmem>>, vector<1x128x512xf32>
    %124 = vector.shape_cast %123 : vector<1x128x512xf32> to vector<128x512xf32>
    %cst_50 = arith.constant dense<0.000000e+00> : vector<8x512xf32>
    %125 = tpu.matmul %116, %124, %cst_50 {dimension_numbers = #tpu.dot_dimension_numbers<[1], [0], [0], [1], [0, 0, 1, 1], [], []>} : vector<8x128xf32>, vector<128x512xf32>, vector<8x512xf32> -> vector<8x512xf32>
    %126 = arith.addf %122, %125 : vector<8x512xf32>
    %127 = vector.extract_strided_slice %126 {offsets = [0, 0], sizes = [8, 128], strides = [1, 1]} : vector<8x512xf32> to vector<8x128xf32>
    %128 = arith.negf %127 : vector<8x128xf32>
    %129 = math.exp %128 : vector<8x128xf32>
    %cst_51 = arith.constant 1.000000e+00 : f32
    %130 = vector.broadcast %cst_51 : f32 to vector<8x128xf32>
    %131 = arith.addf %130, %129 : vector<8x128xf32>
    %132 = arith.divf %130, %131 : vector<8x128xf32>
    %133 = vector.extract_strided_slice %126 {offsets = [0, 128], sizes = [8, 128], strides = [1, 1]} : vector<8x512xf32> to vector<8x128xf32>
    %134 = arith.negf %133 : vector<8x128xf32>
    %135 = math.exp %134 : vector<8x128xf32>
    %cst_52 = arith.constant 1.000000e+00 : f32
    %136 = vector.broadcast %cst_52 : f32 to vector<8x128xf32>
    %137 = arith.addf %136, %135 : vector<8x128xf32>
    %138 = arith.divf %136, %137 : vector<8x128xf32>
    %139 = vector.extract_strided_slice %126 {offsets = [0, 256], sizes = [8, 128], strides = [1, 1]} : vector<8x512xf32> to vector<8x128xf32>
    %140 = math.tanh %139 : vector<8x128xf32>
    %141 = vector.extract_strided_slice %126 {offsets = [0, 384], sizes = [8, 128], strides = [1, 1]} : vector<8x512xf32> to vector<8x128xf32>
    %142 = arith.negf %141 : vector<8x128xf32>
    %143 = math.exp %142 : vector<8x128xf32>
    %cst_53 = arith.constant 1.000000e+00 : f32
    %144 = vector.broadcast %cst_53 : f32 to vector<8x128xf32>
    %145 = arith.addf %144, %143 : vector<8x128xf32>
    %146 = arith.divf %144, %145 : vector<8x128xf32>
    %147 = arith.mulf %138, %114 : vector<8x128xf32>
    %148 = arith.mulf %132, %140 : vector<8x128xf32>
    %149 = arith.addf %147, %148 : vector<8x128xf32>
    %150 = math.tanh %149 : vector<8x128xf32>
    %151 = arith.mulf %146, %150 : vector<8x128xf32>
    %152 = arith.index_cast %120 : i32 to index
    %c0_54 = arith.constant 0 : index
    %153 = vector.load %arg12[%152, %c0_54] : memref<64x128xf32, #tpu.memory_space<vmem>>, vector<8x128xf32>
    tpu.vector_store %arg12[%152, %c0_54], %151 {strides = array<i32>} : memref<64x128xf32, #tpu.memory_space<vmem>>, vector<8x128xf32>,
    %c4_i32 = arith.constant 4 : i32
    %c8_i32_55 = arith.constant 8 : i32
    %154 = arith.muli %c4_i32, %c8_i32_55 : i32
    %155 = tpu.assume_multiple %154, 8 : i32
    %156 = arith.index_cast %155 : i32 to index
    %c0_56 = arith.constant 0 : index
    %157 = vector.load %arg13[%156, %c0_56] : memref<64x512xf32, #tpu.memory_space<vmem>>, vector<8x512xf32>
    %c0_57 = arith.constant 0 : index
    %c0_58 = arith.constant 0 : index
    %c0_59 = arith.constant 0 : index
    %158 = vector.load %arg3[%c0_57, %c0_58, %c0_59] : memref<2x128x512xf32, #tpu.memory_space<vmem>>, vector<1x128x512xf32>
    %159 = vector.shape_cast %158 : vector<1x128x512xf32> to vector<128x512xf32>
    %cst_60 = arith.constant dense<0.000000e+00> : vector<8x512xf32>
    %160 = tpu.matmul %151, %159, %cst_60 {dimension_numbers = #tpu.dot_dimension_numbers<[1], [0], [0], [1], [0, 0, 1, 1], [], []>} : vector<8x128xf32>, vector<128x512xf32>, vector<8x512xf32> -> vector<8x512xf32>
    %161 = arith.addf %157, %160 : vector<8x512xf32>
    %162 = vector.extract_strided_slice %161 {offsets = [0, 0], sizes = [8, 128], strides = [1, 1]} : vector<8x512xf32> to vector<8x128xf32>
    %163 = arith.negf %162 : vector<8x128xf32>
    %164 = math.exp %163 : vector<8x128xf32>
    %cst_61 = arith.constant 1.000000e+00 : f32
    %165 = vector.broadcast %cst_61 : f32 to vector<8x128xf32>
    %166 = arith.addf %165, %164 : vector<8x128xf32>
    %167 = arith.divf %165, %166 : vector<8x128xf32>
    %168 = vector.extract_strided_slice %161 {offsets = [0, 128], sizes = [8, 128], strides = [1, 1]} : vector<8x512xf32> to vector<8x128xf32>
    %169 = arith.negf %168 : vector<8x128xf32>
    %170 = math.exp %169 : vector<8x128xf32>
    %cst_62 = arith.constant 1.000000e+00 : f32
    %171 = vector.broadcast %cst_62 : f32 to vector<8x128xf32>
    %172 = arith.addf %171, %170 : vector<8x128xf32>
    %173 = arith.divf %171, %172 : vector<8x128xf32>
    %174 = vector.extract_strided_slice %161 {offsets = [0, 256], sizes = [8, 128], strides = [1, 1]} : vector<8x512xf32> to vector<8x128xf32>
    %175 = math.tanh %174 : vector<8x128xf32>
    %176 = vector.extract_strided_slice %161 {offsets = [0, 384], sizes = [8, 128], strides = [1, 1]} : vector<8x512xf32> to vector<8x128xf32>
    %177 = arith.negf %176 : vector<8x128xf32>
    %178 = math.exp %177 : vector<8x128xf32>
    %cst_63 = arith.constant 1.000000e+00 : f32
    %179 = vector.broadcast %cst_63 : f32 to vector<8x128xf32>
    %180 = arith.addf %179, %178 : vector<8x128xf32>
    %181 = arith.divf %179, %180 : vector<8x128xf32>
    %182 = arith.mulf %173, %149 : vector<8x128xf32>
    %183 = arith.mulf %167, %175 : vector<8x128xf32>
    %184 = arith.addf %182, %183 : vector<8x128xf32>
    %185 = math.tanh %184 : vector<8x128xf32>
    %186 = arith.mulf %181, %185 : vector<8x128xf32>
    %187 = arith.index_cast %155 : i32 to index
    %c0_64 = arith.constant 0 : index
    %188 = vector.load %arg12[%187, %c0_64] : memref<64x128xf32, #tpu.memory_space<vmem>>, vector<8x128xf32>
    tpu.vector_store %arg12[%187, %c0_64], %186 {strides = array<i32>} : memref<64x128xf32, #tpu.memory_space<vmem>>, vector<8x128xf32>,
    %c5_i32 = arith.constant 5 : i32
    %c8_i32_65 = arith.constant 8 : i32
    %189 = arith.muli %c5_i32, %c8_i32_65 : i32
    %190 = tpu.assume_multiple %189, 8 : i32
    %191 = arith.index_cast %190 : i32 to index
    %c0_66 = arith.constant 0 : index
    %192 = vector.load %arg13[%191, %c0_66] : memref<64x512xf32, #tpu.memory_space<vmem>>, vector<8x512xf32>
    %c0_67 = arith.constant 0 : index
    %c0_68 = arith.constant 0 : index
    %c0_69 = arith.constant 0 : index
    %193 = vector.load %arg3[%c0_67, %c0_68, %c0_69] : memref<2x128x512xf32, #tpu.memory_space<vmem>>, vector<1x128x512xf32>
    %194 = vector.shape_cast %193 : vector<1x128x512xf32> to vector<128x512xf32>
    %cst_70 = arith.constant dense<0.000000e+00> : vector<8x512xf32>
    %195 = tpu.matmul %186, %194, %cst_70 {dimension_numbers = #tpu.dot_dimension_numbers<[1], [0], [0], [1], [0, 0, 1, 1], [], []>} : vector<8x128xf32>, vector<128x512xf32>, vector<8x512xf32> -> vector<8x512xf32>
    %196 = arith.addf %192, %195 : vector<8x512xf32>
    %197 = vector.extract_strided_slice %196 {offsets = [0, 0], sizes = [8, 128], strides = [1, 1]} : vector<8x512xf32> to vector<8x128xf32>
    %198 = arith.negf %197 : vector<8x128xf32>
    %199 = math.exp %198 : vector<8x128xf32>
    %cst_71 = arith.constant 1.000000e+00 : f32
    %200 = vector.broadcast %cst_71 : f32 to vector<8x128xf32>
    %201 = arith.addf %200, %199 : vector<8x128xf32>
    %202 = arith.divf %200, %201 : vector<8x128xf32>
    %203 = vector.extract_strided_slice %196 {offsets = [0, 128], sizes = [8, 128], strides = [1, 1]} : vector<8x512xf32> to vector<8x128xf32>
    %204 = arith.negf %203 : vector<8x128xf32>
    %205 = math.exp %204 : vector<8x128xf32>
    %cst_72 = arith.constant 1.000000e+00 : f32
    %206 = vector.broadcast %cst_72 : f32 to vector<8x128xf32>
    %207 = arith.addf %206, %205 : vector<8x128xf32>
    %208 = arith.divf %206, %207 : vector<8x128xf32>
    %209 = vector.extract_strided_slice %196 {offsets = [0, 256], sizes = [8, 128], strides = [1, 1]} : vector<8x512xf32> to vector<8x128xf32>
    %210 = math.tanh %209 : vector<8x128xf32>
    %211 = vector.extract_strided_slice %196 {offsets = [0, 384], sizes = [8, 128], strides = [1, 1]} : vector<8x512xf32> to vector<8x128xf32>
    %212 = arith.negf %211 : vector<8x128xf32>
    %213 = math.exp %212 : vector<8x128xf32>
    %cst_73 = arith.constant 1.000000e+00 : f32
    %214 = vector.broadcast %cst_73 : f32 to vector<8x128xf32>
    %215 = arith.addf %214, %213 : vector<8x128xf32>
    %216 = arith.divf %214, %215 : vector<8x128xf32>
    %217 = arith.mulf %208, %184 : vector<8x128xf32>
    %218 = arith.mulf %202, %210 : vector<8x128xf32>
    %219 = arith.addf %217, %218 : vector<8x128xf32>
    %220 = math.tanh %219 : vector<8x128xf32>
    %221 = arith.mulf %216, %220 : vector<8x128xf32>
    %222 = arith.index_cast %190 : i32 to index
    %c0_74 = arith.constant 0 : index
    %223 = vector.load %arg12[%222, %c0_74] : memref<64x128xf32, #tpu.memory_space<vmem>>, vector<8x128xf32>
    tpu.vector_store %arg12[%222, %c0_74], %221 {strides = array<i32>} : memref<64x128xf32, #tpu.memory_space<vmem>>, vector<8x128xf32>,
    %c6_i32 = arith.constant 6 : i32
    %c8_i32_75 = arith.constant 8 : i32
    %224 = arith.muli %c6_i32, %c8_i32_75 : i32
    %225 = tpu.assume_multiple %224, 8 : i32
    %226 = arith.index_cast %225 : i32 to index
    %c0_76 = arith.constant 0 : index
    %227 = vector.load %arg13[%226, %c0_76] : memref<64x512xf32, #tpu.memory_space<vmem>>, vector<8x512xf32>
    %c0_77 = arith.constant 0 : index
    %c0_78 = arith.constant 0 : index
    %c0_79 = arith.constant 0 : index
    %228 = vector.load %arg3[%c0_77, %c0_78, %c0_79] : memref<2x128x512xf32, #tpu.memory_space<vmem>>, vector<1x128x512xf32>
    %229 = vector.shape_cast %228 : vector<1x128x512xf32> to vector<128x512xf32>
    %cst_80 = arith.constant dense<0.000000e+00> : vector<8x512xf32>
    %230 = tpu.matmul %221, %229, %cst_80 {dimension_numbers = #tpu.dot_dimension_numbers<[1], [0], [0], [1], [0, 0, 1, 1], [], []>} : vector<8x128xf32>, vector<128x512xf32>, vector<8x512xf32> -> vector<8x512xf32>
    %231 = arith.addf %227, %230 : vector<8x512xf32>
    %232 = vector.extract_strided_slice %231 {offsets = [0, 0], sizes = [8, 128], strides = [1, 1]} : vector<8x512xf32> to vector<8x128xf32>
    %233 = arith.negf %232 : vector<8x128xf32>
    %234 = math.exp %233 : vector<8x128xf32>
    %cst_81 = arith.constant 1.000000e+00 : f32
    %235 = vector.broadcast %cst_81 : f32 to vector<8x128xf32>
    %236 = arith.addf %235, %234 : vector<8x128xf32>
    %237 = arith.divf %235, %236 : vector<8x128xf32>
    %238 = vector.extract_strided_slice %231 {offsets = [0, 128], sizes = [8, 128], strides = [1, 1]} : vector<8x512xf32> to vector<8x128xf32>
    %239 = arith.negf %238 : vector<8x128xf32>
    %240 = math.exp %239 : vector<8x128xf32>
    %cst_82 = arith.constant 1.000000e+00 : f32
    %241 = vector.broadcast %cst_82 : f32 to vector<8x128xf32>
    %242 = arith.addf %241, %240 : vector<8x128xf32>
    %243 = arith.divf %241, %242 : vector<8x128xf32>
    %244 = vector.extract_strided_slice %231 {offsets = [0, 256], sizes = [8, 128], strides = [1, 1]} : vector<8x512xf32> to vector<8x128xf32>
    %245 = math.tanh %244 : vector<8x128xf32>
    %246 = vector.extract_strided_slice %231 {offsets = [0, 384], sizes = [8, 128], strides = [1, 1]} : vector<8x512xf32> to vector<8x128xf32>
    %247 = arith.negf %246 : vector<8x128xf32>
    %248 = math.exp %247 : vector<8x128xf32>
    %cst_83 = arith.constant 1.000000e+00 : f32
    %249 = vector.broadcast %cst_83 : f32 to vector<8x128xf32>
    %250 = arith.addf %249, %248 : vector<8x128xf32>
    %251 = arith.divf %249, %250 : vector<8x128xf32>
    %252 = arith.mulf %243, %219 : vector<8x128xf32>
    %253 = arith.mulf %237, %245 : vector<8x128xf32>
    %254 = arith.addf %252, %253 : vector<8x128xf32>
    %255 = math.tanh %254 : vector<8x128xf32>
    %256 = arith.mulf %251, %255 : vector<8x128xf32>
    %257 = arith.index_cast %225 : i32 to index
    %c0_84 = arith.constant 0 : index
    %258 = vector.load %arg12[%257, %c0_84] : memref<64x128xf32, #tpu.memory_space<vmem>>, vector<8x128xf32>
    tpu.vector_store %arg12[%257, %c0_84], %256 {strides = array<i32>} : memref<64x128xf32, #tpu.memory_space<vmem>>, vector<8x128xf32>,
    %c7_i32 = arith.constant 7 : i32
    %c8_i32_85 = arith.constant 8 : i32
    %259 = arith.muli %c7_i32, %c8_i32_85 : i32
    %260 = tpu.assume_multiple %259, 8 : i32
    %261 = arith.index_cast %260 : i32 to index
    %c0_86 = arith.constant 0 : index
    %262 = vector.load %arg13[%261, %c0_86] : memref<64x512xf32, #tpu.memory_space<vmem>>, vector<8x512xf32>
    %c0_87 = arith.constant 0 : index
    %c0_88 = arith.constant 0 : index
    %c0_89 = arith.constant 0 : index
    %263 = vector.load %arg3[%c0_87, %c0_88, %c0_89] : memref<2x128x512xf32, #tpu.memory_space<vmem>>, vector<1x128x512xf32>
    %264 = vector.shape_cast %263 : vector<1x128x512xf32> to vector<128x512xf32>
    %cst_90 = arith.constant dense<0.000000e+00> : vector<8x512xf32>
    %265 = tpu.matmul %256, %264, %cst_90 {dimension_numbers = #tpu.dot_dimension_numbers<[1], [0], [0], [1], [0, 0, 1, 1], [], []>} : vector<8x128xf32>, vector<128x512xf32>, vector<8x512xf32> -> vector<8x512xf32>
    %266 = arith.addf %262, %265 : vector<8x512xf32>
    %267 = vector.extract_strided_slice %266 {offsets = [0, 0], sizes = [8, 128], strides = [1, 1]} : vector<8x512xf32> to vector<8x128xf32>
    %268 = arith.negf %267 : vector<8x128xf32>
    %269 = math.exp %268 : vector<8x128xf32>
    %cst_91 = arith.constant 1.000000e+00 : f32
    %270 = vector.broadcast %cst_91 : f32 to vector<8x128xf32>
    %271 = arith.addf %270, %269 : vector<8x128xf32>
    %272 = arith.divf %270, %271 : vector<8x128xf32>
    %273 = vector.extract_strided_slice %266 {offsets = [0, 128], sizes = [8, 128], strides = [1, 1]} : vector<8x512xf32> to vector<8x128xf32>
    %274 = arith.negf %273 : vector<8x128xf32>
    %275 = math.exp %274 : vector<8x128xf32>
    %cst_92 = arith.constant 1.000000e+00 : f32
    %276 = vector.broadcast %cst_92 : f32 to vector<8x128xf32>
    %277 = arith.addf %276, %275 : vector<8x128xf32>
    %278 = arith.divf %276, %277 : vector<8x128xf32>
    %279 = vector.extract_strided_slice %266 {offsets = [0, 256], sizes = [8, 128], strides = [1, 1]} : vector<8x512xf32> to vector<8x128xf32>
    %280 = math.tanh %279 : vector<8x128xf32>
    %281 = vector.extract_strided_slice %266 {offsets = [0, 384], sizes = [8, 128], strides = [1, 1]} : vector<8x512xf32> to vector<8x128xf32>
    %282 = arith.negf %281 : vector<8x128xf32>
    %283 = math.exp %282 : vector<8x128xf32>
    %cst_93 = arith.constant 1.000000e+00 : f32
    %284 = vector.broadcast %cst_93 : f32 to vector<8x128xf32>
    %285 = arith.addf %284, %283 : vector<8x128xf32>
    %286 = arith.divf %284, %285 : vector<8x128xf32>
    %287 = arith.mulf %278, %254 : vector<8x128xf32>
    %288 = arith.mulf %272, %280 : vector<8x128xf32>
    %289 = arith.addf %287, %288 : vector<8x128xf32>
    %290 = math.tanh %289 : vector<8x128xf32>
    %291 = arith.mulf %286, %290 : vector<8x128xf32>
    %292 = arith.index_cast %260 : i32 to index
    %c0_94 = arith.constant 0 : index
    %293 = vector.load %arg12[%292, %c0_94] : memref<64x128xf32, #tpu.memory_space<vmem>>, vector<8x128xf32>
    tpu.vector_store %arg12[%292, %c0_94], %291 {strides = array<i32>} : memref<64x128xf32, #tpu.memory_space<vmem>>, vector<8x128xf32>,
    %c8_i32_95 = arith.constant 8 : i32
    %c0_96 = arith.constant 0 : index
    %c0_97 = arith.constant 0 : index
    %294 = vector.load %arg12[%c0_96, %c0_97] : memref<64x128xf32, #tpu.memory_space<vmem>>, vector<64x128xf32>
    %c1 = arith.constant 1 : index
    %c0_98 = arith.constant 0 : index
    %c0_99 = arith.constant 0 : index
    %295 = vector.load %arg2[%c1, %c0_98, %c0_99] : memref<2x128x512xf32, #tpu.memory_space<vmem>>, vector<1x128x512xf32>
    %296 = vector.shape_cast %295 : vector<1x128x512xf32> to vector<128x512xf32>
    %cst_100 = arith.constant dense<0.000000e+00> : vector<64x512xf32>
    %297 = tpu.matmul %294, %296, %cst_100 {dimension_numbers = #tpu.dot_dimension_numbers<[1], [0], [0], [1], [0, 0, 1, 1], [], []>} : vector<64x128xf32>, vector<128x512xf32>, vector<64x512xf32> -> vector<64x512xf32>
    %c1_101 = arith.constant 1 : index
    %c0_102 = arith.constant 0 : index
    %c0_103 = arith.constant 0 : index
    %298 = vector.load %arg4[%c1_101, %c0_102, %c0_103] : memref<2x1x512xf32, #tpu.memory_space<vmem>>, vector<1x1x512xf32>
    %299 = vector.shape_cast %298 : vector<1x1x512xf32> to vector<1x512xf32>
    %300 = vector.broadcast %299 : vector<1x512xf32> to vector<64x512xf32>
    %301 = arith.addf %297, %300 : vector<64x512xf32>
    %c0_104 = arith.constant 0 : index
    %c0_105 = arith.constant 0 : index
    %302 = vector.load %arg13[%c0_104, %c0_105] : memref<64x512xf32, #tpu.memory_space<vmem>>, vector<64x512xf32>
    tpu.vector_store %arg13[%c0_104, %c0_105], %301 {strides = array<i32>} : memref<64x512xf32, #tpu.memory_space<vmem>>, vector<64x512xf32>,
    %cst_106 = arith.constant 0.000000e+00 : f32
    %303 = vector.broadcast %cst_106 : f32 to vector<8x128xf32>
    %cst_107 = arith.constant 0.000000e+00 : f32
    %304 = vector.broadcast %cst_107 : f32 to vector<8x128xf32>
    %c0_i32_108 = arith.constant 0 : i32
    %c8_i32_109 = arith.constant 8 : i32
    %305 = arith.muli %c0_i32_108, %c8_i32_109 : i32
    %306 = tpu.assume_multiple %305, 8 : i32
    %307 = arith.index_cast %306 : i32 to index
    %c0_110 = arith.constant 0 : index
    %308 = vector.load %arg13[%307, %c0_110] : memref<64x512xf32, #tpu.memory_space<vmem>>, vector<8x512xf32>
    %c1_111 = arith.constant 1 : index
    %c0_112 = arith.constant 0 : index
    %c0_113 = arith.constant 0 : index
    %309 = vector.load %arg3[%c1_111, %c0_112, %c0_113] : memref<2x128x512xf32, #tpu.memory_space<vmem>>, vector<1x128x512xf32>
    %310 = vector.shape_cast %309 : vector<1x128x512xf32> to vector<128x512xf32>
    %cst_114 = arith.constant dense<0.000000e+00> : vector<8x512xf32>
    %311 = tpu.matmul %303, %310, %cst_114 {dimension_numbers = #tpu.dot_dimension_numbers<[1], [0], [0], [1], [0, 0, 1, 1], [], []>} : vector<8x128xf32>, vector<128x512xf32>, vector<8x512xf32> -> vector<8x512xf32>
    %312 = arith.addf %308, %311 : vector<8x512xf32>
    %313 = vector.extract_strided_slice %312 {offsets = [0, 0], sizes = [8, 128], strides = [1, 1]} : vector<8x512xf32> to vector<8x128xf32>
    %314 = arith.negf %313 : vector<8x128xf32>
    %315 = math.exp %314 : vector<8x128xf32>
    %cst_115 = arith.constant 1.000000e+00 : f32
    %316 = vector.broadcast %cst_115 : f32 to vector<8x128xf32>
    %317 = arith.addf %316, %315 : vector<8x128xf32>
    %318 = arith.divf %316, %317 : vector<8x128xf32>
    %319 = vector.extract_strided_slice %312 {offsets = [0, 128], sizes = [8, 128], strides = [1, 1]} : vector<8x512xf32> to vector<8x128xf32>
    %320 = arith.negf %319 : vector<8x128xf32>
    %321 = math.exp %320 : vector<8x128xf32>
    %cst_116 = arith.constant 1.000000e+00 : f32
    %322 = vector.broadcast %cst_116 : f32 to vector<8x128xf32>
    %323 = arith.addf %322, %321 : vector<8x128xf32>
    %324 = arith.divf %322, %323 : vector<8x128xf32>
    %325 = vector.extract_strided_slice %312 {offsets = [0, 256], sizes = [8, 128], strides = [1, 1]} : vector<8x512xf32> to vector<8x128xf32>
    %326 = math.tanh %325 : vector<8x128xf32>
    %327 = vector.extract_strided_slice %312 {offsets = [0, 384], sizes = [8, 128], strides = [1, 1]} : vector<8x512xf32> to vector<8x128xf32>
    %328 = arith.negf %327 : vector<8x128xf32>
    %329 = math.exp %328 : vector<8x128xf32>
    %cst_117 = arith.constant 1.000000e+00 : f32
    %330 = vector.broadcast %cst_117 : f32 to vector<8x128xf32>
    %331 = arith.addf %330, %329 : vector<8x128xf32>
    %332 = arith.divf %330, %331 : vector<8x128xf32>
    %333 = arith.mulf %324, %304 : vector<8x128xf32>
    %334 = arith.mulf %318, %326 : vector<8x128xf32>
    %335 = arith.addf %333, %334 : vector<8x128xf32>
    %336 = math.tanh %335 : vector<8x128xf32>
    %337 = arith.mulf %332, %336 : vector<8x128xf32>
    %338 = arith.index_cast %306 : i32 to index
    %c0_118 = arith.constant 0 : index
    %339 = vector.load %arg12[%338, %c0_118] : memref<64x128xf32, #tpu.memory_space<vmem>>, vector<8x128xf32>
    tpu.vector_store %arg12[%338, %c0_118], %337 {strides = array<i32>} : memref<64x128xf32, #tpu.memory_space<vmem>>, vector<8x128xf32>,
    %c1_i32_119 = arith.constant 1 : i32
    %c8_i32_120 = arith.constant 8 : i32
    %340 = arith.muli %c1_i32_119, %c8_i32_120 : i32
    %341 = tpu.assume_multiple %340, 8 : i32
    %342 = arith.index_cast %341 : i32 to index
    %c0_121 = arith.constant 0 : index
    %343 = vector.load %arg13[%342, %c0_121] : memref<64x512xf32, #tpu.memory_space<vmem>>, vector<8x512xf32>
    %c1_122 = arith.constant 1 : index
    %c0_123 = arith.constant 0 : index
    %c0_124 = arith.constant 0 : index
    %344 = vector.load %arg3[%c1_122, %c0_123, %c0_124] : memref<2x128x512xf32, #tpu.memory_space<vmem>>, vector<1x128x512xf32>
    %345 = vector.shape_cast %344 : vector<1x128x512xf32> to vector<128x512xf32>
    %cst_125 = arith.constant dense<0.000000e+00> : vector<8x512xf32>
    %346 = tpu.matmul %337, %345, %cst_125 {dimension_numbers = #tpu.dot_dimension_numbers<[1], [0], [0], [1], [0, 0, 1, 1], [], []>} : vector<8x128xf32>, vector<128x512xf32>, vector<8x512xf32> -> vector<8x512xf32>
    %347 = arith.addf %343, %346 : vector<8x512xf32>
    %348 = vector.extract_strided_slice %347 {offsets = [0, 0], sizes = [8, 128], strides = [1, 1]} : vector<8x512xf32> to vector<8x128xf32>
    %349 = arith.negf %348 : vector<8x128xf32>
    %350 = math.exp %349 : vector<8x128xf32>
    %cst_126 = arith.constant 1.000000e+00 : f32
    %351 = vector.broadcast %cst_126 : f32 to vector<8x128xf32>
    %352 = arith.addf %351, %350 : vector<8x128xf32>
    %353 = arith.divf %351, %352 : vector<8x128xf32>
    %354 = vector.extract_strided_slice %347 {offsets = [0, 128], sizes = [8, 128], strides = [1, 1]} : vector<8x512xf32> to vector<8x128xf32>
    %355 = arith.negf %354 : vector<8x128xf32>
    %356 = math.exp %355 : vector<8x128xf32>
    %cst_127 = arith.constant 1.000000e+00 : f32
    %357 = vector.broadcast %cst_127 : f32 to vector<8x128xf32>
    %358 = arith.addf %357, %356 : vector<8x128xf32>
    %359 = arith.divf %357, %358 : vector<8x128xf32>
    %360 = vector.extract_strided_slice %347 {offsets = [0, 256], sizes = [8, 128], strides = [1, 1]} : vector<8x512xf32> to vector<8x128xf32>
    %361 = math.tanh %360 : vector<8x128xf32>
    %362 = vector.extract_strided_slice %347 {offsets = [0, 384], sizes = [8, 128], strides = [1, 1]} : vector<8x512xf32> to vector<8x128xf32>
    %363 = arith.negf %362 : vector<8x128xf32>
    %364 = math.exp %363 : vector<8x128xf32>
    %cst_128 = arith.constant 1.000000e+00 : f32
    %365 = vector.broadcast %cst_128 : f32 to vector<8x128xf32>
    %366 = arith.addf %365, %364 : vector<8x128xf32>
    %367 = arith.divf %365, %366 : vector<8x128xf32>
    %368 = arith.mulf %359, %335 : vector<8x128xf32>
    %369 = arith.mulf %353, %361 : vector<8x128xf32>
    %370 = arith.addf %368, %369 : vector<8x128xf32>
    %371 = math.tanh %370 : vector<8x128xf32>
    %372 = arith.mulf %367, %371 : vector<8x128xf32>
    %373 = arith.index_cast %341 : i32 to index
    %c0_129 = arith.constant 0 : index
    %374 = vector.load %arg12[%373, %c0_129] : memref<64x128xf32, #tpu.memory_space<vmem>>, vector<8x128xf32>
    tpu.vector_store %arg12[%373, %c0_129], %372 {strides = array<i32>} : memref<64x128xf32, #tpu.memory_space<vmem>>, vector<8x128xf32>,
    %c2_i32_130 = arith.constant 2 : i32
    %c8_i32_131 = arith.constant 8 : i32
    %375 = arith.muli %c2_i32_130, %c8_i32_131 : i32
    %376 = tpu.assume_multiple %375, 8 : i32
    %377 = arith.index_cast %376 : i32 to index
    %c0_132 = arith.constant 0 : index
    %378 = vector.load %arg13[%377, %c0_132] : memref<64x512xf32, #tpu.memory_space<vmem>>, vector<8x512xf32>
    %c1_133 = arith.constant 1 : index
    %c0_134 = arith.constant 0 : index
    %c0_135 = arith.constant 0 : index
    %379 = vector.load %arg3[%c1_133, %c0_134, %c0_135] : memref<2x128x512xf32, #tpu.memory_space<vmem>>, vector<1x128x512xf32>
    %380 = vector.shape_cast %379 : vector<1x128x512xf32> to vector<128x512xf32>
    %cst_136 = arith.constant dense<0.000000e+00> : vector<8x512xf32>
    %381 = tpu.matmul %372, %380, %cst_136 {dimension_numbers = #tpu.dot_dimension_numbers<[1], [0], [0], [1], [0, 0, 1, 1], [], []>} : vector<8x128xf32>, vector<128x512xf32>, vector<8x512xf32> -> vector<8x512xf32>
    %382 = arith.addf %378, %381 : vector<8x512xf32>
    %383 = vector.extract_strided_slice %382 {offsets = [0, 0], sizes = [8, 128], strides = [1, 1]} : vector<8x512xf32> to vector<8x128xf32>
    %384 = arith.negf %383 : vector<8x128xf32>
    %385 = math.exp %384 : vector<8x128xf32>
    %cst_137 = arith.constant 1.000000e+00 : f32
    %386 = vector.broadcast %cst_137 : f32 to vector<8x128xf32>
    %387 = arith.addf %386, %385 : vector<8x128xf32>
    %388 = arith.divf %386, %387 : vector<8x128xf32>
    %389 = vector.extract_strided_slice %382 {offsets = [0, 128], sizes = [8, 128], strides = [1, 1]} : vector<8x512xf32> to vector<8x128xf32>
    %390 = arith.negf %389 : vector<8x128xf32>
    %391 = math.exp %390 : vector<8x128xf32>
    %cst_138 = arith.constant 1.000000e+00 : f32
    %392 = vector.broadcast %cst_138 : f32 to vector<8x128xf32>
    %393 = arith.addf %392, %391 : vector<8x128xf32>
    %394 = arith.divf %392, %393 : vector<8x128xf32>
    %395 = vector.extract_strided_slice %382 {offsets = [0, 256], sizes = [8, 128], strides = [1, 1]} : vector<8x512xf32> to vector<8x128xf32>
    %396 = math.tanh %395 : vector<8x128xf32>
    %397 = vector.extract_strided_slice %382 {offsets = [0, 384], sizes = [8, 128], strides = [1, 1]} : vector<8x512xf32> to vector<8x128xf32>
    %398 = arith.negf %397 : vector<8x128xf32>
    %399 = math.exp %398 : vector<8x128xf32>
    %cst_139 = arith.constant 1.000000e+00 : f32
    %400 = vector.broadcast %cst_139 : f32 to vector<8x128xf32>
    %401 = arith.addf %400, %399 : vector<8x128xf32>
    %402 = arith.divf %400, %401 : vector<8x128xf32>
    %403 = arith.mulf %394, %370 : vector<8x128xf32>
    %404 = arith.mulf %388, %396 : vector<8x128xf32>
    %405 = arith.addf %403, %404 : vector<8x128xf32>
    %406 = math.tanh %405 : vector<8x128xf32>
    %407 = arith.mulf %402, %406 : vector<8x128xf32>
    %408 = arith.index_cast %376 : i32 to index
    %c0_140 = arith.constant 0 : index
    %409 = vector.load %arg12[%408, %c0_140] : memref<64x128xf32, #tpu.memory_space<vmem>>, vector<8x128xf32>
    tpu.vector_store %arg12[%408, %c0_140], %407 {strides = array<i32>} : memref<64x128xf32, #tpu.memory_space<vmem>>, vector<8x128xf32>,
    %c3_i32_141 = arith.constant 3 : i32
    %c8_i32_142 = arith.constant 8 : i32
    %410 = arith.muli %c3_i32_141, %c8_i32_142 : i32
    %411 = tpu.assume_multiple %410, 8 : i32
    %412 = arith.index_cast %411 : i32 to index
    %c0_143 = arith.constant 0 : index
    %413 = vector.load %arg13[%412, %c0_143] : memref<64x512xf32, #tpu.memory_space<vmem>>, vector<8x512xf32>
    %c1_144 = arith.constant 1 : index
    %c0_145 = arith.constant 0 : index
    %c0_146 = arith.constant 0 : index
    %414 = vector.load %arg3[%c1_144, %c0_145, %c0_146] : memref<2x128x512xf32, #tpu.memory_space<vmem>>, vector<1x128x512xf32>
    %415 = vector.shape_cast %414 : vector<1x128x512xf32> to vector<128x512xf32>
    %cst_147 = arith.constant dense<0.000000e+00> : vector<8x512xf32>
    %416 = tpu.matmul %407, %415, %cst_147 {dimension_numbers = #tpu.dot_dimension_numbers<[1], [0], [0], [1], [0, 0, 1, 1], [], []>} : vector<8x128xf32>, vector<128x512xf32>, vector<8x512xf32> -> vector<8x512xf32>
    %417 = arith.addf %413, %416 : vector<8x512xf32>
    %418 = vector.extract_strided_slice %417 {offsets = [0, 0], sizes = [8, 128], strides = [1, 1]} : vector<8x512xf32> to vector<8x128xf32>
    %419 = arith.negf %418 : vector<8x128xf32>
    %420 = math.exp %419 : vector<8x128xf32>
    %cst_148 = arith.constant 1.000000e+00 : f32
    %421 = vector.broadcast %cst_148 : f32 to vector<8x128xf32>
    %422 = arith.addf %421, %420 : vector<8x128xf32>
    %423 = arith.divf %421, %422 : vector<8x128xf32>
    %424 = vector.extract_strided_slice %417 {offsets = [0, 128], sizes = [8, 128], strides = [1, 1]} : vector<8x512xf32> to vector<8x128xf32>
    %425 = arith.negf %424 : vector<8x128xf32>
    %426 = math.exp %425 : vector<8x128xf32>
    %cst_149 = arith.constant 1.000000e+00 : f32
    %427 = vector.broadcast %cst_149 : f32 to vector<8x128xf32>
    %428 = arith.addf %427, %426 : vector<8x128xf32>
    %429 = arith.divf %427, %428 : vector<8x128xf32>
    %430 = vector.extract_strided_slice %417 {offsets = [0, 256], sizes = [8, 128], strides = [1, 1]} : vector<8x512xf32> to vector<8x128xf32>
    %431 = math.tanh %430 : vector<8x128xf32>
    %432 = vector.extract_strided_slice %417 {offsets = [0, 384], sizes = [8, 128], strides = [1, 1]} : vector<8x512xf32> to vector<8x128xf32>
    %433 = arith.negf %432 : vector<8x128xf32>
    %434 = math.exp %433 : vector<8x128xf32>
    %cst_150 = arith.constant 1.000000e+00 : f32
    %435 = vector.broadcast %cst_150 : f32 to vector<8x128xf32>
    %436 = arith.addf %435, %434 : vector<8x128xf32>
    %437 = arith.divf %435, %436 : vector<8x128xf32>
    %438 = arith.mulf %429, %405 : vector<8x128xf32>
    %439 = arith.mulf %423, %431 : vector<8x128xf32>
    %440 = arith.addf %438, %439 : vector<8x128xf32>
    %441 = math.tanh %440 : vector<8x128xf32>
    %442 = arith.mulf %437, %441 : vector<8x128xf32>
    %443 = arith.index_cast %411 : i32 to index
    %c0_151 = arith.constant 0 : index
    %444 = vector.load %arg12[%443, %c0_151] : memref<64x128xf32, #tpu.memory_space<vmem>>, vector<8x128xf32>
    tpu.vector_store %arg12[%443, %c0_151], %442 {strides = array<i32>} : memref<64x128xf32, #tpu.memory_space<vmem>>, vector<8x128xf32>,
    %c4_i32_152 = arith.constant 4 : i32
    %c8_i32_153 = arith.constant 8 : i32
    %445 = arith.muli %c4_i32_152, %c8_i32_153 : i32
    %446 = tpu.assume_multiple %445, 8 : i32
    %447 = arith.index_cast %446 : i32 to index
    %c0_154 = arith.constant 0 : index
    %448 = vector.load %arg13[%447, %c0_154] : memref<64x512xf32, #tpu.memory_space<vmem>>, vector<8x512xf32>
    %c1_155 = arith.constant 1 : index
    %c0_156 = arith.constant 0 : index
    %c0_157 = arith.constant 0 : index
    %449 = vector.load %arg3[%c1_155, %c0_156, %c0_157] : memref<2x128x512xf32, #tpu.memory_space<vmem>>, vector<1x128x512xf32>
    %450 = vector.shape_cast %449 : vector<1x128x512xf32> to vector<128x512xf32>
    %cst_158 = arith.constant dense<0.000000e+00> : vector<8x512xf32>
    %451 = tpu.matmul %442, %450, %cst_158 {dimension_numbers = #tpu.dot_dimension_numbers<[1], [0], [0], [1], [0, 0, 1, 1], [], []>} : vector<8x128xf32>, vector<128x512xf32>, vector<8x512xf32> -> vector<8x512xf32>
    %452 = arith.addf %448, %451 : vector<8x512xf32>
    %453 = vector.extract_strided_slice %452 {offsets = [0, 0], sizes = [8, 128], strides = [1, 1]} : vector<8x512xf32> to vector<8x128xf32>
    %454 = arith.negf %453 : vector<8x128xf32>
    %455 = math.exp %454 : vector<8x128xf32>
    %cst_159 = arith.constant 1.000000e+00 : f32
    %456 = vector.broadcast %cst_159 : f32 to vector<8x128xf32>
    %457 = arith.addf %456, %455 : vector<8x128xf32>
    %458 = arith.divf %456, %457 : vector<8x128xf32>
    %459 = vector.extract_strided_slice %452 {offsets = [0, 128], sizes = [8, 128], strides = [1, 1]} : vector<8x512xf32> to vector<8x128xf32>
    %460 = arith.negf %459 : vector<8x128xf32>
    %461 = math.exp %460 : vector<8x128xf32>
    %cst_160 = arith.constant 1.000000e+00 : f32
    %462 = vector.broadcast %cst_160 : f32 to vector<8x128xf32>
    %463 = arith.addf %462, %461 : vector<8x128xf32>
    %464 = arith.divf %462, %463 : vector<8x128xf32>
    %465 = vector.extract_strided_slice %452 {offsets = [0, 256], sizes = [8, 128], strides = [1, 1]} : vector<8x512xf32> to vector<8x128xf32>
    %466 = math.tanh %465 : vector<8x128xf32>
    %467 = vector.extract_strided_slice %452 {offsets = [0, 384], sizes = [8, 128], strides = [1, 1]} : vector<8x512xf32> to vector<8x128xf32>
    %468 = arith.negf %467 : vector<8x128xf32>
    %469 = math.exp %468 : vector<8x128xf32>
    %cst_161 = arith.constant 1.000000e+00 : f32
    %470 = vector.broadcast %cst_161 : f32 to vector<8x128xf32>
    %471 = arith.addf %470, %469 : vector<8x128xf32>
    %472 = arith.divf %470, %471 : vector<8x128xf32>
    %473 = arith.mulf %464, %440 : vector<8x128xf32>
    %474 = arith.mulf %458, %466 : vector<8x128xf32>
    %475 = arith.addf %473, %474 : vector<8x128xf32>
    %476 = math.tanh %475 : vector<8x128xf32>
    %477 = arith.mulf %472, %476 : vector<8x128xf32>
    %478 = arith.index_cast %446 : i32 to index
    %c0_162 = arith.constant 0 : index
    %479 = vector.load %arg12[%478, %c0_162] : memref<64x128xf32, #tpu.memory_space<vmem>>, vector<8x128xf32>
    tpu.vector_store %arg12[%478, %c0_162], %477 {strides = array<i32>} : memref<64x128xf32, #tpu.memory_space<vmem>>, vector<8x128xf32>,
    %c5_i32_163 = arith.constant 5 : i32
    %c8_i32_164 = arith.constant 8 : i32
    %480 = arith.muli %c5_i32_163, %c8_i32_164 : i32
    %481 = tpu.assume_multiple %480, 8 : i32
    %482 = arith.index_cast %481 : i32 to index
    %c0_165 = arith.constant 0 : index
    %483 = vector.load %arg13[%482, %c0_165] : memref<64x512xf32, #tpu.memory_space<vmem>>, vector<8x512xf32>
    %c1_166 = arith.constant 1 : index
    %c0_167 = arith.constant 0 : index
    %c0_168 = arith.constant 0 : index
    %484 = vector.load %arg3[%c1_166, %c0_167, %c0_168] : memref<2x128x512xf32, #tpu.memory_space<vmem>>, vector<1x128x512xf32>
    %485 = vector.shape_cast %484 : vector<1x128x512xf32> to vector<128x512xf32>
    %cst_169 = arith.constant dense<0.000000e+00> : vector<8x512xf32>
    %486 = tpu.matmul %477, %485, %cst_169 {dimension_numbers = #tpu.dot_dimension_numbers<[1], [0], [0], [1], [0, 0, 1, 1], [], []>} : vector<8x128xf32>, vector<128x512xf32>, vector<8x512xf32> -> vector<8x512xf32>
    %487 = arith.addf %483, %486 : vector<8x512xf32>
    %488 = vector.extract_strided_slice %487 {offsets = [0, 0], sizes = [8, 128], strides = [1, 1]} : vector<8x512xf32> to vector<8x128xf32>
    %489 = arith.negf %488 : vector<8x128xf32>
    %490 = math.exp %489 : vector<8x128xf32>
    %cst_170 = arith.constant 1.000000e+00 : f32
    %491 = vector.broadcast %cst_170 : f32 to vector<8x128xf32>
    %492 = arith.addf %491, %490 : vector<8x128xf32>
    %493 = arith.divf %491, %492 : vector<8x128xf32>
    %494 = vector.extract_strided_slice %487 {offsets = [0, 128], sizes = [8, 128], strides = [1, 1]} : vector<8x512xf32> to vector<8x128xf32>
    %495 = arith.negf %494 : vector<8x128xf32>
    %496 = math.exp %495 : vector<8x128xf32>
    %cst_171 = arith.constant 1.000000e+00 : f32
    %497 = vector.broadcast %cst_171 : f32 to vector<8x128xf32>
    %498 = arith.addf %497, %496 : vector<8x128xf32>
    %499 = arith.divf %497, %498 : vector<8x128xf32>
    %500 = vector.extract_strided_slice %487 {offsets = [0, 256], sizes = [8, 128], strides = [1, 1]} : vector<8x512xf32> to vector<8x128xf32>
    %501 = math.tanh %500 : vector<8x128xf32>
    %502 = vector.extract_strided_slice %487 {offsets = [0, 384], sizes = [8, 128], strides = [1, 1]} : vector<8x512xf32> to vector<8x128xf32>
    %503 = arith.negf %502 : vector<8x128xf32>
    %504 = math.exp %503 : vector<8x128xf32>
    %cst_172 = arith.constant 1.000000e+00 : f32
    %505 = vector.broadcast %cst_172 : f32 to vector<8x128xf32>
    %506 = arith.addf %505, %504 : vector<8x128xf32>
    %507 = arith.divf %505, %506 : vector<8x128xf32>
    %508 = arith.mulf %499, %475 : vector<8x128xf32>
    %509 = arith.mulf %493, %501 : vector<8x128xf32>
    %510 = arith.addf %508, %509 : vector<8x128xf32>
    %511 = math.tanh %510 : vector<8x128xf32>
    %512 = arith.mulf %507, %511 : vector<8x128xf32>
    %513 = arith.index_cast %481 : i32 to index
    %c0_173 = arith.constant 0 : index
    %514 = vector.load %arg12[%513, %c0_173] : memref<64x128xf32, #tpu.memory_space<vmem>>, vector<8x128xf32>
    tpu.vector_store %arg12[%513, %c0_173], %512 {strides = array<i32>} : memref<64x128xf32, #tpu.memory_space<vmem>>, vector<8x128xf32>,
    %c6_i32_174 = arith.constant 6 : i32
    %c8_i32_175 = arith.constant 8 : i32
    %515 = arith.muli %c6_i32_174, %c8_i32_175 : i32
    %516 = tpu.assume_multiple %515, 8 : i32
    %517 = arith.index_cast %516 : i32 to index
    %c0_176 = arith.constant 0 : index
    %518 = vector.load %arg13[%517, %c0_176] : memref<64x512xf32, #tpu.memory_space<vmem>>, vector<8x512xf32>
    %c1_177 = arith.constant 1 : index
    %c0_178 = arith.constant 0 : index
    %c0_179 = arith.constant 0 : index
    %519 = vector.load %arg3[%c1_177, %c0_178, %c0_179] : memref<2x128x512xf32, #tpu.memory_space<vmem>>, vector<1x128x512xf32>
    %520 = vector.shape_cast %519 : vector<1x128x512xf32> to vector<128x512xf32>
    %cst_180 = arith.constant dense<0.000000e+00> : vector<8x512xf32>
    %521 = tpu.matmul %512, %520, %cst_180 {dimension_numbers = #tpu.dot_dimension_numbers<[1], [0], [0], [1], [0, 0, 1, 1], [], []>} : vector<8x128xf32>, vector<128x512xf32>, vector<8x512xf32> -> vector<8x512xf32>
    %522 = arith.addf %518, %521 : vector<8x512xf32>
    %523 = vector.extract_strided_slice %522 {offsets = [0, 0], sizes = [8, 128], strides = [1, 1]} : vector<8x512xf32> to vector<8x128xf32>
    %524 = arith.negf %523 : vector<8x128xf32>
    %525 = math.exp %524 : vector<8x128xf32>
    %cst_181 = arith.constant 1.000000e+00 : f32
    %526 = vector.broadcast %cst_181 : f32 to vector<8x128xf32>
    %527 = arith.addf %526, %525 : vector<8x128xf32>
    %528 = arith.divf %526, %527 : vector<8x128xf32>
    %529 = vector.extract_strided_slice %522 {offsets = [0, 128], sizes = [8, 128], strides = [1, 1]} : vector<8x512xf32> to vector<8x128xf32>
    %530 = arith.negf %529 : vector<8x128xf32>
    %531 = math.exp %530 : vector<8x128xf32>
    %cst_182 = arith.constant 1.000000e+00 : f32
    %532 = vector.broadcast %cst_182 : f32 to vector<8x128xf32>
    %533 = arith.addf %532, %531 : vector<8x128xf32>
    %534 = arith.divf %532, %533 : vector<8x128xf32>
    %535 = vector.extract_strided_slice %522 {offsets = [0, 256], sizes = [8, 128], strides = [1, 1]} : vector<8x512xf32> to vector<8x128xf32>
    %536 = math.tanh %535 : vector<8x128xf32>
    %537 = vector.extract_strided_slice %522 {offsets = [0, 384], sizes = [8, 128], strides = [1, 1]} : vector<8x512xf32> to vector<8x128xf32>
    %538 = arith.negf %537 : vector<8x128xf32>
    %539 = math.exp %538 : vector<8x128xf32>
    %cst_183 = arith.constant 1.000000e+00 : f32
    %540 = vector.broadcast %cst_183 : f32 to vector<8x128xf32>
    %541 = arith.addf %540, %539 : vector<8x128xf32>
    %542 = arith.divf %540, %541 : vector<8x128xf32>
    %543 = arith.mulf %534, %510 : vector<8x128xf32>
    %544 = arith.mulf %528, %536 : vector<8x128xf32>
    %545 = arith.addf %543, %544 : vector<8x128xf32>
    %546 = math.tanh %545 : vector<8x128xf32>
    %547 = arith.mulf %542, %546 : vector<8x128xf32>
    %548 = arith.index_cast %516 : i32 to index
    %c0_184 = arith.constant 0 : index
    %549 = vector.load %arg12[%548, %c0_184] : memref<64x128xf32, #tpu.memory_space<vmem>>, vector<8x128xf32>
    tpu.vector_store %arg12[%548, %c0_184], %547 {strides = array<i32>} : memref<64x128xf32, #tpu.memory_space<vmem>>, vector<8x128xf32>,
    %c7_i32_185 = arith.constant 7 : i32
    %c8_i32_186 = arith.constant 8 : i32
    %550 = arith.muli %c7_i32_185, %c8_i32_186 : i32
    %551 = tpu.assume_multiple %550, 8 : i32
    %552 = arith.index_cast %551 : i32 to index
    %c0_187 = arith.constant 0 : index
    %553 = vector.load %arg13[%552, %c0_187] : memref<64x512xf32, #tpu.memory_space<vmem>>, vector<8x512xf32>
    %c1_188 = arith.constant 1 : index
    %c0_189 = arith.constant 0 : index
    %c0_190 = arith.constant 0 : index
    %554 = vector.load %arg3[%c1_188, %c0_189, %c0_190] : memref<2x128x512xf32, #tpu.memory_space<vmem>>, vector<1x128x512xf32>
    %555 = vector.shape_cast %554 : vector<1x128x512xf32> to vector<128x512xf32>
    %cst_191 = arith.constant dense<0.000000e+00> : vector<8x512xf32>
    %556 = tpu.matmul %547, %555, %cst_191 {dimension_numbers = #tpu.dot_dimension_numbers<[1], [0], [0], [1], [0, 0, 1, 1], [], []>} : vector<8x128xf32>, vector<128x512xf32>, vector<8x512xf32> -> vector<8x512xf32>
    %557 = arith.addf %553, %556 : vector<8x512xf32>
    %558 = vector.extract_strided_slice %557 {offsets = [0, 0], sizes = [8, 128], strides = [1, 1]} : vector<8x512xf32> to vector<8x128xf32>
    %559 = arith.negf %558 : vector<8x128xf32>
    %560 = math.exp %559 : vector<8x128xf32>
    %cst_192 = arith.constant 1.000000e+00 : f32
    %561 = vector.broadcast %cst_192 : f32 to vector<8x128xf32>
    %562 = arith.addf %561, %560 : vector<8x128xf32>
    %563 = arith.divf %561, %562 : vector<8x128xf32>
    %564 = vector.extract_strided_slice %557 {offsets = [0, 128], sizes = [8, 128], strides = [1, 1]} : vector<8x512xf32> to vector<8x128xf32>
    %565 = arith.negf %564 : vector<8x128xf32>
    %566 = math.exp %565 : vector<8x128xf32>
    %cst_193 = arith.constant 1.000000e+00 : f32
    %567 = vector.broadcast %cst_193 : f32 to vector<8x128xf32>
    %568 = arith.addf %567, %566 : vector<8x128xf32>
    %569 = arith.divf %567, %568 : vector<8x128xf32>
    %570 = vector.extract_strided_slice %557 {offsets = [0, 256], sizes = [8, 128], strides = [1, 1]} : vector<8x512xf32> to vector<8x128xf32>
    %571 = math.tanh %570 : vector<8x128xf32>
    %572 = vector.extract_strided_slice %557 {offsets = [0, 384], sizes = [8, 128], strides = [1, 1]} : vector<8x512xf32> to vector<8x128xf32>
    %573 = arith.negf %572 : vector<8x128xf32>
    %574 = math.exp %573 : vector<8x128xf32>
    %cst_194 = arith.constant 1.000000e+00 : f32
    %575 = vector.broadcast %cst_194 : f32 to vector<8x128xf32>
    %576 = arith.addf %575, %574 : vector<8x128xf32>
    %577 = arith.divf %575, %576 : vector<8x128xf32>
    %578 = arith.mulf %569, %545 : vector<8x128xf32>
    %579 = arith.mulf %563, %571 : vector<8x128xf32>
    %580 = arith.addf %578, %579 : vector<8x128xf32>
    %581 = math.tanh %580 : vector<8x128xf32>
    %582 = arith.mulf %577, %581 : vector<8x128xf32>
    %583 = arith.index_cast %551 : i32 to index
    %c0_195 = arith.constant 0 : index
    %584 = vector.load %arg12[%583, %c0_195] : memref<64x128xf32, #tpu.memory_space<vmem>>, vector<8x128xf32>
    tpu.vector_store %arg12[%583, %c0_195], %582 {strides = array<i32>} : memref<64x128xf32, #tpu.memory_space<vmem>>, vector<8x128xf32>,
    %c8_i32_196 = arith.constant 8 : i32
    %c0_197 = arith.constant 0 : index
    %c0_198 = arith.constant 0 : index
    %585 = vector.load %arg12[%c0_197, %c0_198] : memref<64x128xf32, #tpu.memory_space<vmem>>, vector<64x128xf32>
    %c0_199 = arith.constant 0 : index
    %c0_200 = arith.constant 0 : index
    %586 = vector.load %arg5[%c0_199, %c0_200] : memref<128x128xf32, #tpu.memory_space<vmem>>, vector<128x128xf32>
    %cst_201 = arith.constant dense<0.000000e+00> : vector<64x128xf32>
    %587 = tpu.matmul %585, %586, %cst_201 {dimension_numbers = #tpu.dot_dimension_numbers<[1], [0], [0], [1], [0, 0, 1, 1], [], []>} : vector<64x128xf32>, vector<128x128xf32>, vector<64x128xf32> -> vector<64x128xf32>
    %c0_202 = arith.constant 0 : index
    %c0_203 = arith.constant 0 : index
    %588 = vector.load %arg6[%c0_202, %c0_203] : memref<1x128xf32, #tpu.memory_space<vmem>>, vector<1x128xf32>
    %589 = vector.broadcast %588 : vector<1x128xf32> to vector<64x128xf32>
    %590 = arith.addf %587, %589 : vector<64x128xf32>
    %cst_204 = arith.constant dense<0.000000e+00> : vector<64xf32>
    %591 = vector.multi_reduction <add>, %590, %cst_204 [1] : vector<64x128xf32> to vector<64xf32>
    %592 = vector.shape_cast %591 : vector<64xf32> to vector<64x1xf32>
    %cst_205 = arith.constant 6.250000e-02 : f32
    %593 = vector.broadcast %cst_205 : f32 to vector<64x1xf32>
    %594 = arith.mulf %592, %593 : vector<64x1xf32>
    %595 = tpu.iota {dimensions = array<i32: 1>} : vector<1x128xi32>
    %c16_i32 = arith.constant 16 : i32
    %596 = vector.broadcast %c16_i32 : i32 to vector<1x128xi32>
    %597 = arith.cmpi slt, %595, %596 : vector<1x128xi32>
    %598 = vector.broadcast %594 : vector<64x1xf32> to vector<64x128xf32>
    %599 = arith.subf %590, %598 : vector<64x128xf32>
    %cst_206 = arith.constant 0.000000e+00 : f32
    %600 = vector.shape_cast %597 : vector<1x128xi1> to vector<1x128xi1>
    %601 = vector.broadcast %600 : vector<1x128xi1> to vector<64x128xi1>
    %602 = vector.broadcast %cst_206 : f32 to vector<64x128xf32>
    %603 = arith.select %601, %599, %602 : vector<64x128xi1>, vector<64x128xf32>
    %604 = arith.mulf %603, %603 : vector<64x128xf32>
    %cst_207 = arith.constant dense<0.000000e+00> : vector<64xf32>
    %605 = vector.multi_reduction <add>, %604, %cst_207 [1] : vector<64x128xf32> to vector<64xf32>
    %606 = vector.shape_cast %605 : vector<64xf32> to vector<64x1xf32>
    %cst_208 = arith.constant 6.250000e-02 : f32
    %607 = vector.broadcast %cst_208 : f32 to vector<64x1xf32>
    %608 = arith.mulf %606, %607 : vector<64x1xf32>
    %cst_209 = arith.constant 9.99999974E-6 : f32
    %609 = vector.broadcast %cst_209 : f32 to vector<64x1xf32>
    %610 = arith.addf %608, %609 : vector<64x1xf32>
    %611 = math.rsqrt %610 : vector<64x1xf32>
    %612 = vector.broadcast %611 : vector<64x1xf32> to vector<64x128xf32>
    %613 = arith.mulf %603, %612 : vector<64x128xf32>
    %c0_210 = arith.constant 0 : index
    %c0_211 = arith.constant 0 : index
    %614 = vector.load %arg7[%c0_210, %c0_211] : memref<1x128xf32, #tpu.memory_space<vmem>>, vector<1x128xf32>
    %615 = vector.broadcast %614 : vector<1x128xf32> to vector<64x128xf32>
    %616 = arith.mulf %613, %615 : vector<64x128xf32>
    %c0_212 = arith.constant 0 : index
    %c0_213 = arith.constant 0 : index
    %617 = vector.load %arg8[%c0_212, %c0_213] : memref<1x128xf32, #tpu.memory_space<vmem>>, vector<1x128xf32>
    %618 = vector.broadcast %617 : vector<1x128xf32> to vector<64x128xf32>
    %619 = arith.addf %616, %618 : vector<64x128xf32>
    %c0_214 = arith.constant 0 : index
    %c0_215 = arith.constant 0 : index
    %620 = vector.load %arg9[%c0_214, %c0_215] : memref<128x128xf32, #tpu.memory_space<vmem>>, vector<128x128xf32>
    %cst_216 = arith.constant dense<0.000000e+00> : vector<64x128xf32>
    %621 = tpu.matmul %619, %620, %cst_216 {dimension_numbers = #tpu.dot_dimension_numbers<[1], [0], [0], [1], [0, 0, 1, 1], [], []>} : vector<64x128xf32>, vector<128x128xf32>, vector<64x128xf32> -> vector<64x128xf32>
    %c0_217 = arith.constant 0 : index
    %c0_218 = arith.constant 0 : index
    %622 = vector.load %arg10[%c0_217, %c0_218] : memref<1x128xf32, #tpu.memory_space<vmem>>, vector<1x128xf32>
    %623 = vector.broadcast %622 : vector<1x128xf32> to vector<64x128xf32>
    %624 = arith.addf %621, %623 : vector<64x128xf32>
    %625 = vector.shape_cast %624 : vector<64x128xf32> to vector<8x8x128xf32>
    %c0_219 = arith.constant 0 : index
    %c0_220 = arith.constant 0 : index
    %c0_221 = arith.constant 0 : index
    %626 = vector.load %arg11[%c0_219, %c0_220, %c0_221] : memref<8x8x128xf32, #tpu.memory_space<vmem>>, vector<8x8x128xf32>
    tpu.vector_store %arg11[%c0_219, %c0_220, %c0_221], %625 {strides = array<i32>} : memref<8x8x128xf32, #tpu.memory_space<vmem>>, vector<8x8x128xf32>,
    return
  }
  func.func @transform_0(%arg0: i32) -> (i32, i32, i32) {
    %c0_i32 = arith.constant 0 : i32
    %c0_i32_0 = arith.constant 0 : i32
    %c0_i32_1 = arith.constant 0 : i32
    return %c0_i32, %arg0, %c0_i32_0 : i32, i32, i32
  }
  func.func @transform_1(%arg0: i32) -> (i32, i32, i32) {
    %c0_i32 = arith.constant 0 : i32
    %c0_i32_0 = arith.constant 0 : i32
    %c0_i32_1 = arith.constant 0 : i32
    %c0_i32_2 = arith.constant 0 : i32
    return %c0_i32, %c0_i32_0, %c0_i32_1 : i32, i32, i32
  }
  func.func @transform_2(%arg0: i32) -> (i32, i32, i32) {
    %c0_i32 = arith.constant 0 : i32
    %c0_i32_0 = arith.constant 0 : i32
    %c0_i32_1 = arith.constant 0 : i32
    %c0_i32_2 = arith.constant 0 : i32
    return %c0_i32, %c0_i32_0, %c0_i32_1 : i32, i32, i32
  }
  func.func @transform_3(%arg0: i32) -> (i32, i32, i32) {
    %c0_i32 = arith.constant 0 : i32
    %c0_i32_0 = arith.constant 0 : i32
    %c0_i32_1 = arith.constant 0 : i32
    %c0_i32_2 = arith.constant 0 : i32
    return %c0_i32, %c0_i32_0, %c0_i32_1 : i32, i32, i32
  }
  func.func @transform_4(%arg0: i32) -> (i32, i32) {
    %c0_i32 = arith.constant 0 : i32
    %c0_i32_0 = arith.constant 0 : i32
    %c0_i32_1 = arith.constant 0 : i32
    return %c0_i32, %c0_i32_0 : i32, i32
  }
  func.func @transform_5(%arg0: i32) -> (i32, i32) {
    %c0_i32 = arith.constant 0 : i32
    %c0_i32_0 = arith.constant 0 : i32
    %c0_i32_1 = arith.constant 0 : i32
    return %c0_i32, %c0_i32_0 : i32, i32
  }
  func.func @transform_6(%arg0: i32) -> (i32, i32) {
    %c0_i32 = arith.constant 0 : i32
    %c0_i32_0 = arith.constant 0 : i32
    %c0_i32_1 = arith.constant 0 : i32
    return %c0_i32, %c0_i32_0 : i32, i32
  }
  func.func @transform_7(%arg0: i32) -> (i32, i32) {
    %c0_i32 = arith.constant 0 : i32
    %c0_i32_0 = arith.constant 0 : i32
    %c0_i32_1 = arith.constant 0 : i32
    return %c0_i32, %c0_i32_0 : i32, i32
  }
  func.func @transform_8(%arg0: i32) -> (i32, i32) {
    %c0_i32 = arith.constant 0 : i32
    %c0_i32_0 = arith.constant 0 : i32
    %c0_i32_1 = arith.constant 0 : i32
    return %c0_i32, %c0_i32_0 : i32, i32
  }
  func.func @transform_9(%arg0: i32) -> (i32, i32) {
    %c0_i32 = arith.constant 0 : i32
    %c0_i32_0 = arith.constant 0 : i32
    %c0_i32_1 = arith.constant 0 : i32
    return %c0_i32, %c0_i32_0 : i32, i32
  }
  func.func @transform_10(%arg0: i32) -> (i32, i32, i32) {
    %c0_i32 = arith.constant 0 : i32
    %c0_i32_0 = arith.constant 0 : i32
    %c0_i32_1 = arith.constant 0 : i32
    return %c0_i32, %arg0, %c0_i32_0 : i32, i32, i32
  }
}

</mosaic_0001>

<bundles_post_ra>
// kernel: tpu_custom_call.1
= control target key start
LH: loop header
LB: loop body
LE: loop exit
PB: predicated region body
PF: predicated region fallthrough
CT: control target
= control target key end

     0   :  { %15 = vsyncpa [#allocation5], 0  ;;  %s8368_s0 = inlined_call_operand.hbm [shape: f32[8,8,128], index: 0, kind: input, shape index: {}]   ;;  %s8369_s1 = inlined_call_operand.hbm [shape: f32[2,128,512], index: 1, kind: input, shape index: {}]   ;;  %s8370_s2 = inlined_call_operand.hbm [shape: f32[2,128,512], index: 2, kind: input, shape index: {}]   ;;  %s8371_s3 = inlined_call_operand.vmem [shape: f32[2,1,512], index: 3, kind: input, shape index: {}]   ;;  %s8372_s4 = inlined_call_operand.hbm [shape: f32[128,128], index: 4, kind: input, shape index: {}]   ;;  %s8373_s5 = inlined_call_operand.vmem [shape: f32[1,128], index: 5, kind: input, shape index: {}]   ;;  %s8374_s6 = inlined_call_operand.vmem [shape: f32[1,128], index: 6, kind: input, shape index: {}]   ;;  %s8375_s7 = inlined_call_operand.vmem [shape: f32[1,128], index: 7, kind: input, shape index: {}]   ;;  %s8376_s8 = inlined_call_operand.hbm [shape: f32[128,128], index: 8, kind: input, shape index: {}]   ;;  %s8377_s9 = inlined_call_operand.vmem [shape: f32[1,128], index: 9, kind: input, shape index: {}]   ;;  %s8378_s10 = inlined_call_operand.hbm [shape: f32[8,8,128], index: 10, kind: output, shape index: {}]  }
   0x1   :  { %16 = vsyncpa [#allocation8], 0 }
   0x2   :  { %17 = vsyncpa [#allocation11], 0 }
   0x3   :  { %18 = vsyncpa [#allocation6], 0  ;;  %s7067_s13 = smov [#allocation7]   ;;  %s6927_s17 = scalar_lea.hbm %s8369_s1, 16384 }
   0x4   :  { %s36_s14 = sshll.u32 %s7067_s13, 4  ;;  %p6928_p0 = scmp.ne.s32.totalorder %s8369_s1, %s6927_s17  ;;  %s37_s14 = int_to_ptr.vmem [resolvable:$true] %s36_s14 }
   0x5   :  { %p6931_p1 = scmp.lt.u32.totalorder %s6927_s17, %s8369_s1 }
   0x7   :  { %p6933_p2 = pnand %p6931_p1, %p6928_p0 }
   0x9   :  { %6936 = shalt.err (!%p6933_p2)
}
   0xa   :  { %s6937_s22 = scalar_lea.vmem %s37_s14, 16384  ;;  %p6942_p4 = scmp.lt.s32.totalorder %s37_s14, %s37_s14 }
   0xb   :  { %p6938_p3 = scmp.ne.s32.totalorder %s37_s14, %s6937_s22  ;;  %p6943_p5 = scmp.lt.s32.totalorder %s6937_s22, %s6937_s22 }
   0xd   :  { %p6944_p6 = por %p6943_p5, %p6942_p4 }
   0xf   :  { %p6945_p7 = pnand %p6944_p6, %p6938_p3 }
  0x11   :  { %6948 = shalt.err (!%p6945_p7)
}
  0x12   :  { %s7068_s23 = smov 512   ;;  %s7069_s24 = smov 32  }
  0x13   :  { %42 = dma.hbm_to_vmem [thread:$0]  %s8369_s1, 16384, %s37_s14, [#allocation8], %s7068_s23, %s7068_s23, %s7069_s24  }
  0x14   :  { %s7070_s27 = smov [#allocation10]   ;;  %s7071_s29 = smov [#allocation4]  }
  0x15   :  { %s62_s28 = sshll.u32 %s7070_s27, 4  ;;  %s24_s30 = sshll.u32 %s7071_s29, 4  ;;  %s63_s28 = int_to_ptr.vmem [resolvable:$true] %s62_s28  ;;  %s25_s30 = int_to_ptr.vmem [resolvable:$true] %s24_s30 }
  0x16   :  { %s6949_s13 = scalar_lea.hbm %s8372_s4, 2048 }
  0x17   :  { %p6950_p8 = scmp.ne.s32.totalorder %s8372_s4, %s6949_s13  ;;  %p6953_p9 = scmp.lt.u32.totalorder %s6949_s13, %s8372_s4 }
  0x19   :  { %p6955_p10 = pnand %p6953_p9, %p6950_p8 }
  0x1b   :  { %6958 = shalt.err (!%p6955_p10)
}
  0x1c   :  { %s6959_s1 = scalar_lea.vmem %s63_s28, 2048  ;;  %p6964_p12 = scmp.lt.s32.totalorder %s63_s28, %s63_s28 }
  0x1d   :  { %p6960_p11 = scmp.ne.s32.totalorder %s63_s28, %s6959_s1  ;;  %p6965_p13 = scmp.lt.s32.totalorder %s6959_s1, %s6959_s1 }
  0x1f   :  { %p6966_p0 = por %p6965_p13, %p6964_p12 }
  0x21   :  { %p6967_p1 = pnand %p6966_p0, %p6960_p11 }
  0x23   :  { %6970 = shalt.err (!%p6967_p1)
}
  0x24   :  { %s7072_s14 = smov 128   ;;  %s7073_s19 = smov 8  }
  0x25   :  { %68 = dma.hbm_to_vmem [thread:$0]  %s8372_s4, 2048, %s63_s28, [#allocation11], %s7072_s14, %s7072_s14, %s7073_s19  }
  0x26   :  { %s6971_s26 = scalar_lea.hbm %s8368_s0, 1024 }
  0x27   :  { %p6972_p2 = scmp.ne.s32.totalorder %s8368_s0, %s6971_s26  ;;  %p6975_p3 = scmp.lt.u32.totalorder %s6971_s26, %s8368_s0 }
  0x29   :  { %p6977_p4 = pnand %p6975_p3, %p6972_p2 }
  0x2b   :  { %6980 = shalt.err (!%p6977_p4)
}
  0x2c   :  { %s6981_s13 = scalar_lea.vmem %s25_s30, 1024  ;;  %p6986_p6 = scmp.lt.s32.totalorder %s25_s30, %s25_s30 }
  0x2d   :  { %p6982_p5 = scmp.ne.s32.totalorder %s25_s30, %s6981_s13  ;;  %p6987_p7 = scmp.lt.s32.totalorder %s6981_s13, %s6981_s13 }
  0x2f   :  { %p6988_p8 = por %p6987_p7, %p6986_p6 }
  0x31   :  { %p6989_p9 = pnand %p6988_p8, %p6982_p5 }
  0x33   :  { %6992 = shalt.err (!%p6989_p9)
}
  0x34   :  { %30 = dma.hbm_to_vmem [thread:$0]  %s8368_s0, 1024, %s25_s30, [#allocation5], %s7072_s14, %s7072_s14, %s7073_s19  }
  0x35   :  { %s7074_s15 = smov [#allocation9]   ;;  %s7075_s17 = smov [#allocation12]  }
  0x36   :  { %s48_s16 = sshll.u32 %s7074_s15, 4  ;;  %s80_s18 = sshll.u32 %s7075_s17, 4  ;;  %s49_s16 = int_to_ptr.vmem [resolvable:$true] %s48_s16  ;;  %s81_s18 = int_to_ptr.vmem [resolvable:$true] %s80_s18 }
  0x37   :  { %s6993_s21 = scalar_lea.hbm %s8370_s2, 16384 }
  0x38   :  { %p6994_p10 = scmp.ne.s32.totalorder %s8370_s2, %s6993_s21  ;;  %p6997_p11 = scmp.lt.u32.totalorder %s6993_s21, %s8370_s2 }
  0x3a   :  { %p6999_p12 = pnand %p6997_p11, %p6994_p10 }
  0x3c   :  { %7002 = shalt.err (!%p6999_p12)
}
  0x3d   :  { %s7003_s0 = scalar_lea.vmem %s49_s16, 16384  ;;  %p7008_p0 = scmp.lt.s32.totalorder %s49_s16, %s49_s16 }
  0x3e   :  { %p7004_p13 = scmp.ne.s32.totalorder %s49_s16, %s7003_s0  ;;  %p7009_p1 = scmp.lt.s32.totalorder %s7003_s0, %s7003_s0 }
  0x40   :  { %p7010_p2 = por %p7009_p1, %p7008_p0 }
  0x42   :  { %p7011_p3 = pnand %p7010_p2, %p7004_p13 }
  0x44   :  { %7014 = shalt.err (!%p7011_p3)
}
  0x45   :  { %54 = dma.hbm_to_vmem [thread:$0]  %s8370_s2, 16384, %s49_s16, [#allocation8], %s7068_s23, %s7068_s23, %s7069_s24  }
  0x46   :  { %s7015_s13 = scalar_lea.hbm %s8376_s8, 2048 }
  0x47   :  { %p7016_p4 = scmp.ne.s32.totalorder %s8376_s8, %s7015_s13  ;;  %p7019_p5 = scmp.lt.u32.totalorder %s7015_s13, %s8376_s8 }
  0x49   :  { %p7021_p6 = pnand %p7019_p5, %p7016_p4 }
  0x4b   :  { %7024 = shalt.err (!%p7021_p6)
}
  0x4c   :  { %s7025_s1 = scalar_lea.vmem %s81_s18, 2048  ;;  %p7030_p8 = scmp.lt.s32.totalorder %s81_s18, %s81_s18 }
  0x4d   :  { %p7026_p7 = scmp.ne.s32.totalorder %s81_s18, %s7025_s1  ;;  %p7031_p9 = scmp.lt.s32.totalorder %s7025_s1, %s7025_s1 }
  0x4f   :  { %p7032_p10 = por %p7031_p9, %p7030_p8 }
  0x51   :  { %p7033_p11 = pnand %p7032_p10, %p7026_p7 }
  0x53   :  { %7036 = shalt.err (!%p7033_p11)
}
  0x54   :  { %86 = dma.hbm_to_vmem [thread:$0]  %s8376_s8, 2048, %s81_s18, [#allocation11], %s7072_s14, %s7072_s14, %s7073_s19  }
  0x55   :  { %7059 = dma.done.wait [#allocation5], 1024  }
  0x56   :  { %7060 = vsyncadd [#allocation5], 4294966272 }
  0x57   :  { %7061 = dma.done.wait [#allocation8], 32768  }
  0x58   :  { %7062 = vsyncadd [#allocation8], 4294934528 }
  0x59   :  { %7063 = dma.done.wait [#allocation11], 4096  }
  0x5a   :  { %7064 = vsyncadd [#allocation11], 4294963200  ;;  %v7076_v0 = vmov 0.0   ;;  %v129_v1 = vld [vmem:[#allocation7 + $0x8] sm:$0xff]  ;;  %v131_v3 = vld [vmem:[#allocation7 + $0x18] sm:$0xff]  ;;  %s7077_s26 = smov [#allocation13]  }
  0x5b   :  { %278 = vmatprep.mubr.f32.mxu0 %v7076_v0  ;;  %391 = vmatprep.mubr.f32.mxu1 %v7076_v0  ;;  %v133_v2 = vld [vmem:[#allocation7 + $0x28] sm:$0xff]  ;;  %v135_v5 = vld [vmem:[#allocation7 + $0x38] sm:$0xff]  ;;  %v128_v6 = vld [vmem:[#allocation7] sm:$0xff] }
  0x5c   :  { %v5300_v4 = vpack.c.bf16 %v133_v2, %v129_v1  ;;  %v132_v7 = vld [vmem:[#allocation7 + $0x20] sm:$0xff]  ;;  %v5332_v8 = vpack.c.bf16 %v135_v5, %v131_v3  ;;  %v130_v10 = vld [vmem:[#allocation7 + $0x10] sm:$0xff]  ;;  %v137_v12 = vld [vmem:[#allocation7 + $0x48] sm:$0xff] }
  0x5d   :  { %v5302_v9 = vpack.c.bf16 %v132_v7, %v128_v6  ;;  %v134_v11 = vld [vmem:[#allocation7 + $0x30] sm:$0xff]  ;;  %v141_v14 = vld [vmem:[#allocation7 + $0x68] sm:$0xff]  ;;  %v139_v15 = vld [vmem:[#allocation7 + $0x58] sm:$0xff] }
  0x5e   :  { %5301 = vmatprep.subr.bf16.mxu0 %v5300_v4  ;;  %v5334_v13 = vpack.c.bf16 %v134_v11, %v130_v10  ;;  %v143_v16 = vld [vmem:[#allocation7 + $0x78] sm:$0xff]  ;;  %5333 = vmatprep.subr.bf16.mxu1 %v5332_v8  ;;  %v5304_v17 = vpack.c.bf16 %v141_v14, %v137_v12  ;;  %v136_v19 = vld [vmem:[#allocation7 + $0x40] sm:$0xff]  ;;  %v138_v21 = vld [vmem:[#allocation7 + $0x50] sm:$0xff] }
  0x5f   :  { %5303 = vmatpush1.bf16.msra.mxu0 %v5302_v9  ;;  %v5336_v18 = vpack.c.bf16 %v143_v16, %v139_v15  ;;  %v140_v20 = vld [vmem:[#allocation7 + $0x60] sm:$0xff]  ;;  %v142_v23 = vld [vmem:[#allocation7 + $0x70] sm:$0xff]  ;;  %v145_v24 = vld [vmem:[#allocation7 + $0x88] sm:$0xff] }
  0x60   :  { %5335 = vmatpush1.bf16.msra.mxu1 %v5334_v13  ;;  %v5306_v22 = vpack.c.bf16 %v140_v20, %v136_v19  ;;  %v149_v25 = vld [vmem:[#allocation7 + $0xa8] sm:$0xff]  ;;  %5305 = vmatprep.subr.bf16.mxu0 %v5304_v17  ;;  %v5338_v26 = vpack.c.bf16 %v142_v23, %v138_v21  ;;  %v147_v28 = vld [vmem:[#allocation7 + $0x98] sm:$0xff]  ;;  %v144_v30 = vld [vmem:[#allocation7 + $0x80] sm:$0xff] }
  0x61   :  { %5337 = vmatprep.subr.bf16.mxu1 %v5336_v18  ;;  %v5308_v27 = vpack.c.bf16 %v149_v25, %v145_v24  ;;  %v151_v29 = vld [vmem:[#allocation7 + $0xb8] sm:$0xff]  ;;  %v148_v32 = vld [vmem:[#allocation7 + $0xa0] sm:$0xff]  ;;  %v146_v33 = vld [vmem:[#allocation7 + $0x90] sm:$0xff] }
  0x62   :  { %v5340_v31 = vpack.c.bf16 %v151_v29, %v147_v28  ;;  %v150_v34 = vld [vmem:[#allocation7 + $0xb0] sm:$0xff]  ;;  %v5310_v35 = vpack.c.bf16 %v148_v32, %v144_v30  ;;  %v153_v36 = vld [vmem:[#allocation7 + $0xc8] sm:$0xff]  ;;  %v155_v38 = vld [vmem:[#allocation7 + $0xd8] sm:$0xff] }
  0x63   :  { %5307 = vmatpush1.bf16.msra.mxu0 %v5306_v22  ;;  %v157_v37 = vld [vmem:[#allocation7 + $0xe8] sm:$0xff]  ;;  %v5342_v39 = vpack.c.bf16 %v150_v34, %v146_v33  ;;  %v159_v41 = vld [vmem:[#allocation7 + $0xf8] sm:$0xff]  ;;  %v152_v42 = vld [vmem:[#allocation7 + $0xc0] sm:$0xff] }
  0x64   :  { %5339 = vmatpush1.bf16.msra.mxu1 %v5338_v26  ;;  %5309 = vmatprep.subr.bf16.mxu0 %v5308_v27  ;;  %v5312_v40 = vpack.c.bf16 %v157_v37, %v153_v36  ;;  %v156_v43 = vld [vmem:[#allocation7 + $0xe0] sm:$0xff]  ;;  %v5344_v44 = vpack.c.bf16 %v159_v41, %v155_v38  ;;  %v154_v45 = vld [vmem:[#allocation7 + $0xd0] sm:$0xff]  ;;  %v161_v47 = vld [vmem:[#allocation7 + $0x108] sm:$0xff] }
  0x65   :  { %5341 = vmatprep.subr.bf16.mxu1 %v5340_v31  ;;  %v158_v46 = vld [vmem:[#allocation7 + $0xf0] sm:$0xff]  ;;  %v165_v48 = vld [vmem:[#allocation7 + $0x128] sm:$0xff]  ;;  %v163_v49 = vld [vmem:[#allocation7 + $0x118] sm:$0xff]  ;;  %v5314_v51 = vpack.c.bf16 %v156_v43, %v152_v42 }
  0x66   :  { %v167_v50 = vld [vmem:[#allocation7 + $0x138] sm:$0xff]  ;;  %v5346_v52 = vpack.c.bf16 %v158_v46, %v154_v45  ;;  %v5316_v53 = vpack.c.bf16 %v165_v48, %v161_v47  ;;  %v160_v54 = vld [vmem:[#allocation7 + $0x100] sm:$0xff]  ;;  %v162_v56 = vld [vmem:[#allocation7 + $0x110] sm:$0xff] }
  0x67   :  { %5311 = vmatpush1.bf16.msra.mxu0 %v5310_v35  ;;  %v164_v55 = vld [vmem:[#allocation7 + $0x120] sm:$0xff]  ;;  %v5348_v57 = vpack.c.bf16 %v167_v50, %v163_v49  ;;  %v166_v58 = vld [vmem:[#allocation7 + $0x130] sm:$0xff]  ;;  %v169_v59 = vld [vmem:[#allocation7 + $0x148] sm:$0xff] }
  0x68   :  { %5343 = vmatpush1.bf16.msra.mxu1 %v5342_v39  ;;  %5313 = vmatprep.subr.bf16.mxu0 %v5312_v40  ;;  %v173_v60 = vld [vmem:[#allocation7 + $0x168] sm:$0xff]  ;;  %v171_v61 = vld [vmem:[#allocation7 + $0x158] sm:$0xff]  ;;  %v5318_v63 = vpack.c.bf16 %v164_v55, %v160_v54  ;;  %v5350_v1 = vpack.c.bf16 %v166_v58, %v162_v56  ;;  %v168_v3 = vld [vmem:[#allocation7 + $0x140] sm:$0xff] }
  0x69   :  { %5345 = vmatprep.subr.bf16.mxu1 %v5344_v44  ;;  %v175_v62 = vld [vmem:[#allocation7 + $0x178] sm:$0xff]  ;;  %v5320_v2 = vpack.c.bf16 %v173_v60, %v169_v59  ;;  %v172_v4 = vld [vmem:[#allocation7 + $0x160] sm:$0xff]  ;;  %v170_v5 = vld [vmem:[#allocation7 + $0x150] sm:$0xff] }
  0x6a   :  { %v5352_v6 = vpack.c.bf16 %v175_v62, %v171_v61  ;;  %v174_v7 = vld [vmem:[#allocation7 + $0x170] sm:$0xff]  ;;  %v177_v8 = vld [vmem:[#allocation7 + $0x188] sm:$0xff]  ;;  %v179_v10 = vld [vmem:[#allocation7 + $0x198] sm:$0xff]  ;;  %v5322_v12 = vpack.c.bf16 %v172_v4, %v168_v3 }
  0x6b   :  { %5315 = vmatpush1.bf16.msra.mxu0 %v5314_v51  ;;  %v181_v9 = vld [vmem:[#allocation7 + $0x1a8] sm:$0xff]  ;;  %v183_v11 = vld [vmem:[#allocation7 + $0x1b8] sm:$0xff]  ;;  %v5354_v13 = vpack.c.bf16 %v174_v7, %v170_v5  ;;  %v176_v15 = vld [vmem:[#allocation7 + $0x180] sm:$0xff] }
  0x6c   :  { %5347 = vmatpush1.bf16.msra.mxu1 %v5346_v52  ;;  %5317 = vmatprep.subr.bf16.mxu0 %v5316_v53  ;;  %v5324_v14 = vpack.c.bf16 %v181_v9, %v177_v8  ;;  %v180_v16 = vld [vmem:[#allocation7 + $0x1a0] sm:$0xff]  ;;  %v178_v17 = vld [vmem:[#allocation7 + $0x190] sm:$0xff]  ;;  %v5356_v18 = vpack.c.bf16 %v183_v11, %v179_v10  ;;  %v185_v20 = vld [vmem:[#allocation7 + $0x1c8] sm:$0xff] }
  0x6d   :  { %5349 = vmatprep.subr.bf16.mxu1 %v5348_v57  ;;  %v182_v19 = vld [vmem:[#allocation7 + $0x1b0] sm:$0xff]  ;;  %v189_v21 = vld [vmem:[#allocation7 + $0x1e8] sm:$0xff]  ;;  %v187_v22 = vld [vmem:[#allocation7 + $0x1d8] sm:$0xff]  ;;  %v5326_v24 = vpack.c.bf16 %v180_v16, %v176_v15 }
  0x6e   :  { %v191_v23 = vld [vmem:[#allocation7 + $0x1f8] sm:$0xff]  ;;  %v5358_v25 = vpack.c.bf16 %v182_v19, %v178_v17  ;;  %v5328_v26 = vpack.c.bf16 %v189_v21, %v185_v20  ;;  %v184_v27 = vld [vmem:[#allocation7 + $0x1c0] sm:$0xff]  ;;  %v186_v29 = vld [vmem:[#allocation7 + $0x1d0] sm:$0xff] }
  0x6f   :  { %5319 = vmatpush1.bf16.msra.mxu0 %v5318_v63  ;;  %v188_v28 = vld [vmem:[#allocation7 + $0x1e0] sm:$0xff]  ;;  %v5360_v30 = vpack.c.bf16 %v191_v23, %v187_v22  ;;  %v190_v31 = vld [vmem:[#allocation7 + $0x1f0] sm:$0xff]  ;;  %v480_v32 = vld [vmem:[#allocation9 + $0x8] sm:$0xff] }
  0x70   :  { %5351 = vmatpush1.bf16.msra.mxu1 %v5350_v1  ;;  %5321 = vmatprep.subr.bf16.mxu0 %v5320_v2  ;;  %v484_v33 = vld [vmem:[#allocation9 + $0x28] sm:$0xff]  ;;  %v482_v34 = vld [vmem:[#allocation9 + $0x18] sm:$0xff]  ;;  %v5330_v36 = vpack.c.bf16 %v188_v28, %v184_v27  ;;  %v5362_v37 = vpack.c.bf16 %v190_v31, %v186_v29  ;;  %v479_v39 = vld [vmem:[#allocation9] sm:$0xff] }
  0x71   :  { %5353 = vmatprep.subr.bf16.mxu1 %v5352_v6  ;;  %v486_v35 = vld [vmem:[#allocation9 + $0x38] sm:$0xff]  ;;  %v7210_v38 = vpack.c.bf16 %v484_v33, %v480_v32  ;;  %v483_v40 = vld [vmem:[#allocation9 + $0x20] sm:$0xff]  ;;  %v481_v42 = vld [vmem:[#allocation9 + $0x10] sm:$0xff] }
  0x72   :  { %v7212_v41 = vpack.c.bf16 %v486_v35, %v482_v34  ;;  %v485_v43 = vld [vmem:[#allocation9 + $0x30] sm:$0xff]  ;;  %v488_v44 = vld [vmem:[#allocation9 + $0x48] sm:$0xff]  ;;  %v104_v46 = vld [vmem:[#allocation4] sm:$0xff]  ;;  %v7214_v47 = vpack.c.bf16 %v483_v40, %v479_v39 }
  0x73   :  { %5323 = vmatpush1.bf16.msra.mxu0 %v5322_v12  ;;  %v492_v45 = vld [vmem:[#allocation9 + $0x68] sm:$0xff]  ;;  %v490_v48 = vld [vmem:[#allocation9 + $0x58] sm:$0xff]  ;;  %v7217_v50 = vpack.c.bf16 %v485_v43, %v481_v42  ;;  %v487_v51 = vld [vmem:[#allocation9 + $0x40] sm:$0xff] }
  0x74   :  { %5355 = vmatpush1.bf16.msra.mxu1 %v5354_v13  ;;  %5325 = vmatprep.subr.bf16.mxu0 %v5324_v14  ;;  %v494_v49 = vld [vmem:[#allocation9 + $0x78] sm:$0xff]  ;;  %v491_v52 = vld [vmem:[#allocation9 + $0x60] sm:$0xff]  ;;  %v7220_v53 = vpack.c.bf16 %v492_v45, %v488_v44  ;;  %v489_v54 = vld [vmem:[#allocation9 + $0x50] sm:$0xff] }
  0x75   :  { %5357 = vmatprep.subr.bf16.mxu1 %v5356_v18  ;;  %v493_v55 = vld [vmem:[#allocation9 + $0x70] sm:$0xff]  ;;  %v7222_v56 = vpack.c.bf16 %v494_v49, %v490_v48  ;;  %v496_v57 = vld [vmem:[#allocation9 + $0x88] sm:$0xff]  ;;  %v7225_v60 = vpack.c.bf16 %v491_v52, %v487_v51  ;;  %v498_v61 = vld [vmem:[#allocation9 + $0x98] sm:$0xff] }
  0x76   :  { %v500_v58 = vld [vmem:[#allocation9 + $0xa8] sm:$0xff]  ;;  %v502_v62 = vld [vmem:[#allocation9 + $0xb8] sm:$0xff]  ;;  %v7229_v63 = vpack.c.bf16 %v493_v55, %v489_v54  ;;  %v495_v1 = vld [vmem:[#allocation9 + $0x80] sm:$0xff] }
  0x77   :  { %5327 = vmatpush1.bf16.msra.mxu0 %v5326_v24  ;;  %v105_v59 = vld [vmem:[#allocation4 + $0x8] sm:$0xff]  ;;  %v499_v2 = vld [vmem:[#allocation9 + $0xa0] sm:$0xff]  ;;  %v7233_v3 = vpack.c.bf16 %v500_v58, %v496_v57  ;;  %v497_v4 = vld [vmem:[#allocation9 + $0x90] sm:$0xff]  ;;  %v7236_v6 = vpack.c.bf16 %v502_v62, %v498_v61 }
  0x78   :  { %5359 = vmatpush1.bf16.msra.mxu1 %v5358_v25  ;;  %5329 = vmatprep.subr.bf16.mxu0 %v5328_v26  ;;  %v501_v5 = vld [vmem:[#allocation9 + $0xb0] sm:$0xff]  ;;  %v504_v7 = vld [vmem:[#allocation9 + $0xc8] sm:$0xff]  ;;  %v7239_v10 = vpack.c.bf16 %v499_v2, %v495_v1  ;;  %v506_v11 = vld [vmem:[#allocation9 + $0xd8] sm:$0xff] }
  0x79   :  { %5361 = vmatprep.subr.bf16.mxu1 %v5360_v30  ;;  %v508_v8 = vld [vmem:[#allocation9 + $0xe8] sm:$0xff]  ;;  %v106_v9 = vld [vmem:[#allocation4 + $0x10] sm:$0xff]  ;;  %v510_v12 = vld [vmem:[#allocation9 + $0xf8] sm:$0xff]  ;;  %v7243_v13 = vpack.c.bf16 %v501_v5, %v497_v4 }
  0x7a   :  { %v503_v14 = vld [vmem:[#allocation9 + $0xc0] sm:$0xff]  ;;  %v7247_v16 = vpack.c.bf16 %v508_v8, %v504_v7  ;;  %v505_v17 = vld [vmem:[#allocation9 + $0xd0] sm:$0xff]  ;;  %v7250_v19 = vpack.c.bf16 %v510_v12, %v506_v11  ;;  %v512_v20 = vld [vmem:[#allocation9 + $0x108] sm:$0xff] }
  0x7b   :  { %5331 = vmatpush1.bf16.msra.mxu0 %v5330_v36  ;;  %v507_v15 = vld [vmem:[#allocation9 + $0xe0] sm:$0xff]  ;;  %v509_v18 = vld [vmem:[#allocation9 + $0xf0] sm:$0xff]  ;;  %v516_v21 = vld [vmem:[#allocation9 + $0x128] sm:$0xff] }
  0x7c   :  { %5363 = vmatpush1.bf16.msra.mxu1 %v5362_v37  ;;  %5365 = vmatprep.subr.bf16.mxu0 %v7210_v38  ;;  %v107_v22 = vld [vmem:[#allocation4 + $0x18] sm:$0xff]  ;;  %v7253_v23 = vpack.c.bf16 %v507_v15, %v503_v14  ;;  %v7257_v26 = vpack.c.bf16 %v509_v18, %v505_v17  ;;  %v511_v27 = vld [vmem:[#allocation9 + $0x100] sm:$0xff]  ;;  %v7261_v29 = vpack.c.bf16 %v516_v21, %v512_v20  ;;  %v513_v30 = vld [vmem:[#allocation9 + $0x110] sm:$0xff] }
  0x7d   :  { %5397 = vmatprep.subr.bf16.mxu1 %v7212_v41  ;;  %v514_v24 = vld [vmem:[#allocation9 + $0x118] sm:$0xff]  ;;  %v515_v28 = vld [vmem:[#allocation9 + $0x120] sm:$0xff]  ;;  %v517_v31 = vld [vmem:[#allocation9 + $0x130] sm:$0xff] }
  0x7e   :  { %279 = vmatmul.mubr.f32.vlgmr.msra.gmra.mrb[0].mxu0 %v104_v46  ;;  %v518_v25 = vld [vmem:[#allocation9 + $0x138] sm:$0xff]  ;;  %v520_v33 = vld [vmem:[#allocation9 + $0x148] sm:$0xff]  ;;  %v108_v35 = vld [vmem:[#allocation4 + $0x20] sm:$0xff]  ;;  %v7267_v36 = vpack.c.bf16 %v515_v28, %v511_v27  ;;  %v7271_v40 = vpack.c.bf16 %v517_v31, %v513_v30  ;;  %v194_v28 = vlaneseq }
  0x7f   :  { %392 = vmatmul.mubr.f32.vlgmr.msra.gmra.mrb[0].mxu1 %v104_v46  ;;  %5367 = vmatpush1.bf16.msra.mxu0 %v7214_v47  ;;  %v7264_v32 = vpack.c.bf16 %v518_v25, %v514_v24  ;;  %v524_v34 = vld [vmem:[#allocation9 + $0x168] sm:$0xff]  ;;  %v522_v37 = vld [vmem:[#allocation9 + $0x158] sm:$0xff]  ;;  %v519_v42 = vld [vmem:[#allocation9 + $0x140] sm:$0xff] }
  0x80   :  { %5399 = vmatpush1.bf16.msra.mxu1 %v7217_v50  ;;  %284 = vmatprep.mubr.f32.mxu0 %v7076_v0  ;;  %v526_v39 = vld [vmem:[#allocation9 + $0x178] sm:$0xff]  ;;  %v523_v43 = vld [vmem:[#allocation9 + $0x160] sm:$0xff]  ;;  %v7275_v44 = vpack.c.bf16 %v524_v34, %v520_v33  ;;  %v521_v45 = vld [vmem:[#allocation9 + $0x150] sm:$0xff]  ;;  %v7361_v30 = vshrl.u32 %v194_v28, 7 }
  0x81   :  { %397 = vmatprep.mubr.f32.mxu1 %v7076_v0  ;;  %5369 = vmatprep.subr.bf16.mxu0 %v7220_v53  ;;  %v525_v46 = vld [vmem:[#allocation9 + $0x170] sm:$0xff]  ;;  %v7278_v48 = vpack.c.bf16 %v526_v39, %v522_v37  ;;  %v528_v49 = vld [vmem:[#allocation9 + $0x188] sm:$0xff]  ;;  %v7281_v54 = vpack.c.bf16 %v523_v43, %v519_v42  ;;  %v530_v55 = vld [vmem:[#allocation9 + $0x198] sm:$0xff] }
  0x82   :  { %285 = vmatmul.mubr.f32.gmra.mrb[2].mxu0 %v105_v59  ;;  %5401 = vmatprep.subr.bf16.mxu1 %v7222_v56  ;;  %v532_v51 = vld [vmem:[#allocation9 + $0x1a8] sm:$0xff]  ;;  %v534_v57 = vld [vmem:[#allocation9 + $0x1b8] sm:$0xff]  ;;  %v7285_v58 = vpack.c.bf16 %v525_v46, %v521_v45  ;;  %v531_v61 = vld [vmem:[#allocation9 + $0x1a0] sm:$0xff]  ;;  %v196_v31 = vsub.s32 0, %v7361_v30  ;;  %v200_v34 = vsub.s32 1, %v7361_v30  ;;  %v208_v37 = vsub.s32 3, %v7361_v30 }
  0x83   :  { %398 = vmatmul.mubr.f32.gmra.mrb[2].mxu1 %v105_v59  ;;  %5371 = vmatpush1.bf16.msra.mxu0 %v7225_v60  ;;  %v109_v52 = vld [vmem:[#allocation4 + $0x28] sm:$0xff]  ;;  %v527_v59 = vld [vmem:[#allocation9 + $0x180] sm:$0xff]  ;;  %v7289_v62 = vpack.c.bf16 %v532_v51, %v528_v49  ;;  %v529_v1 = vld [vmem:[#allocation9 + $0x190] sm:$0xff]  ;;  %v7292_v4 = vpack.c.bf16 %v534_v57, %v530_v55  ;;  %v204_v55 = vsub.s32 2, %v7361_v30 }
  0x84   :  { %5403 = vmatpush1.bf16.msra.mxu1 %v7229_v63  ;;  %290 = vmatprep.mubr.f32.mxu0 %v7076_v0  ;;  %v533_v2 = vld [vmem:[#allocation9 + $0x1b0] sm:$0xff]  ;;  %v536_v5 = vld [vmem:[#allocation9 + $0x1c8] sm:$0xff]  ;;  %v538_v11 = vld [vmem:[#allocation9 + $0x1d8] sm:$0xff] }
  0x85   :  { %403 = vmatprep.mubr.f32.mxu1 %v7076_v0  ;;  %5373 = vmatprep.subr.bf16.mxu0 %v7233_v3  ;;  %v540_v7 = vld [vmem:[#allocation9 + $0x1e8] sm:$0xff]  ;;  %v110_v8 = vld [vmem:[#allocation4 + $0x30] sm:$0xff]  ;;  %v542_v12 = vld [vmem:[#allocation9 + $0x1f8] sm:$0xff]  ;;  %v7299_v14 = vpack.c.bf16 %v533_v2, %v529_v1 }
  0x86   :  { %291 = vmatmul.mubr.f32.gmra.mrb[4].mxu0 %v106_v9  ;;  %5405 = vmatprep.subr.bf16.mxu1 %v7236_v6  ;;  %v535_v15 = vld [vmem:[#allocation9 + $0x1c0] sm:$0xff]  ;;  %v7303_v18 = vpack.c.bf16 %v540_v7, %v536_v5  ;;  %v537_v20 = vld [vmem:[#allocation9 + $0x1d0] sm:$0xff]  ;;  %v111_v24 = vld [vmem:[#allocation4 + $0x38] sm:$0xff] }
  0x87   :  { %404 = vmatmul.mubr.f32.gmra.mrb[4].mxu1 %v106_v9  ;;  %5375 = vmatpush1.bf16.msra.mxu0 %v7239_v10  ;;  %v7295_v9 = vpack.c.bf16 %v531_v61, %v527_v59  ;;  %v539_v17 = vld [vmem:[#allocation9 + $0x1e0] sm:$0xff]  ;;  %v541_v21 = vld [vmem:[#allocation9 + $0x1f0] sm:$0xff] }
  0x88   :  { %5407 = vmatpush1.bf16.msra.mxu1 %v7243_v13  ;;  %296 = vmatprep.mubr.f32.mxu0 %v7076_v0  ;;  %v7309_v25 = vpack.c.bf16 %v539_v17, %v535_v15  ;;  %v7313_v27 = vpack.c.bf16 %v541_v21, %v537_v20  ;;  %v192_v33 = vld [vmem:[%s8371_s3] sm:$0xf] }
  0x89   :  { %409 = vmatprep.mubr.f32.mxu1 %v7076_v0  ;;  %5377 = vmatprep.subr.bf16.mxu0 %v7247_v16  ;;  %v7387_v59 = vrot.slane %v192_v33, %v204_v55 }
  0x8a   :  { %297 = vmatmul.mubr.f32.gmra.mrb[6].mxu0 %v107_v22  ;;  %5409 = vmatprep.subr.bf16.mxu1 %v7250_v19 }
  0x8b   :  { %410 = vmatmul.mubr.f32.gmra.mrb[6].mxu1 %v107_v22  ;;  %5379 = vmatpush1.bf16.msra.mxu0 %v7253_v23  ;;  %v7306_v22 = vpack.c.bf16 %v542_v12, %v538_v11 }
  0x8c   :  { %5411 = vmatpush1.bf16.msra.mxu1 %v7257_v26  ;;  %302 = vmatprep.mubr.f32.mxu0 %v7076_v0 }
  0x8d   :  { %415 = vmatprep.mubr.f32.mxu1 %v7076_v0  ;;  %5381 = vmatprep.subr.bf16.mxu0 %v7261_v29 }
  0x8e   :  { %303 = vmatmul.mubr.f32.gmra.mrb[8].mxu0 %v108_v35  ;;  %5413 = vmatprep.subr.bf16.mxu1 %v7264_v32 }
  0x8f   :  { %416 = vmatmul.mubr.f32.gmra.mrb[8].mxu1 %v108_v35  ;;  %5383 = vmatpush1.bf16.msra.mxu0 %v7267_v36  ;;  %v7370_v35 = vrot.slane %v192_v33, %v196_v31 }
  0x90   :  { %5415 = vmatpush1.bf16.msra.mxu1 %v7271_v40  ;;  %308 = vmatprep.mubr.f32.mxu0 %v7076_v0 }
  0x91   :  { %421 = vmatprep.mubr.f32.mxu1 %v7076_v0  ;;  %5385 = vmatprep.subr.bf16.mxu0 %v7275_v44 }
  0x92   :  { %309 = vmatmul.mubr.f32.gmra.mrb[10].mxu0 %v109_v52  ;;  %5417 = vmatprep.subr.bf16.mxu1 %v7278_v48 }
  0x93   :  { %422 = vmatmul.mubr.f32.gmra.mrb[10].mxu1 %v109_v52  ;;  %5387 = vmatpush1.bf16.msra.mxu0 %v7281_v54  ;;  %v7381_v52 = vrot.slane %v192_v33, %v208_v37 }
  0x94   :  { %5419 = vmatpush1.bf16.msra.mxu1 %v7285_v58  ;;  %314 = vmatprep.mubr.f32.mxu0 %v7076_v0 }
  0x95   :  { %427 = vmatprep.mubr.f32.mxu1 %v7076_v0  ;;  %5389 = vmatprep.subr.bf16.mxu0 %v7289_v62 }
  0x96   :  { %315 = vmatmul.mubr.f32.gmra.mrb[12].mxu0 %v110_v8  ;;  %5421 = vmatprep.subr.bf16.mxu1 %v7292_v4 }
  0x97   :  { %428 = vmatmul.mubr.f32.gmra.mrb[12].mxu1 %v110_v8  ;;  %5391 = vmatpush1.bf16.msra.mxu0 %v7295_v9 }
  0x98   :  { %5423 = vmatpush1.bf16.msra.mxu1 %v7299_v14  ;;  %320 = vmatprep.mubr.f32.mxu0 %v7076_v0 }
  0x99   :  { %433 = vmatprep.mubr.f32.mxu1 %v7076_v0  ;;  %5393 = vmatprep.subr.bf16.mxu0 %v7303_v18 }
  0x9a   :  { %321 = vmatmul.mubr.f32.gmra.mrb[14].mxu0 %v111_v24  ;;  %5425 = vmatprep.subr.bf16.mxu1 %v7306_v22 }
  0x9b   :  { %434 = vmatmul.mubr.f32.gmra.mrb[14].mxu1 %v111_v24  ;;  %5395 = vmatpush1.bf16.msra.mxu0 %v7309_v25 }
  0x9c   :  { %5427 = vmatpush1.bf16.msra.mxu1 %v7313_v27  ;;  %607 = vmatprep.mubr.f32.mxu0 %v7076_v0 }
  0x9d   :  { %678 = vmatprep.mubr.f32.mxu1 %v7076_v0  ;;  %5429 = vmatprep.subr.bf16.mxu0 %v7210_v38 }
  0x9e   :  { %608 = vmatmul.mubr.f32.vlgmr.msra.gmra.mrb[0].mxu0 %v7076_v0  ;;  %5461 = vmatprep.subr.bf16.mxu1 %v7212_v41 }
  0x9f   :  { %679 = vmatmul.mubr.f32.vlgmr.msra.gmra.mrb[0].mxu1 %v7076_v0  ;;  %5431 = vmatpush1.bf16.msra.mxu0 %v7214_v47 }
  0xa0   :  { %5463 = vmatpush1.bf16.msra.mxu1 %v7217_v50  ;;  %5433 = vmatprep.subr.bf16.mxu0 %v7220_v53 }
  0xa1   :  { %5465 = vmatprep.subr.bf16.mxu1 %v7222_v56  ;;  %849 = vmatprep.mubr.f32.mxu0 %v7076_v0 }
  0xa2   :  { %920 = vmatprep.mubr.f32.mxu1 %v7076_v0 }
  0xa3   :  { %5435 = vmatpush1.bf16.msra.mxu0 %v7225_v60 }
  0xa4   :  { %5467 = vmatpush1.bf16.msra.mxu1 %v7229_v63  ;;  %5437 = vmatprep.subr.bf16.mxu0 %v7233_v3 }
  0xa5   :  { %5469 = vmatprep.subr.bf16.mxu1 %v7236_v6 }
  0xa7   :  { %5439 = vmatpush1.bf16.msra.mxu0 %v7239_v10 }
  0xa8   :  { %5471 = vmatpush1.bf16.msra.mxu1 %v7243_v13  ;;  %5441 = vmatprep.subr.bf16.mxu0 %v7247_v16 }
  0xa9   :  { %5473 = vmatprep.subr.bf16.mxu1 %v7250_v19 }
  0xab   :  { %5443 = vmatpush1.bf16.msra.mxu0 %v7253_v23 }
  0xac   :  { %5475 = vmatpush1.bf16.msra.mxu1 %v7257_v26  ;;  %5445 = vmatprep.subr.bf16.mxu0 %v7261_v29 }
  0xad   :  { %5477 = vmatprep.subr.bf16.mxu1 %v7264_v32 }
  0xaf   :  { %5447 = vmatpush1.bf16.msra.mxu0 %v7267_v36 }
  0xb0   :  { %5479 = vmatpush1.bf16.msra.mxu1 %v7271_v40  ;;  %5449 = vmatprep.subr.bf16.mxu0 %v7275_v44 }
  0xb1   :  { %5481 = vmatprep.subr.bf16.mxu1 %v7278_v48 }
  0xb3   :  { %5451 = vmatpush1.bf16.msra.mxu0 %v7281_v54 }
  0xb4   :  { %5483 = vmatpush1.bf16.msra.mxu1 %v7285_v58  ;;  %5453 = vmatprep.subr.bf16.mxu0 %v7289_v62 }
  0xb5   :  { %5485 = vmatprep.subr.bf16.mxu1 %v7292_v4 }
  0xb7   :  { %5455 = vmatpush1.bf16.msra.mxu0 %v7295_v9 }
  0xb8   :  { %5487 = vmatpush1.bf16.msra.mxu1 %v7299_v14  ;;  %5457 = vmatprep.subr.bf16.mxu0 %v7303_v18 }
  0xb9   :  { %5489 = vmatprep.subr.bf16.mxu1 %v7306_v22 }
  0xbb   :  { %5459 = vmatpush1.bf16.msra.mxu0 %v7309_v25 }
  0xbc   :  { %5491 = vmatpush1.bf16.msra.mxu1 %v7313_v27  ;;  %5493 = vmatprep.subr.bf16.mxu0 %v7210_v38  ;;  %v7374_v38 = vrot.slane %v192_v33, %v200_v34 }
  0xbd   :  { %5525 = vmatprep.subr.bf16.mxu1 %v7212_v41 }
 0x171   :  { %v609_v41 = vpop.f32.mrb[0].mxu0 }
 0x172   :  { %v6516_v39 = vadd.f32 %v609_v41, %v7370_v35  ;;  %v680_v42 = vpop.f32.mrb[0].mxu1  ;;  %v611_v43 = vpop.f32.mrb[1].mxu0 }
 0x173   :  { %v6517_v45 = vadd.f32 %v611_v43, %v7374_v38  ;;  %v682_v46 = vpop.f32.mrb[1].mxu1  ;;  %v6532_v1 = vadd.f32 %v680_v42, %v7387_v59 }
 0x174   :  { %v5111_v49 = vmul.f32 -1.442695, %v6516_v39  ;;  %v6533_v57 = vadd.f32 %v682_v46, %v7381_v52 }
 0x175   :  { %v5112_v51 = vmul.f32 -1.442695, %v6517_v45 }
 0x176   :  { %6655 = vpow2.f32 %v5111_v49  ;;  %v5113_v61 = vmul.f32 -1.442695, %v6533_v57 }
 0x177   :  { %6657 = vpow2.f32 %v5112_v51 }
 0x178   :  { %6659 = vpow2.f32 %v5113_v61 }
 0x179   :  { %6661 = vtanh.f32 %v6532_v1 }
 0x180   :  { %v6656_v2 = vpop.eup %6655 }
 0x181   :  { %v6658_v5 = vpop.eup %6657  ;;  %v692_v7 = vadd.f32 1.0, %v6656_v2 }
 0x182   :  { %v698_v8 = vadd.f32 1.0, %v6658_v5  ;;  %v6660_v11 = vpop.eup %6659 }
 0x183   :  { %6663 = vrcp.f32 %v692_v7  ;;  %v6662_v12 = vpop.eup %6661  ;;  %v705_v21 = vadd.f32 1.0, %v6660_v11 }
 0x184   :  { %6665 = vrcp.f32 %v698_v8 }
 0x185   :  { %6667 = vrcp.f32 %v705_v21 }
 0x18d   :  { %v6664_v15 = vpop.eup %6663 }
 0x18e   :  { %v6666_v17 = vpop.eup %6665  ;;  %v709_v20 = vmul.f32 %v6664_v15, %v6662_v12 }
 0x18f   :  { %v708_v24 = vmul.f32 0.0, %v6666_v17  ;;  %v6668_v41 = vpop.eup %6667 }
 0x191   :  { %v7390_v33 = vadd.f32 %v709_v20, %v708_v24 }
 0x193   :  { %6669 = vtanh.f32 %v7390_v33 }
 0x19d   :  { %v6670_v39 = vpop.eup %6669 }
 0x19e   :  { %v7393_v42 = vmul.f32 %v6670_v39, %v6668_v41  ;;  %v1208_v39 = vld [vmem:[#allocation9 + $0x8] sm:$0xff] }
 0x1a0   :  { %850 = vmatmul.mubr.f32.vlgmr.msra.gmra.mrb[2].mxu0 %v7393_v42  ;;  %921 = vmatmul.mubr.f32.vlgmr.msra.gmra.mrb[2].mxu1 %v7393_v42 }
 0x1a1   :  { %5495 = vmatpush1.bf16.msra.mxu0 %v7214_v47  ;;  %5527 = vmatpush1.bf16.msra.mxu1 %v7217_v50 }
 0x1a2   :  { %5497 = vmatprep.subr.bf16.mxu0 %v7220_v53  ;;  %5529 = vmatprep.subr.bf16.mxu1 %v7222_v56 }
 0x1a3   :  { %1092 = vmatprep.mubr.f32.mxu0 %v7076_v0  ;;  %1163 = vmatprep.mubr.f32.mxu1 %v7076_v0 }
 0x1a5   :  { %5499 = vmatpush1.bf16.msra.mxu0 %v7225_v60  ;;  %5531 = vmatpush1.bf16.msra.mxu1 %v7229_v63 }
 0x1a6   :  { %5501 = vmatprep.subr.bf16.mxu0 %v7233_v3  ;;  %5533 = vmatprep.subr.bf16.mxu1 %v7236_v6 }
 0x1a9   :  { %5503 = vmatpush1.bf16.msra.mxu0 %v7239_v10  ;;  %5535 = vmatpush1.bf16.msra.mxu1 %v7243_v13 }
 0x1aa   :  { %5505 = vmatprep.subr.bf16.mxu0 %v7247_v16  ;;  %5537 = vmatprep.subr.bf16.mxu1 %v7250_v19 }
 0x1ad   :  { %5507 = vmatpush1.bf16.msra.mxu0 %v7253_v23  ;;  %5539 = vmatpush1.bf16.msra.mxu1 %v7257_v26 }
 0x1ae   :  { %5509 = vmatprep.subr.bf16.mxu0 %v7261_v29  ;;  %5541 = vmatprep.subr.bf16.mxu1 %v7264_v32 }
 0x1b1   :  { %5511 = vmatpush1.bf16.msra.mxu0 %v7267_v36  ;;  %5543 = vmatpush1.bf16.msra.mxu1 %v7271_v40 }
 0x1b2   :  { %5513 = vmatprep.subr.bf16.mxu0 %v7275_v44  ;;  %5545 = vmatprep.subr.bf16.mxu1 %v7278_v48 }
 0x1b5   :  { %5515 = vmatpush1.bf16.msra.mxu0 %v7281_v54  ;;  %5547 = vmatpush1.bf16.msra.mxu1 %v7285_v58 }
 0x1b6   :  { %5517 = vmatprep.subr.bf16.mxu0 %v7289_v62  ;;  %5549 = vmatprep.subr.bf16.mxu1 %v7292_v4 }
 0x1b9   :  { %5519 = vmatpush1.bf16.msra.mxu0 %v7295_v9  ;;  %5551 = vmatpush1.bf16.msra.mxu1 %v7299_v14 }
 0x1ba   :  { %5521 = vmatprep.subr.bf16.mxu0 %v7303_v18  ;;  %5553 = vmatprep.subr.bf16.mxu1 %v7306_v22 }
 0x1bd   :  { %5523 = vmatpush1.bf16.msra.mxu0 %v7309_v25  ;;  %5555 = vmatpush1.bf16.msra.mxu1 %v7313_v27 }
 0x273   :  { %v851_v47 = vpop.f32.mrb[2].mxu0  ;;  %v922_v50 = vpop.f32.mrb[2].mxu1 }
 0x274   :  { %v6518_v53 = vadd.f32 %v851_v47, %v7370_v35  ;;  %v853_v56 = vpop.f32.mrb[3].mxu0  ;;  %v924_v60 = vpop.f32.mrb[3].mxu1  ;;  %v6534_v51 = vadd.f32 %v922_v50, %v7387_v59  ;;  %v1212_v47 = vld [vmem:[#allocation9 + $0x28] sm:$0xff] }
 0x275   :  { %v6519_v63 = vadd.f32 %v853_v56, %v7374_v38  ;;  %v6535_v46 = vadd.f32 %v924_v60, %v7381_v52  ;;  %v7443_v50 = vpack.c.bf16 %v1212_v47, %v1208_v39  ;;  %v1207_v56 = vld [vmem:[#allocation9] sm:$0xff]  ;;  %v1471_v39 = vld [vmem:[#allocation9 + $0xa8] sm:$0xff]  ;;  %v1469_v47 = vld [vmem:[#allocation9 + $0x98] sm:$0xff] }
 0x276   :  { %v5114_v43 = vmul.f32 -1.442695, %v6518_v53  ;;  %v1214_v53 = vld [vmem:[#allocation9 + $0x38] sm:$0xff]  ;;  %v1211_v60 = vld [vmem:[#allocation9 + $0x20] sm:$0xff] }
 0x277   :  { %v5115_v45 = vmul.f32 -1.442695, %v6519_v63  ;;  %v5116_v49 = vmul.f32 -1.442695, %v6535_v46  ;;  %v1213_v46 = vld [vmem:[#allocation9 + $0x30] sm:$0xff]  ;;  %5557 = vmatprep.subr.bf16.mxu0 %v7443_v50 }
 0x278   :  { %6671 = vpow2.f32 %v5114_v43  ;;  %v7447_v43 = vpack.c.bf16 %v1211_v60, %v1207_v56  ;;  %v1466_v56 = vld [vmem:[#allocation9 + $0x80] sm:$0xff] }
 0x279   :  { %6673 = vpow2.f32 %v5115_v45  ;;  %v1209_v45 = vld [vmem:[#allocation9 + $0x10] sm:$0xff]  ;;  %v1470_v60 = vld [vmem:[#allocation9 + $0xa0] sm:$0xff] }
 0x27a   :  { %6675 = vpow2.f32 %v5116_v49  ;;  %v7450_v49 = vpack.c.bf16 %v1213_v46, %v1209_v45  ;;  %v7517_v46 = vpack.c.bf16 %v1470_v60, %v1466_v56  ;;  %v1492_v56 = vld [vmem:[#allocation9 + $0x150] sm:$0xff] }
 0x27b   :  { %6677 = vtanh.f32 %v6534_v51  ;;  %v1216_v51 = vld [vmem:[#allocation9 + $0x48] sm:$0xff]  ;;  %v1496_v60 = vld [vmem:[#allocation9 + $0x170] sm:$0xff] }
 0x282   :  { %v6672_v57 = vpop.eup %6671 }
 0x283   :  { %v6674_v61 = vpop.eup %6673  ;;  %v934_v1 = vadd.f32 1.0, %v6672_v57  ;;  %v1220_v57 = vld [vmem:[#allocation9 + $0x68] sm:$0xff] }
 0x284   :  { %v940_v2 = vadd.f32 1.0, %v6674_v61  ;;  %v6676_v5 = vpop.eup %6675  ;;  %v1218_v61 = vld [vmem:[#allocation9 + $0x58] sm:$0xff] }
 0x285   :  { %6679 = vrcp.f32 %v934_v1  ;;  %v6678_v7 = vpop.eup %6677  ;;  %v947_v15 = vadd.f32 1.0, %v6676_v5  ;;  %v7455_v1 = vpack.c.bf16 %v1220_v57, %v1216_v51  ;;  %v1215_v5 = vld [vmem:[#allocation9 + $0x40] sm:$0xff]  ;;  %v1468_v51 = vld [vmem:[#allocation9 + $0x90] sm:$0xff] }
 0x286   :  { %6681 = vrcp.f32 %v940_v2  ;;  %v1222_v2 = vld [vmem:[#allocation9 + $0x78] sm:$0xff]  ;;  %v1472_v57 = vld [vmem:[#allocation9 + $0xb0] sm:$0xff] }
 0x287   :  { %6683 = vrcp.f32 %v947_v15  ;;  %v1221_v15 = vld [vmem:[#allocation9 + $0x70] sm:$0xff] }
 0x28f   :  { %v6680_v8 = vpop.eup %6679 }
 0x290   :  { %v6682_v11 = vpop.eup %6681  ;;  %v951_v12 = vmul.f32 %v6680_v8, %v6678_v7  ;;  %v1219_v7 = vld [vmem:[#allocation9 + $0x60] sm:$0xff]  ;;  %v7457_v8 = vpack.c.bf16 %v1222_v2, %v1218_v61  ;;  %v7520_v61 = vpack.c.bf16 %v1472_v57, %v1468_v51  ;;  %v1475_v2 = vld [vmem:[#allocation9 + $0xc8] sm:$0xff]  ;;  %v7556_v57 = vpack.c.bf16 %v1496_v60, %v1492_v56 }
 0x291   :  { %v950_v17 = vmul.f32 %v6682_v11, %v7390_v33  ;;  %v6684_v21 = vpop.eup %6683  ;;  %v1210_v33 = vld [vmem:[#allocation9 + $0x18] sm:$0xff]  ;;  %v7459_v11 = vpack.c.bf16 %v1219_v7, %v1215_v5  ;;  %v1479_v5 = vld [vmem:[#allocation9 + $0xe8] sm:$0xff] }
 0x292   :  { %v7445_v63 = vpack.c.bf16 %v1214_v53, %v1210_v33  ;;  %v1473_v53 = vld [vmem:[#allocation9 + $0xb8] sm:$0xff]  ;;  %v1499_v51 = vld [vmem:[#allocation9 + $0x188] sm:$0xff] }
 0x293   :  { %v7434_v20 = vadd.f32 %v951_v12, %v950_v17  ;;  %v1217_v12 = vld [vmem:[#allocation9 + $0x50] sm:$0xff]  ;;  %v7515_v45 = vpack.c.bf16 %v1473_v53, %v1469_v47  ;;  %v1477_v7 = vld [vmem:[#allocation9 + $0xd8] sm:$0xff] }
 0x294   :  { %5589 = vmatprep.subr.bf16.mxu1 %v7445_v63  ;;  %v7462_v17 = vpack.c.bf16 %v1221_v15, %v1217_v12  ;;  %v7525_v12 = vpack.c.bf16 %v1479_v5, %v1475_v2  ;;  %v1481_v15 = vld [vmem:[#allocation9 + $0xf8] sm:$0xff]  ;;  %v1503_v2 = vld [vmem:[#allocation9 + $0x1a8] sm:$0xff] }
 0x295   :  { %6685 = vtanh.f32 %v7434_v20  ;;  %v1501_v5 = vld [vmem:[#allocation9 + $0x198] sm:$0xff] }
 0x29f   :  { %v6686_v24 = vpop.eup %6685 }
 0x2a0   :  { %v7437_v41 = vmul.f32 %v6686_v24, %v6684_v21 }
 0x2a2   :  { %1093 = vmatmul.mubr.f32.vlgmr.msra.gmra.mrb[4].mxu0 %v7437_v41  ;;  %1164 = vmatmul.mubr.f32.vlgmr.msra.gmra.mrb[4].mxu1 %v7437_v41 }
 0x2a3   :  { %1335 = vmatprep.mubr.f32.mxu0 %v7076_v0  ;;  %1406 = vmatprep.mubr.f32.mxu1 %v7076_v0 }
 0x2a4   :  { %5559 = vmatpush1.bf16.msra.mxu0 %v7447_v43  ;;  %5591 = vmatpush1.bf16.msra.mxu1 %v7450_v49 }
 0x2a5   :  { %5561 = vmatprep.subr.bf16.mxu0 %v7455_v1  ;;  %5593 = vmatprep.subr.bf16.mxu1 %v7457_v8 }
 0x2a8   :  { %5563 = vmatpush1.bf16.msra.mxu0 %v7459_v11  ;;  %5595 = vmatpush1.bf16.msra.mxu1 %v7462_v17 }
 0x2a9   :  { %5565 = vmatprep.subr.bf16.mxu0 %v7233_v3  ;;  %5597 = vmatprep.subr.bf16.mxu1 %v7236_v6 }
 0x2ac   :  { %5567 = vmatpush1.bf16.msra.mxu0 %v7239_v10  ;;  %5599 = vmatpush1.bf16.msra.mxu1 %v7243_v13 }
 0x2ad   :  { %5569 = vmatprep.subr.bf16.mxu0 %v7247_v16  ;;  %5601 = vmatprep.subr.bf16.mxu1 %v7250_v19 }
 0x2b0   :  { %5571 = vmatpush1.bf16.msra.mxu0 %v7253_v23  ;;  %5603 = vmatpush1.bf16.msra.mxu1 %v7257_v26 }
 0x2b1   :  { %5573 = vmatprep.subr.bf16.mxu0 %v7261_v29  ;;  %5605 = vmatprep.subr.bf16.mxu1 %v7264_v32 }
 0x2b4   :  { %5575 = vmatpush1.bf16.msra.mxu0 %v7267_v36  ;;  %5607 = vmatpush1.bf16.msra.mxu1 %v7271_v40 }
 0x2b5   :  { %5577 = vmatprep.subr.bf16.mxu0 %v7275_v44  ;;  %5609 = vmatprep.subr.bf16.mxu1 %v7278_v48 }
 0x2b8   :  { %5579 = vmatpush1.bf16.msra.mxu0 %v7281_v54  ;;  %5611 = vmatpush1.bf16.msra.mxu1 %v7285_v58 }
 0x2b9   :  { %5581 = vmatprep.subr.bf16.mxu0 %v7289_v62  ;;  %5613 = vmatprep.subr.bf16.mxu1 %v7292_v4 }
 0x2bc   :  { %5583 = vmatpush1.bf16.msra.mxu0 %v7295_v9  ;;  %5615 = vmatpush1.bf16.msra.mxu1 %v7299_v14 }
 0x2bd   :  { %5585 = vmatprep.subr.bf16.mxu0 %v7303_v18  ;;  %5617 = vmatprep.subr.bf16.mxu1 %v7306_v22 }
 0x2c0   :  { %5587 = vmatpush1.bf16.msra.mxu0 %v7309_v25  ;;  %5619 = vmatpush1.bf16.msra.mxu1 %v7313_v27 }
 0x2c1   :  { %5621 = vmatprep.subr.bf16.mxu0 %v7443_v50  ;;  %5653 = vmatprep.subr.bf16.mxu1 %v7445_v63 }
 0x375   :  { %v1094_v3 = vpop.f32.mrb[4].mxu0  ;;  %v1165_v6 = vpop.f32.mrb[4].mxu1 }
 0x376   :  { %v6520_v10 = vadd.f32 %v1094_v3, %v7370_v35  ;;  %v1096_v13 = vpop.f32.mrb[5].mxu0  ;;  %v1167_v16 = vpop.f32.mrb[5].mxu1  ;;  %v6536_v36 = vadd.f32 %v1165_v6, %v7387_v59  ;;  %v1474_v3 = vld [vmem:[#allocation9 + $0xc0] sm:$0xff] }
 0x377   :  { %v6521_v19 = vadd.f32 %v1096_v13, %v7374_v38  ;;  %v6537_v29 = vadd.f32 %v1167_v16, %v7381_v52  ;;  %v1478_v6 = vld [vmem:[#allocation9 + $0xe0] sm:$0xff]  ;;  %v1476_v16 = vld [vmem:[#allocation9 + $0xd0] sm:$0xff] }
 0x378   :  { %v5117_v23 = vmul.f32 -1.442695, %v6520_v10  ;;  %v7527_v10 = vpack.c.bf16 %v1481_v15, %v1477_v7  ;;  %v7529_v13 = vpack.c.bf16 %v1478_v6, %v1474_v3  ;;  %v1505_v7 = vld [vmem:[#allocation9 + $0x1b8] sm:$0xff]  ;;  %v7559_v15 = vpack.c.bf16 %v1503_v2, %v1499_v51  ;;  %v1498_v6 = vld [vmem:[#allocation9 + $0x180] sm:$0xff] }
 0x379   :  { %v5118_v26 = vmul.f32 -1.442695, %v6521_v19  ;;  %v5119_v32 = vmul.f32 -1.442695, %v6537_v29  ;;  %v1480_v19 = vld [vmem:[#allocation9 + $0xf0] sm:$0xff]  ;;  %v1487_v29 = vld [vmem:[#allocation9 + $0x128] sm:$0xff]  ;;  %v7561_v3 = vpack.c.bf16 %v1505_v7, %v1501_v5 }
 0x37a   :  { %6687 = vpow2.f32 %v5117_v23  ;;  %v7532_v23 = vpack.c.bf16 %v1480_v19, %v1476_v16  ;;  %v1502_v16 = vld [vmem:[#allocation9 + $0x1a0] sm:$0xff]  ;;  %v1500_v19 = vld [vmem:[#allocation9 + $0x190] sm:$0xff] }
 0x37b   :  { %6689 = vpow2.f32 %v5118_v26  ;;  %v1483_v26 = vld [vmem:[#allocation9 + $0x108] sm:$0xff] }
 0x37c   :  { %6691 = vpow2.f32 %v5119_v32  ;;  %v1485_v32 = vld [vmem:[#allocation9 + $0x118] sm:$0xff] }
 0x37d   :  { %6693 = vtanh.f32 %v6536_v36  ;;  %v7537_v36 = vpack.c.bf16 %v1487_v29, %v1483_v26  ;;  %v7564_v26 = vpack.c.bf16 %v1502_v16, %v1498_v6  ;;  %v1504_v29 = vld [vmem:[#allocation9 + $0x1b0] sm:$0xff] }
 0x384   :  { %v6688_v40 = vpop.eup %6687 }
 0x385   :  { %v6690_v44 = vpop.eup %6689  ;;  %v1177_v48 = vadd.f32 1.0, %v6688_v40  ;;  %v1489_v40 = vld [vmem:[#allocation9 + $0x138] sm:$0xff] }
 0x386   :  { %v1183_v54 = vadd.f32 1.0, %v6690_v44  ;;  %v6692_v58 = vpop.eup %6691  ;;  %v1482_v44 = vld [vmem:[#allocation9 + $0x100] sm:$0xff] }
 0x387   :  { %6695 = vrcp.f32 %v1177_v48  ;;  %v6694_v62 = vpop.eup %6693  ;;  %v1190_v18 = vadd.f32 1.0, %v6692_v58  ;;  %v1486_v48 = vld [vmem:[#allocation9 + $0x120] sm:$0xff] }
 0x388   :  { %6697 = vrcp.f32 %v1183_v54  ;;  %v7539_v54 = vpack.c.bf16 %v1489_v40, %v1485_v32  ;;  %v7541_v58 = vpack.c.bf16 %v1486_v48, %v1482_v44  ;;  %v1507_v32 = vld [vmem:[#allocation9 + $0x1c8] sm:$0xff]  ;;  %v7568_v44 = vpack.c.bf16 %v1504_v29, %v1500_v19 }
 0x389   :  { %6699 = vrcp.f32 %v1190_v18  ;;  %v1495_v18 = vld [vmem:[#allocation9 + $0x168] sm:$0xff] }
 0x38a   :  { %v1511_v40 = vld [vmem:[#allocation9 + $0x1e8] sm:$0xff] }
 0x38b   :  { %v7570_v48 = vpack.c.bf16 %v1511_v40, %v1507_v32 }
 0x391   :  { %v6696_v4 = vpop.eup %6695 }
 0x392   :  { %v6698_v9 = vpop.eup %6697  ;;  %v1194_v14 = vmul.f32 %v6696_v4, %v6694_v62  ;;  %v1484_v62 = vld [vmem:[#allocation9 + $0x110] sm:$0xff] }
 0x393   :  { %v1193_v22 = vmul.f32 %v6698_v9, %v7434_v20  ;;  %v6700_v27 = vpop.eup %6699  ;;  %v1467_v20 = vld [vmem:[#allocation9 + $0x88] sm:$0xff]  ;;  %v1488_v4 = vld [vmem:[#allocation9 + $0x130] sm:$0xff] }
 0x394   :  { %v7513_v33 = vpack.c.bf16 %v1471_v39, %v1467_v20  ;;  %v7544_v9 = vpack.c.bf16 %v1488_v4, %v1484_v62  ;;  %v1490_v20 = vld [vmem:[#allocation9 + $0x140] sm:$0xff]  ;;  %v1509_v62 = vld [vmem:[#allocation9 + $0x1d8] sm:$0xff] }
 0x395   :  { %v7498_v25 = vadd.f32 %v1194_v14, %v1193_v22  ;;  %v1491_v14 = vld [vmem:[#allocation9 + $0x148] sm:$0xff]  ;;  %v1493_v22 = vld [vmem:[#allocation9 + $0x158] sm:$0xff]  ;;  %v1494_v39 = vld [vmem:[#allocation9 + $0x160] sm:$0xff] }
 0x396   :  { %v7553_v53 = vpack.c.bf16 %v1494_v39, %v1490_v20  ;;  %v1513_v4 = vld [vmem:[#allocation9 + $0x1f8] sm:$0xff]  ;;  %v1512_v20 = vld [vmem:[#allocation9 + $0x1f0] sm:$0xff] }
 0x397   :  { %6701 = vtanh.f32 %v7498_v25 }
 0x3a1   :  { %v6702_v21 = vpop.eup %6701 }
 0x3a2   :  { %v7501_v24 = vmul.f32 %v6702_v21, %v6700_v27  ;;  %v7548_v27 = vpack.c.bf16 %v1495_v18, %v1491_v14  ;;  %v1497_v21 = vld [vmem:[#allocation9 + $0x178] sm:$0xff]  ;;  %v1506_v14 = vld [vmem:[#allocation9 + $0x1c0] sm:$0xff]  ;;  %v7573_v18 = vpack.c.bf16 %v1513_v4, %v1509_v62 }
 0x3a3   :  { %v7551_v47 = vpack.c.bf16 %v1497_v21, %v1493_v22  ;;  %v1510_v22 = vld [vmem:[#allocation9 + $0x1e0] sm:$0xff]  ;;  %v1508_v21 = vld [vmem:[#allocation9 + $0x1d0] sm:$0xff] }
 0x3a4   :  { %1336 = vmatmul.mubr.f32.vlgmr.msra.gmra.mrb[6].mxu0 %v7501_v24  ;;  %1407 = vmatmul.mubr.f32.vlgmr.msra.gmra.mrb[6].mxu1 %v7501_v24  ;;  %v7576_v39 = vpack.c.bf16 %v1510_v22, %v1506_v14  ;;  %v7580_v56 = vpack.c.bf16 %v1512_v20, %v1508_v21 }
 0x3a5   :  { %5623 = vmatpush1.bf16.msra.mxu0 %v7447_v43  ;;  %5655 = vmatpush1.bf16.msra.mxu1 %v7450_v49 }
 0x3a6   :  { %5625 = vmatprep.subr.bf16.mxu0 %v7455_v1  ;;  %5657 = vmatprep.subr.bf16.mxu1 %v7457_v8 }
 0x3a7   :  { %1578 = vmatprep.mubr.f32.mxu0 %v7076_v0  ;;  %1649 = vmatprep.mubr.f32.mxu1 %v7076_v0 }
 0x3a9   :  { %5627 = vmatpush1.bf16.msra.mxu0 %v7459_v11  ;;  %5659 = vmatpush1.bf16.msra.mxu1 %v7462_v17 }
 0x3aa   :  { %5629 = vmatprep.subr.bf16.mxu0 %v7513_v33  ;;  %5661 = vmatprep.subr.bf16.mxu1 %v7515_v45 }
 0x3ad   :  { %5631 = vmatpush1.bf16.msra.mxu0 %v7517_v46  ;;  %5663 = vmatpush1.bf16.msra.mxu1 %v7520_v61 }
 0x3ae   :  { %5633 = vmatprep.subr.bf16.mxu0 %v7525_v12  ;;  %5665 = vmatprep.subr.bf16.mxu1 %v7527_v10 }
 0x3b1   :  { %5635 = vmatpush1.bf16.msra.mxu0 %v7529_v13  ;;  %5667 = vmatpush1.bf16.msra.mxu1 %v7532_v23 }
 0x3b2   :  { %5637 = vmatprep.subr.bf16.mxu0 %v7537_v36  ;;  %5669 = vmatprep.subr.bf16.mxu1 %v7539_v54 }
 0x3b5   :  { %5639 = vmatpush1.bf16.msra.mxu0 %v7541_v58  ;;  %5671 = vmatpush1.bf16.msra.mxu1 %v7544_v9 }
 0x3b6   :  { %5641 = vmatprep.subr.bf16.mxu0 %v7548_v27  ;;  %5673 = vmatprep.subr.bf16.mxu1 %v7551_v47 }
 0x3b9   :  { %5643 = vmatpush1.bf16.msra.mxu0 %v7553_v53  ;;  %5675 = vmatpush1.bf16.msra.mxu1 %v7556_v57 }
 0x3ba   :  { %5645 = vmatprep.subr.bf16.mxu0 %v7559_v15  ;;  %5677 = vmatprep.subr.bf16.mxu1 %v7561_v3 }
 0x3bd   :  { %5647 = vmatpush1.bf16.msra.mxu0 %v7564_v26  ;;  %5679 = vmatpush1.bf16.msra.mxu1 %v7568_v44 }
 0x3be   :  { %5649 = vmatprep.subr.bf16.mxu0 %v7570_v48  ;;  %5681 = vmatprep.subr.bf16.mxu1 %v7573_v18 }
 0x3c1   :  { %5651 = vmatpush1.bf16.msra.mxu0 %v7576_v39  ;;  %5683 = vmatpush1.bf16.msra.mxu1 %v7580_v56 }
 0x3c2   :  { %5685 = vmatprep.subr.bf16.mxu0 %v7443_v50  ;;  %5717 = vmatprep.subr.bf16.mxu1 %v7445_v63 }
 0x477   :  { %v1337_v60 = vpop.f32.mrb[6].mxu0  ;;  %v1408_v51 = vpop.f32.mrb[6].mxu1 }
 0x478   :  { %v6522_v2 = vadd.f32 %v1337_v60, %v7370_v35  ;;  %v1339_v5 = vpop.f32.mrb[7].mxu0  ;;  %v1410_v7 = vpop.f32.mrb[7].mxu1  ;;  %v6538_v40 = vadd.f32 %v1408_v51, %v7387_v59 }
 0x479   :  { %v6523_v6 = vadd.f32 %v1339_v5, %v7374_v38  ;;  %v6539_v29 = vadd.f32 %v1410_v7, %v7381_v52 }
 0x47a   :  { %v5120_v16 = vmul.f32 -1.442695, %v6522_v2 }
 0x47b   :  { %v5121_v19 = vmul.f32 -1.442695, %v6523_v6  ;;  %v5122_v32 = vmul.f32 -1.442695, %v6539_v29 }
 0x47c   :  { %6703 = vpow2.f32 %v5120_v16 }
 0x47d   :  { %6705 = vpow2.f32 %v5121_v19 }
 0x47e   :  { %6707 = vpow2.f32 %v5122_v32 }
 0x47f   :  { %6709 = vtanh.f32 %v6538_v40 }
 0x486   :  { %v6704_v62 = vpop.eup %6703 }
 0x487   :  { %v6706_v4 = vpop.eup %6705  ;;  %v1420_v14 = vadd.f32 1.0, %v6704_v62 }
 0x488   :  { %v1426_v22 = vadd.f32 1.0, %v6706_v4  ;;  %v6708_v21 = vpop.eup %6707 }
 0x489   :  { %6711 = vrcp.f32 %v1420_v14  ;;  %v6710_v20 = vpop.eup %6709  ;;  %v1433_v6 = vadd.f32 1.0, %v6708_v21 }
 0x48a   :  { %6713 = vrcp.f32 %v1426_v22 }
 0x48b   :  { %6715 = vrcp.f32 %v1433_v6 }
 0x493   :  { %v6712_v60 = vpop.eup %6711 }
 0x494   :  { %v6714_v2 = vpop.eup %6713  ;;  %v1437_v5 = vmul.f32 %v6712_v60, %v6710_v20 }
 0x495   :  { %v1436_v16 = vmul.f32 %v6714_v2, %v7498_v25  ;;  %v6716_v51 = vpop.eup %6715 }
 0x497   :  { %v7592_v7 = vadd.f32 %v1437_v5, %v1436_v16 }
 0x499   :  { %6717 = vtanh.f32 %v7592_v7 }
 0x4a3   :  { %v6718_v19 = vpop.eup %6717 }
 0x4a4   :  { %v7595_v29 = vmul.f32 %v6718_v19, %v6716_v51 }
 0x4a6   :  { %1579 = vmatmul.mubr.f32.vlgmr.msra.gmra.mrb[8].mxu0 %v7595_v29  ;;  %1650 = vmatmul.mubr.f32.vlgmr.msra.gmra.mrb[8].mxu1 %v7595_v29 }
 0x4a7   :  { %5687 = vmatpush1.bf16.msra.mxu0 %v7447_v43  ;;  %5719 = vmatpush1.bf16.msra.mxu1 %v7450_v49 }
 0x4a8   :  { %5689 = vmatprep.subr.bf16.mxu0 %v7455_v1  ;;  %5721 = vmatprep.subr.bf16.mxu1 %v7457_v8 }
 0x4a9   :  { %1821 = vmatprep.mubr.f32.mxu0 %v7076_v0  ;;  %1892 = vmatprep.mubr.f32.mxu1 %v7076_v0 }
 0x4ab   :  { %5691 = vmatpush1.bf16.msra.mxu0 %v7459_v11  ;;  %5723 = vmatpush1.bf16.msra.mxu1 %v7462_v17 }
 0x4ac   :  { %5693 = vmatprep.subr.bf16.mxu0 %v7513_v33  ;;  %5725 = vmatprep.subr.bf16.mxu1 %v7515_v45 }
 0x4af   :  { %5695 = vmatpush1.bf16.msra.mxu0 %v7517_v46  ;;  %5727 = vmatpush1.bf16.msra.mxu1 %v7520_v61 }
 0x4b0   :  { %5697 = vmatprep.subr.bf16.mxu0 %v7525_v12  ;;  %5729 = vmatprep.subr.bf16.mxu1 %v7527_v10 }
 0x4b3   :  { %5699 = vmatpush1.bf16.msra.mxu0 %v7529_v13  ;;  %5731 = vmatpush1.bf16.msra.mxu1 %v7532_v23 }
 0x4b4   :  { %5701 = vmatprep.subr.bf16.mxu0 %v7537_v36  ;;  %5733 = vmatprep.subr.bf16.mxu1 %v7539_v54 }
 0x4b7   :  { %5703 = vmatpush1.bf16.msra.mxu0 %v7541_v58  ;;  %5735 = vmatpush1.bf16.msra.mxu1 %v7544_v9 }
 0x4b8   :  { %5705 = vmatprep.subr.bf16.mxu0 %v7548_v27  ;;  %5737 = vmatprep.subr.bf16.mxu1 %v7551_v47 }
 0x4bb   :  { %5707 = vmatpush1.bf16.msra.mxu0 %v7553_v53  ;;  %5739 = vmatpush1.bf16.msra.mxu1 %v7556_v57 }
 0x4bc   :  { %5709 = vmatprep.subr.bf16.mxu0 %v7559_v15  ;;  %5741 = vmatprep.subr.bf16.mxu1 %v7561_v3 }
 0x4bf   :  { %5711 = vmatpush1.bf16.msra.mxu0 %v7564_v26  ;;  %5743 = vmatpush1.bf16.msra.mxu1 %v7568_v44 }
 0x4c0   :  { %5713 = vmatprep.subr.bf16.mxu0 %v7570_v48  ;;  %5745 = vmatprep.subr.bf16.mxu1 %v7573_v18 }
 0x4c3   :  { %5715 = vmatpush1.bf16.msra.mxu0 %v7576_v39  ;;  %5747 = vmatpush1.bf16.msra.mxu1 %v7580_v56 }
 0x4c4   :  { %5749 = vmatprep.subr.bf16.mxu0 %v7443_v50  ;;  %5781 = vmatprep.subr.bf16.mxu1 %v7445_v63 }
 0x579   :  { %v1580_v25 = vpop.f32.mrb[8].mxu0  ;;  %v1651_v32 = vpop.f32.mrb[8].mxu1 }
 0x57a   :  { %v6524_v40 = vadd.f32 %v1580_v25, %v7370_v35  ;;  %v1582_v62 = vpop.f32.mrb[9].mxu0  ;;  %v1653_v4 = vpop.f32.mrb[9].mxu1  ;;  %v6540_v2 = vadd.f32 %v1651_v32, %v7387_v59 }
 0x57b   :  { %v6525_v14 = vadd.f32 %v1582_v62, %v7374_v38  ;;  %v6541_v20 = vadd.f32 %v1653_v4, %v7381_v52 }
 0x57c   :  { %v5123_v22 = vmul.f32 -1.442695, %v6524_v40 }
 0x57d   :  { %v5124_v21 = vmul.f32 -1.442695, %v6525_v14  ;;  %v5125_v60 = vmul.f32 -1.442695, %v6541_v20 }
 0x57e   :  { %6719 = vpow2.f32 %v5123_v22 }
 0x57f   :  { %6721 = vpow2.f32 %v5124_v21 }
 0x580   :  { %6723 = vpow2.f32 %v5125_v60 }
 0x581   :  { %6725 = vtanh.f32 %v6540_v2 }
 0x588   :  { %v6720_v50 = vpop.eup %6719 }
 0x589   :  { %v6722_v5 = vpop.eup %6721  ;;  %v1663_v63 = vadd.f32 1.0, %v6720_v50 }
 0x58a   :  { %v1669_v6 = vadd.f32 1.0, %v6722_v5  ;;  %v6724_v16 = vpop.eup %6723 }
 0x58b   :  { %6727 = vrcp.f32 %v1663_v63  ;;  %v6726_v51 = vpop.eup %6725  ;;  %v1676_v62 = vadd.f32 1.0, %v6724_v16 }
 0x58c   :  { %6729 = vrcp.f32 %v1669_v6 }
 0x58d   :  { %6731 = vrcp.f32 %v1676_v62 }
 0x595   :  { %v6728_v19 = vpop.eup %6727 }
 0x596   :  { %v6730_v25 = vpop.eup %6729  ;;  %v1680_v40 = vmul.f32 %v6728_v19, %v6726_v51 }
 0x597   :  { %v1679_v14 = vmul.f32 %v6730_v25, %v7592_v7  ;;  %v6732_v32 = vpop.eup %6731 }
 0x599   :  { %v7638_v4 = vadd.f32 %v1680_v40, %v1679_v14 }
 0x59b   :  { %6733 = vtanh.f32 %v7638_v4 }
 0x5a5   :  { %v6734_v22 = vpop.eup %6733 }
 0x5a6   :  { %v7641_v21 = vmul.f32 %v6734_v22, %v6732_v32 }
 0x5a8   :  { %1822 = vmatmul.mubr.f32.vlgmr.msra.gmra.mrb[10].mxu0 %v7641_v21  ;;  %1893 = vmatmul.mubr.f32.vlgmr.msra.gmra.mrb[10].mxu1 %v7641_v21 }
 0x5a9   :  { %5751 = vmatpush1.bf16.msra.mxu0 %v7447_v43  ;;  %5783 = vmatpush1.bf16.msra.mxu1 %v7450_v49 }
 0x5aa   :  { %5753 = vmatprep.subr.bf16.mxu0 %v7455_v1  ;;  %5785 = vmatprep.subr.bf16.mxu1 %v7457_v8 }
 0x5ab   :  { %2064 = vmatprep.mubr.f32.mxu0 %v7076_v0  ;;  %2135 = vmatprep.mubr.f32.mxu1 %v7076_v0 }
 0x5ad   :  { %5755 = vmatpush1.bf16.msra.mxu0 %v7459_v11  ;;  %5787 = vmatpush1.bf16.msra.mxu1 %v7462_v17 }
 0x5ae   :  { %5757 = vmatprep.subr.bf16.mxu0 %v7513_v33  ;;  %5789 = vmatprep.subr.bf16.mxu1 %v7515_v45 }
 0x5b1   :  { %5759 = vmatpush1.bf16.msra.mxu0 %v7517_v46  ;;  %5791 = vmatpush1.bf16.msra.mxu1 %v7520_v61 }
 0x5b2   :  { %5761 = vmatprep.subr.bf16.mxu0 %v7525_v12  ;;  %5793 = vmatprep.subr.bf16.mxu1 %v7527_v10 }
 0x5b5   :  { %5763 = vmatpush1.bf16.msra.mxu0 %v7529_v13  ;;  %5795 = vmatpush1.bf16.msra.mxu1 %v7532_v23 }
 0x5b6   :  { %5765 = vmatprep.subr.bf16.mxu0 %v7537_v36  ;;  %5797 = vmatprep.subr.bf16.mxu1 %v7539_v54 }
 0x5b9   :  { %5767 = vmatpush1.bf16.msra.mxu0 %v7541_v58  ;;  %5799 = vmatpush1.bf16.msra.mxu1 %v7544_v9 }
 0x5ba   :  { %5769 = vmatprep.subr.bf16.mxu0 %v7548_v27  ;;  %5801 = vmatprep.subr.bf16.mxu1 %v7551_v47 }
 0x5bd   :  { %5771 = vmatpush1.bf16.msra.mxu0 %v7553_v53  ;;  %5803 = vmatpush1.bf16.msra.mxu1 %v7556_v57 }
 0x5be   :  { %5773 = vmatprep.subr.bf16.mxu0 %v7559_v15  ;;  %5805 = vmatprep.subr.bf16.mxu1 %v7561_v3 }
 0x5c1   :  { %5775 = vmatpush1.bf16.msra.mxu0 %v7564_v26  ;;  %5807 = vmatpush1.bf16.msra.mxu1 %v7568_v44 }
 0x5c2   :  { %5777 = vmatprep.subr.bf16.mxu0 %v7570_v48  ;;  %5809 = vmatprep.subr.bf16.mxu1 %v7573_v18 }
 0x5c5   :  { %5779 = vmatpush1.bf16.msra.mxu0 %v7576_v39  ;;  %5811 = vmatpush1.bf16.msra.mxu1 %v7580_v56 }
 0x67b   :  { %v1823_v43 = vpop.f32.mrb[10].mxu0  ;;  %v1894_v49 = vpop.f32.mrb[10].mxu1 }
 0x67c   :  { %v6526_v1 = vadd.f32 %v1823_v43, %v7370_v35  ;;  %v1825_v8 = vpop.f32.mrb[11].mxu0  ;;  %v1896_v11 = vpop.f32.mrb[11].mxu1  ;;  %v6542_v50 = vadd.f32 %v1894_v49, %v7387_v59 }
 0x67d   :  { %v6527_v17 = vadd.f32 %v1825_v8, %v7374_v38  ;;  %v6543_v60 = vadd.f32 %v1896_v11, %v7381_v52  ;;  %v2180_v8 = vld [vmem:[#allocation9 + $0x8] sm:$0xff] }
 0x67e   :  { %v5126_v7 = vmul.f32 -1.442695, %v6526_v1  ;;  %v2184_v11 = vld [vmem:[#allocation9 + $0x28] sm:$0xff] }
 0x67f   :  { %v5127_v20 = vmul.f32 -1.442695, %v6527_v17  ;;  %v5128_v2 = vmul.f32 -1.442695, %v6543_v60  ;;  %v5812_v17 = vpack.c.bf16 %v2184_v11, %v2180_v8  ;;  %v2183_v60 = vld [vmem:[#allocation9 + $0x20] sm:$0xff]  ;;  %v2193_v8 = vld [vmem:[#allocation9 + $0x70] sm:$0xff] }
 0x680   :  { %6735 = vpow2.f32 %v5126_v7  ;;  %v2186_v7 = vld [vmem:[#allocation9 + $0x38] sm:$0xff] }
 0x681   :  { %6737 = vpow2.f32 %v5127_v20  ;;  %v2179_v20 = vld [vmem:[#allocation9] sm:$0xff]  ;;  %5813 = vmatprep.subr.bf16.mxu0 %v5812_v17 }
 0x682   :  { %6739 = vpow2.f32 %v5128_v2 }
 0x683   :  { %6741 = vtanh.f32 %v6542_v50  ;;  %v5814_v50 = vpack.c.bf16 %v2183_v60, %v2179_v20 }
 0x68a   :  { %v6736_v5 = vpop.eup %6735 }
 0x68b   :  { %v6738_v63 = vpop.eup %6737  ;;  %v1906_v6 = vadd.f32 1.0, %v6736_v5  ;;  %v2181_v5 = vld [vmem:[#allocation9 + $0x10] sm:$0xff] }
 0x68c   :  { %v1912_v16 = vadd.f32 1.0, %v6738_v63  ;;  %v6740_v51 = vpop.eup %6739  ;;  %v2185_v63 = vld [vmem:[#allocation9 + $0x30] sm:$0xff] }
 0x68d   :  { %6743 = vrcp.f32 %v1906_v6  ;;  %v6742_v19 = vpop.eup %6741  ;;  %v1919_v14 = vadd.f32 1.0, %v6740_v51  ;;  %v5846_v6 = vpack.c.bf16 %v2185_v63, %v2181_v5  ;;  %v2192_v51 = vld [vmem:[#allocation9 + $0x68] sm:$0xff]  ;;  %v2426_v5 = vld [vmem:[#allocation7 + $0x210] sm:$0xff] }
 0x68e   :  { %6745 = vrcp.f32 %v1912_v16  ;;  %v2188_v16 = vld [vmem:[#allocation9 + $0x48] sm:$0xff]  ;;  %v2430_v63 = vld [vmem:[#allocation7 + $0x230] sm:$0xff] }
 0x68f   :  { %6747 = vrcp.f32 %v1919_v14  ;;  %v2191_v14 = vld [vmem:[#allocation9 + $0x60] sm:$0xff] }
 0x697   :  { %v6744_v25 = vpop.eup %6743 }
 0x698   :  { %v6746_v40 = vpop.eup %6745  ;;  %v1923_v62 = vmul.f32 %v6744_v25, %v6742_v19  ;;  %v2190_v19 = vld [vmem:[#allocation9 + $0x58] sm:$0xff]  ;;  %v5816_v25 = vpack.c.bf16 %v2192_v51, %v2188_v16  ;;  %v2437_v16 = vld [vmem:[#allocation7 + $0x268] sm:$0xff] }
 0x699   :  { %v1922_v32 = vmul.f32 %v6746_v40, %v7638_v4  ;;  %v6748_v43 = vpop.eup %6747  ;;  %v2182_v4 = vld [vmem:[#allocation9 + $0x18] sm:$0xff] }
 0x69a   :  { %v5844_v2 = vpack.c.bf16 %v2186_v7, %v2182_v4  ;;  %v2194_v40 = vld [vmem:[#allocation9 + $0x78] sm:$0xff] }
 0x69b   :  { %v7682_v22 = vadd.f32 %v1923_v62, %v1922_v32  ;;  %v2187_v62 = vld [vmem:[#allocation9 + $0x40] sm:$0xff]  ;;  %v5848_v32 = vpack.c.bf16 %v2194_v40, %v2190_v19  ;;  %v2435_v51 = vld [vmem:[#allocation7 + $0x258] sm:$0xff] }
 0x69c   :  { %5845 = vmatprep.subr.bf16.mxu1 %v5844_v2  ;;  %v2424_v2 = vld [vmem:[#allocation7 + $0x200] sm:$0xff]  ;;  %v2439_v19 = vld [vmem:[#allocation7 + $0x278] sm:$0xff] }
 0x69d   :  { %6749 = vtanh.f32 %v7682_v22 }
 0x6a7   :  { %v6750_v49 = vpop.eup %6749 }
 0x6a8   :  { %v7685_v1 = vmul.f32 %v6750_v49, %v6748_v43  ;;  %v5818_v43 = vpack.c.bf16 %v2191_v14, %v2187_v62  ;;  %v2189_v49 = vld [vmem:[#allocation9 + $0x50] sm:$0xff]  ;;  %v5910_v14 = vpack.c.bf16 %v2430_v63, %v2426_v5  ;;  %v2456_v63 = vld [vmem:[#allocation7 + $0x300] sm:$0xff] }
 0x6a9   :  { %v5850_v11 = vpack.c.bf16 %v2193_v8, %v2189_v49  ;;  %v5912_v8 = vpack.c.bf16 %v2439_v19, %v2435_v51  ;;  %v2458_v19 = vld [vmem:[#allocation7 + $0x310] sm:$0xff] }
 0x6aa   :  { %2065 = vmatmul.mubr.f32.vlgmr.msra.gmra.mrb[12].mxu0 %v7685_v1  ;;  %2136 = vmatmul.mubr.f32.vlgmr.msra.gmra.mrb[12].mxu1 %v7685_v1 }
 0x6ab   :  { %2307 = vmatprep.mubr.f32.mxu0 %v7076_v0  ;;  %2378 = vmatprep.mubr.f32.mxu1 %v7076_v0 }
 0x6ac   :  { %5815 = vmatpush1.bf16.msra.mxu0 %v5814_v50  ;;  %5847 = vmatpush1.bf16.msra.mxu1 %v5846_v6  ;;  %v2428_v50 = vld [vmem:[#allocation7 + $0x220] sm:$0xff]  ;;  %v2433_v6 = vld [vmem:[#allocation7 + $0x248] sm:$0xff] }
 0x6ad   :  { %5817 = vmatprep.subr.bf16.mxu0 %v5816_v25  ;;  %5849 = vmatprep.subr.bf16.mxu1 %v5848_v32  ;;  %v5878_v62 = vpack.c.bf16 %v2428_v50, %v2424_v2  ;;  %v2432_v32 = vld [vmem:[#allocation7 + $0x240] sm:$0xff]  ;;  %v5880_v49 = vpack.c.bf16 %v2437_v16, %v2433_v6  ;;  %v2463_v2 = vld [vmem:[#allocation7 + $0x338] sm:$0xff] }
 0x6ae   :  { %v2460_v6 = vld [vmem:[#allocation7 + $0x320] sm:$0xff] }
 0x6b0   :  { %5819 = vmatpush1.bf16.msra.mxu0 %v5818_v43  ;;  %5851 = vmatpush1.bf16.msra.mxu1 %v5850_v11  ;;  %v2436_v43 = vld [vmem:[#allocation7 + $0x260] sm:$0xff]  ;;  %v2434_v11 = vld [vmem:[#allocation7 + $0x250] sm:$0xff] }
 0x6b1   :  { %5821 = vmatprep.subr.bf16.mxu0 %v7513_v33  ;;  %5853 = vmatprep.subr.bf16.mxu1 %v7515_v45  ;;  %v2425_v33 = vld [vmem:[#allocation7 + $0x208] sm:$0xff] }
 0x6b2   :  { %v2429_v45 = vld [vmem:[#allocation7 + $0x228] sm:$0xff] }
 0x6b4   :  { %5823 = vmatpush1.bf16.msra.mxu0 %v7517_v46  ;;  %5855 = vmatpush1.bf16.msra.mxu1 %v7520_v61  ;;  %v2427_v46 = vld [vmem:[#allocation7 + $0x218] sm:$0xff] }
 0x6b5   :  { %5825 = vmatprep.subr.bf16.mxu0 %v7525_v12  ;;  %5857 = vmatprep.subr.bf16.mxu1 %v7527_v10  ;;  %v2431_v61 = vld [vmem:[#allocation7 + $0x238] sm:$0xff]  ;;  %v5876_v12 = vpack.c.bf16 %v2429_v45, %v2425_v33  ;;  %v2438_v33 = vld [vmem:[#allocation7 + $0x270] sm:$0xff]  ;;  %v2441_v45 = vld [vmem:[#allocation7 + $0x288] sm:$0xff] }
 0x6b6   :  { %v5908_v10 = vpack.c.bf16 %v2431_v61, %v2427_v46  ;;  %v2445_v46 = vld [vmem:[#allocation7 + $0x2a8] sm:$0xff]  ;;  %v2443_v61 = vld [vmem:[#allocation7 + $0x298] sm:$0xff] }
 0x6b8   :  { %5827 = vmatpush1.bf16.msra.mxu0 %v7529_v13  ;;  %5859 = vmatpush1.bf16.msra.mxu1 %v7532_v23 }
 0x6b9   :  { %5829 = vmatprep.subr.bf16.mxu0 %v7537_v36  ;;  %5861 = vmatprep.subr.bf16.mxu1 %v7539_v54 }
 0x6bc   :  { %5831 = vmatpush1.bf16.msra.mxu0 %v7541_v58  ;;  %5863 = vmatpush1.bf16.msra.mxu1 %v7544_v9 }
 0x6bd   :  { %5833 = vmatprep.subr.bf16.mxu0 %v7548_v27  ;;  %5865 = vmatprep.subr.bf16.mxu1 %v7551_v47 }
 0x6c0   :  { %5835 = vmatpush1.bf16.msra.mxu0 %v7553_v53  ;;  %5867 = vmatpush1.bf16.msra.mxu1 %v7556_v57 }
 0x6c1   :  { %5837 = vmatprep.subr.bf16.mxu0 %v7559_v15  ;;  %5869 = vmatprep.subr.bf16.mxu1 %v7561_v3 }
 0x6c4   :  { %5839 = vmatpush1.bf16.msra.mxu0 %v7564_v26  ;;  %5871 = vmatpush1.bf16.msra.mxu1 %v7568_v44 }
 0x6c5   :  { %5841 = vmatprep.subr.bf16.mxu0 %v7570_v48  ;;  %5873 = vmatprep.subr.bf16.mxu1 %v7573_v18 }
 0x6c8   :  { %5843 = vmatpush1.bf16.msra.mxu0 %v7576_v39  ;;  %5875 = vmatpush1.bf16.msra.mxu1 %v7580_v56 }
 0x6c9   :  { %5877 = vmatprep.subr.bf16.mxu0 %v5876_v12  ;;  %5909 = vmatprep.subr.bf16.mxu1 %v5908_v10  ;;  %v2447_v12 = vld [vmem:[#allocation7 + $0x2b8] sm:$0xff]  ;;  %v5882_v10 = vpack.c.bf16 %v2436_v43, %v2432_v32  ;;  %v5894_v43 = vpack.c.bf16 %v2460_v6, %v2456_v63 }
 0x6ca   :  { %v2471_v32 = vld [vmem:[#allocation7 + $0x378] sm:$0xff] }
 0x77d   :  { %v2066_v13 = vpop.f32.mrb[12].mxu0  ;;  %v2137_v23 = vpop.f32.mrb[12].mxu1 }
 0x77e   :  { %v6528_v36 = vadd.f32 %v2066_v13, %v7370_v35  ;;  %v2068_v54 = vpop.f32.mrb[13].mxu0  ;;  %v2139_v58 = vpop.f32.mrb[13].mxu1  ;;  %v6544_v15 = vadd.f32 %v2137_v23, %v7387_v59  ;;  %v5914_v13 = vpack.c.bf16 %v2438_v33, %v2434_v11  ;;  %v2440_v23 = vld [vmem:[#allocation7 + $0x280] sm:$0xff] }
 0x77f   :  { %v6529_v9 = vadd.f32 %v2068_v54, %v7374_v38  ;;  %v6545_v53 = vadd.f32 %v2139_v58, %v7381_v52  ;;  %v5884_v54 = vpack.c.bf16 %v2445_v46, %v2441_v45  ;;  %v5916_v58 = vpack.c.bf16 %v2447_v12, %v2443_v61  ;;  %v2468_v11 = vld [vmem:[#allocation7 + $0x360] sm:$0xff]  ;;  %v2466_v46 = vld [vmem:[#allocation7 + $0x350] sm:$0xff]  ;;  %v2473_v12 = vld [vmem:[#allocation7 + $0x388] sm:$0xff] }
 0x780   :  { %v5129_v27 = vmul.f32 -1.442695, %v6528_v36  ;;  %v2444_v36 = vld [vmem:[#allocation7 + $0x2a0] sm:$0xff]  ;;  %v2470_v61 = vld [vmem:[#allocation7 + $0x370] sm:$0xff] }
 0x781   :  { %v5130_v47 = vmul.f32 -1.442695, %v6529_v9  ;;  %v5131_v57 = vmul.f32 -1.442695, %v6545_v53  ;;  %v2442_v9 = vld [vmem:[#allocation7 + $0x290] sm:$0xff]  ;;  %v2453_v53 = vld [vmem:[#allocation7 + $0x2e8] sm:$0xff] }
 0x782   :  { %6751 = vpow2.f32 %v5129_v27  ;;  %v2446_v27 = vld [vmem:[#allocation7 + $0x2b0] sm:$0xff] }
 0x783   :  { %6753 = vpow2.f32 %v5130_v47  ;;  %v2449_v47 = vld [vmem:[#allocation7 + $0x2c8] sm:$0xff] }
 0x784   :  { %6755 = vpow2.f32 %v5131_v57  ;;  %v2451_v57 = vld [vmem:[#allocation7 + $0x2d8] sm:$0xff] }
 0x785   :  { %6757 = vtanh.f32 %v6544_v15  ;;  %v2455_v15 = vld [vmem:[#allocation7 + $0x2f8] sm:$0xff] }
 0x78c   :  { %v6752_v3 = vpop.eup %6751 }
 0x78d   :  { %v6754_v26 = vpop.eup %6753  ;;  %v2149_v44 = vadd.f32 1.0, %v6752_v3  ;;  %v5886_v3 = vpack.c.bf16 %v2444_v36, %v2440_v23  ;;  %v2479_v23 = vld [vmem:[#allocation7 + $0x3b8] sm:$0xff] }
 0x78e   :  { %v2155_v48 = vadd.f32 1.0, %v6754_v26  ;;  %v6756_v18 = vpop.eup %6755  ;;  %v5918_v26 = vpack.c.bf16 %v2446_v27, %v2442_v9  ;;  %v2476_v9 = vld [vmem:[#allocation7 + $0x3a0] sm:$0xff] }
 0x78f   :  { %6759 = vrcp.f32 %v2149_v44  ;;  %v6758_v39 = vpop.eup %6757  ;;  %v2162_v7 = vadd.f32 1.0, %v6756_v18  ;;  %v2448_v44 = vld [vmem:[#allocation7 + $0x2c0] sm:$0xff]  ;;  %v5888_v18 = vpack.c.bf16 %v2453_v53, %v2449_v47  ;;  %v2474_v53 = vld [vmem:[#allocation7 + $0x390] sm:$0xff] }
 0x790   :  { %6761 = vrcp.f32 %v2155_v48  ;;  %v2452_v48 = vld [vmem:[#allocation7 + $0x2e0] sm:$0xff] }
 0x791   :  { %6763 = vrcp.f32 %v2162_v7  ;;  %v2461_v7 = vld [vmem:[#allocation7 + $0x328] sm:$0xff]  ;;  %v5890_v50 = vpack.c.bf16 %v2452_v48, %v2448_v44  ;;  %v2487_v44 = vld [vmem:[#allocation7 + $0x3f8] sm:$0xff] }
 0x799   :  { %v6760_v56 = vpop.eup %6759 }
 0x79a   :  { %v6762_v4 = vpop.eup %6761  ;;  %v2166_v17 = vmul.f32 %v6760_v56, %v6758_v39  ;;  %v5920_v39 = vpack.c.bf16 %v2455_v15, %v2451_v57  ;;  %v2450_v56 = vld [vmem:[#allocation7 + $0x2d0] sm:$0xff]  ;;  %v2481_v15 = vld [vmem:[#allocation7 + $0x3c8] sm:$0xff] }
 0x79b   :  { %v2165_v20 = vmul.f32 %v6762_v4, %v7682_v22  ;;  %v6764_v25 = vpop.eup %6763  ;;  %v2454_v4 = vld [vmem:[#allocation7 + $0x2f0] sm:$0xff] }
 0x79c   :  { %v5922_v5 = vpack.c.bf16 %v2454_v4, %v2450_v56  ;;  %v2478_v57 = vld [vmem:[#allocation7 + $0x3b0] sm:$0xff] }
 0x79d   :  { %v7720_v60 = vadd.f32 %v2166_v17, %v2165_v20  ;;  %v2457_v17 = vld [vmem:[#allocation7 + $0x308] sm:$0xff]  ;;  %v2459_v20 = vld [vmem:[#allocation7 + $0x318] sm:$0xff] }
 0x79e   :  { %v5892_v16 = vpack.c.bf16 %v2461_v7, %v2457_v17  ;;  %v5924_v51 = vpack.c.bf16 %v2463_v2, %v2459_v20  ;;  %v2484_v17 = vld [vmem:[#allocation7 + $0x3e0] sm:$0xff]  ;;  %v2482_v7 = vld [vmem:[#allocation7 + $0x3d0] sm:$0xff] }
 0x79f   :  { %6765 = vtanh.f32 %v7720_v60  ;;  %v2486_v20 = vld [vmem:[#allocation7 + $0x3f0] sm:$0xff] }
 0x7a9   :  { %v6766_v40 = vpop.eup %6765 }
 0x7aa   :  { %v7723_v22 = vmul.f32 %v6766_v40, %v6764_v25  ;;  %v2462_v25 = vld [vmem:[#allocation7 + $0x330] sm:$0xff]  ;;  %v2465_v40 = vld [vmem:[#allocation7 + $0x348] sm:$0xff] }
 0x7ac   :  { %2308 = vmatmul.mubr.f32.vlgmr.msra.gmra.mrb[14].mxu0 %v7723_v22  ;;  %2379 = vmatmul.mubr.f32.vlgmr.msra.gmra.mrb[14].mxu1 %v7723_v22 }
 0x7ad   :  { %5879 = vmatpush1.bf16.msra.mxu0 %v5878_v62  ;;  %5911 = vmatpush1.bf16.msra.mxu1 %v5910_v14  ;;  %v2469_v62 = vld [vmem:[#allocation7 + $0x368] sm:$0xff]  ;;  %v2467_v14 = vld [vmem:[#allocation7 + $0x358] sm:$0xff] }
 0x7ae   :  { %5881 = vmatprep.subr.bf16.mxu0 %v5880_v49  ;;  %5913 = vmatprep.subr.bf16.mxu1 %v5912_v8  ;;  %v5926_v49 = vpack.c.bf16 %v2462_v25, %v2458_v19  ;;  %v2464_v8 = vld [vmem:[#allocation7 + $0x340] sm:$0xff]  ;;  %v5896_v33 = vpack.c.bf16 %v2469_v62, %v2465_v40  ;;  %v5928_v45 = vpack.c.bf16 %v2471_v32, %v2467_v14  ;;  %v2783_v19 = vld [vmem:[#allocation9 + $0x248] sm:$0xff]  ;;  %v2785_v40 = vld [vmem:[#allocation9 + $0x258] sm:$0xff] }
 0x7af   :  { %2575 = vmatprep.mubr.f32.mxu0 %v7076_v0  ;;  %2688 = vmatprep.mubr.f32.mxu1 %v7076_v0  ;;  %v5898_v36 = vpack.c.bf16 %v2468_v11, %v2464_v8  ;;  %v2787_v25 = vld [vmem:[#allocation9 + $0x268] sm:$0xff]  ;;  %v2789_v14 = vld [vmem:[#allocation9 + $0x278] sm:$0xff]  ;;  %v2782_v32 = vld [vmem:[#allocation9 + $0x240] sm:$0xff] }
 0x7b0   :  { %v7769_v62 = vpack.c.bf16 %v2787_v25, %v2783_v19  ;;  %v2784_v11 = vld [vmem:[#allocation9 + $0x250] sm:$0xff]  ;;  %v2819_v19 = vld [vmem:[#allocation9 + $0x368] sm:$0xff] }
 0x7b1   :  { %5883 = vmatpush1.bf16.msra.mxu0 %v5882_v10  ;;  %5915 = vmatpush1.bf16.msra.mxu1 %v5914_v13  ;;  %v2477_v10 = vld [vmem:[#allocation7 + $0x3a8] sm:$0xff]  ;;  %v2475_v13 = vld [vmem:[#allocation7 + $0x398] sm:$0xff] }
 0x7b2   :  { %5885 = vmatprep.subr.bf16.mxu0 %v5884_v54  ;;  %5917 = vmatprep.subr.bf16.mxu1 %v5916_v58  ;;  %v5930_v54 = vpack.c.bf16 %v2470_v61, %v2466_v46  ;;  %v2472_v58 = vld [vmem:[#allocation7 + $0x380] sm:$0xff]  ;;  %v5900_v27 = vpack.c.bf16 %v2477_v10, %v2473_v12  ;;  %v5932_v47 = vpack.c.bf16 %v2479_v23, %v2475_v13  ;;  %v2791_v46 = vld [vmem:[#allocation9 + $0x288] sm:$0xff]  ;;  %v2793_v12 = vld [vmem:[#allocation9 + $0x298] sm:$0xff] }
 0x7b3   :  { %v5902_v48 = vpack.c.bf16 %v2476_v9, %v2472_v58  ;;  %v2795_v61 = vld [vmem:[#allocation9 + $0x2a8] sm:$0xff]  ;;  %v2797_v13 = vld [vmem:[#allocation9 + $0x2b8] sm:$0xff]  ;;  %v2790_v23 = vld [vmem:[#allocation9 + $0x280] sm:$0xff] }
 0x7b4   :  { %v7781_v10 = vpack.c.bf16 %v2795_v61, %v2791_v46  ;;  %v2792_v9 = vld [vmem:[#allocation9 + $0x290] sm:$0xff] }
 0x7b5   :  { %5887 = vmatpush1.bf16.msra.mxu0 %v5886_v3  ;;  %5919 = vmatpush1.bf16.msra.mxu1 %v5918_v26  ;;  %v2485_v3 = vld [vmem:[#allocation7 + $0x3e8] sm:$0xff]  ;;  %v2483_v26 = vld [vmem:[#allocation7 + $0x3d8] sm:$0xff]  ;;  %v2816_v46 = vld [vmem:[#allocation9 + $0x350] sm:$0xff] }
 0x7b6   :  { %5889 = vmatprep.subr.bf16.mxu0 %v5888_v18  ;;  %5921 = vmatprep.subr.bf16.mxu1 %v5920_v39  ;;  %v5934_v18 = vpack.c.bf16 %v2478_v57, %v2474_v53  ;;  %v2480_v39 = vld [vmem:[#allocation7 + $0x3c0] sm:$0xff]  ;;  %v5904_v56 = vpack.c.bf16 %v2485_v3, %v2481_v15  ;;  %v5936_v4 = vpack.c.bf16 %v2487_v44, %v2483_v26  ;;  %v2799_v53 = vld [vmem:[#allocation9 + $0x2c8] sm:$0xff]  ;;  %v2801_v15 = vld [vmem:[#allocation9 + $0x2d8] sm:$0xff] }
 0x7b7   :  { %v5906_v2 = vpack.c.bf16 %v2484_v17, %v2480_v39  ;;  %v2803_v57 = vld [vmem:[#allocation9 + $0x2e8] sm:$0xff]  ;;  %v2805_v26 = vld [vmem:[#allocation9 + $0x2f8] sm:$0xff]  ;;  %v2798_v44 = vld [vmem:[#allocation9 + $0x2c0] sm:$0xff] }
 0x7b8   :  { %v7793_v3 = vpack.c.bf16 %v2803_v57, %v2799_v53  ;;  %v2807_v17 = vld [vmem:[#allocation9 + $0x308] sm:$0xff]  ;;  %v2820_v61 = vld [vmem:[#allocation9 + $0x370] sm:$0xff]  ;;  %v2829_v53 = vld [vmem:[#allocation9 + $0x3b8] sm:$0xff] }
 0x7b9   :  { %5891 = vmatpush1.bf16.msra.mxu0 %v5890_v50  ;;  %5923 = vmatpush1.bf16.msra.mxu1 %v5922_v5  ;;  %v5938_v50 = vpack.c.bf16 %v2486_v20, %v2482_v7  ;;  %v2774_v5 = vld [vmem:[#allocation9 + $0x200] sm:$0xff]  ;;  %v2811_v20 = vld [vmem:[#allocation9 + $0x328] sm:$0xff] }
 0x7ba   :  { %5893 = vmatprep.subr.bf16.mxu0 %v5892_v16  ;;  %5925 = vmatprep.subr.bf16.mxu1 %v5924_v51  ;;  %v2776_v16 = vld [vmem:[#allocation9 + $0x210] sm:$0xff]  ;;  %v2822_v57 = vld [vmem:[#allocation9 + $0x380] sm:$0xff] }
 0x7bb   :  { %v2780_v51 = vld [vmem:[#allocation9 + $0x230] sm:$0xff] }
 0x7bd   :  { %5895 = vmatpush1.bf16.msra.mxu0 %v5894_v43  ;;  %5927 = vmatpush1.bf16.msra.mxu1 %v5926_v49  ;;  %v2786_v43 = vld [vmem:[#allocation9 + $0x260] sm:$0xff]  ;;  %v7771_v49 = vpack.c.bf16 %v2789_v14, %v2785_v40  ;;  %v2817_v14 = vld [vmem:[#allocation9 + $0x358] sm:$0xff] }
 0x7be   :  { %5897 = vmatprep.subr.bf16.mxu0 %v5896_v33  ;;  %5929 = vmatprep.subr.bf16.mxu1 %v5928_v45  ;;  %v7773_v8 = vpack.c.bf16 %v2786_v43, %v2782_v32  ;;  %v2788_v33 = vld [vmem:[#allocation9 + $0x270] sm:$0xff]  ;;  %v2821_v32 = vld [vmem:[#allocation9 + $0x378] sm:$0xff]  ;;  %v2814_v43 = vld [vmem:[#allocation9 + $0x340] sm:$0xff] }
 0x7bf   :  { %v7776_v45 = vpack.c.bf16 %v2788_v33, %v2784_v11  ;;  %v7817_v11 = vpack.c.bf16 %v2821_v32, %v2817_v14  ;;  %v2818_v33 = vld [vmem:[#allocation9 + $0x360] sm:$0xff]  ;;  %v2836_v14 = vld [vmem:[#allocation9 + $0x3f0] sm:$0xff] }
 0x7c1   :  { %5899 = vmatpush1.bf16.msra.mxu0 %v5898_v36  ;;  %5931 = vmatpush1.bf16.msra.mxu1 %v5930_v54  ;;  %v2794_v36 = vld [vmem:[#allocation9 + $0x2a0] sm:$0xff]  ;;  %v7783_v54 = vpack.c.bf16 %v2797_v13, %v2793_v12  ;;  %v7820_v12 = vpack.c.bf16 %v2818_v33, %v2814_v43  ;;  %v2823_v13 = vld [vmem:[#allocation9 + $0x388] sm:$0xff] }
 0x7c2   :  { %5901 = vmatprep.subr.bf16.mxu0 %v5900_v27  ;;  %5933 = vmatprep.subr.bf16.mxu1 %v5932_v47  ;;  %v7785_v58 = vpack.c.bf16 %v2794_v36, %v2790_v23  ;;  %v2796_v27 = vld [vmem:[#allocation9 + $0x2b0] sm:$0xff]  ;;  %v2827_v23 = vld [vmem:[#allocation9 + $0x3a8] sm:$0xff]  ;;  %v2825_v36 = vld [vmem:[#allocation9 + $0x398] sm:$0xff] }
 0x7c3   :  { %v7788_v47 = vpack.c.bf16 %v2796_v27, %v2792_v9  ;;  %v7824_v9 = vpack.c.bf16 %v2820_v61, %v2816_v46  ;;  %v7826_v27 = vpack.c.bf16 %v2827_v23, %v2823_v13 }
 0x7c5   :  { %5903 = vmatpush1.bf16.msra.mxu0 %v5902_v48  ;;  %5935 = vmatpush1.bf16.msra.mxu1 %v5934_v18  ;;  %v2802_v48 = vld [vmem:[#allocation9 + $0x2e0] sm:$0xff]  ;;  %v7795_v18 = vpack.c.bf16 %v2805_v26, %v2801_v15  ;;  %v7829_v26 = vpack.c.bf16 %v2829_v53, %v2825_v36 }
 0x7c6   :  { %5905 = vmatprep.subr.bf16.mxu0 %v5904_v56  ;;  %5937 = vmatprep.subr.bf16.mxu1 %v5936_v4  ;;  %v7797_v39 = vpack.c.bf16 %v2802_v48, %v2798_v44  ;;  %v2800_v56 = vld [vmem:[#allocation9 + $0x2d0] sm:$0xff]  ;;  %v2826_v15 = vld [vmem:[#allocation9 + $0x3a0] sm:$0xff] }
 0x7c7   :  { %v2804_v4 = vld [vmem:[#allocation9 + $0x2f0] sm:$0xff] }
 0x7c8   :  { %v7800_v7 = vpack.c.bf16 %v2804_v4, %v2800_v56  ;;  %v2824_v44 = vld [vmem:[#allocation9 + $0x390] sm:$0xff]  ;;  %v7832_v56 = vpack.c.bf16 %v2826_v15, %v2822_v57 }
 0x7c9   :  { %5907 = vmatpush1.bf16.msra.mxu0 %v5906_v2  ;;  %5939 = vmatpush1.bf16.msra.mxu1 %v5938_v50  ;;  %v2809_v2 = vld [vmem:[#allocation9 + $0x318] sm:$0xff]  ;;  %v2828_v48 = vld [vmem:[#allocation9 + $0x3b0] sm:$0xff] }
 0x7ca   :  { %v2813_v50 = vld [vmem:[#allocation9 + $0x338] sm:$0xff]  ;;  %v7836_v4 = vpack.c.bf16 %v2828_v48, %v2824_v44 }
 0x7cc   :  { %2576 = vmatmul.mubr.f32.vlgmr.msra.gmra.mrb[16].mxu0 %v7393_v42  ;;  %2689 = vmatmul.mubr.f32.vlgmr.msra.gmra.mrb[16].mxu1 %v7393_v42  ;;  %v2775_v42 = vld [vmem:[#allocation9 + $0x208] sm:$0xff] }
 0x7cd   :  { %2581 = vmatprep.mubr.f32.mxu0 %v7076_v0  ;;  %2694 = vmatprep.mubr.f32.mxu1 %v7076_v0 }
 0x7d0   :  { %2582 = vmatmul.mubr.f32.gmra.mrb[18].mxu0 %v7437_v41  ;;  %2695 = vmatmul.mubr.f32.gmra.mrb[18].mxu1 %v7437_v41  ;;  %v2779_v41 = vld [vmem:[#allocation9 + $0x228] sm:$0xff] }
 0x7d1   :  { %2587 = vmatprep.mubr.f32.mxu0 %v7076_v0  ;;  %2700 = vmatprep.mubr.f32.mxu1 %v7076_v0 }
 0x7d4   :  { %2588 = vmatmul.mubr.f32.gmra.mrb[20].mxu0 %v7501_v24  ;;  %2701 = vmatmul.mubr.f32.gmra.mrb[20].mxu1 %v7501_v24  ;;  %v2777_v24 = vld [vmem:[#allocation9 + $0x218] sm:$0xff] }
 0x7d5   :  { %2593 = vmatprep.mubr.f32.mxu0 %v7076_v0  ;;  %2706 = vmatprep.mubr.f32.mxu1 %v7076_v0 }
 0x7d8   :  { %2594 = vmatmul.mubr.f32.gmra.mrb[22].mxu0 %v7595_v29  ;;  %2707 = vmatmul.mubr.f32.gmra.mrb[22].mxu1 %v7595_v29  ;;  %v7757_v29 = vpack.c.bf16 %v2779_v41, %v2775_v42  ;;  %v7804_v42 = vpack.c.bf16 %v2811_v20, %v2807_v17  ;;  %v7806_v41 = vpack.c.bf16 %v2813_v50, %v2809_v2  ;;  %v2831_v17 = vld [vmem:[#allocation9 + $0x3c8] sm:$0xff]  ;;  %v2833_v2 = vld [vmem:[#allocation9 + $0x3d8] sm:$0xff] }
 0x7d9   :  { %2599 = vmatprep.mubr.f32.mxu0 %v7076_v0  ;;  %2712 = vmatprep.mubr.f32.mxu1 %v7076_v0  ;;  %v2835_v20 = vld [vmem:[#allocation9 + $0x3e8] sm:$0xff] }
 0x7da   :  { %5941 = vmatprep.subr.bf16.mxu0 %v7757_v29  ;;  %v7841_v50 = vpack.c.bf16 %v2835_v20, %v2831_v17 }
 0x7dc   :  { %2600 = vmatmul.mubr.f32.gmra.mrb[24].mxu0 %v7641_v21  ;;  %2713 = vmatmul.mubr.f32.gmra.mrb[24].mxu1 %v7641_v21  ;;  %v2781_v21 = vld [vmem:[#allocation9 + $0x238] sm:$0xff] }
 0x7dd   :  { %2605 = vmatprep.mubr.f32.mxu0 %v7076_v0  ;;  %2718 = vmatprep.mubr.f32.mxu1 %v7076_v0  ;;  %v7759_v63 = vpack.c.bf16 %v2781_v21, %v2777_v24  ;;  %v2806_v24 = vld [vmem:[#allocation9 + $0x300] sm:$0xff] }
 0x7de   :  { %v2810_v21 = vld [vmem:[#allocation9 + $0x320] sm:$0xff] }
 0x7df   :  { %5973 = vmatprep.subr.bf16.mxu1 %v7759_v63 }
 0x7e0   :  { %2606 = vmatmul.mubr.f32.gmra.mrb[26].mxu0 %v7685_v1  ;;  %2719 = vmatmul.mubr.f32.gmra.mrb[26].mxu1 %v7685_v1  ;;  %v2778_v1 = vld [vmem:[#allocation9 + $0x220] sm:$0xff] }
 0x7e1   :  { %2611 = vmatprep.mubr.f32.mxu0 %v7076_v0  ;;  %2724 = vmatprep.mubr.f32.mxu1 %v7076_v0  ;;  %v7761_v6 = vpack.c.bf16 %v2778_v1, %v2774_v5  ;;  %v2808_v5 = vld [vmem:[#allocation9 + $0x310] sm:$0xff]  ;;  %v7809_v1 = vpack.c.bf16 %v2810_v21, %v2806_v24  ;;  %v2837_v24 = vld [vmem:[#allocation9 + $0x3f8] sm:$0xff]  ;;  %v2830_v21 = vld [vmem:[#allocation9 + $0x3c0] sm:$0xff] }
 0x7e3   :  { %5943 = vmatpush1.bf16.msra.mxu0 %v7761_v6 }
 0x7e4   :  { %2612 = vmatmul.mubr.f32.gmra.mrb[28].mxu0 %v7723_v22  ;;  %2725 = vmatmul.mubr.f32.gmra.mrb[28].mxu1 %v7723_v22  ;;  %v7764_v22 = vpack.c.bf16 %v2780_v51, %v2776_v16  ;;  %v2812_v16 = vld [vmem:[#allocation9 + $0x330] sm:$0xff]  ;;  %v2815_v51 = vld [vmem:[#allocation9 + $0x348] sm:$0xff] }
 0x7e5   :  { %2617 = vmatprep.mubr.f32.mxu0 %v7076_v0  ;;  %2730 = vmatprep.mubr.f32.mxu1 %v7076_v0  ;;  %v7813_v25 = vpack.c.bf16 %v2812_v16, %v2808_v5  ;;  %v7815_v40 = vpack.c.bf16 %v2819_v19, %v2815_v51  ;;  %v2834_v5 = vld [vmem:[#allocation9 + $0x3e0] sm:$0xff]  ;;  %v7843_v16 = vpack.c.bf16 %v2837_v24, %v2833_v2  ;;  %v2832_v19 = vld [vmem:[#allocation9 + $0x3d0] sm:$0xff] }
 0x7e6   :  { %5975 = vmatpush1.bf16.msra.mxu1 %v7764_v22  ;;  %5945 = vmatprep.subr.bf16.mxu0 %v7769_v62  ;;  %v7845_v51 = vpack.c.bf16 %v2834_v5, %v2830_v21  ;;  %v7848_v32 = vpack.c.bf16 %v2836_v14, %v2832_v19 }
 0x7e7   :  { %5977 = vmatprep.subr.bf16.mxu1 %v7771_v49  ;;  %5947 = vmatpush1.bf16.msra.mxu0 %v7773_v8 }
 0x7e8   :  { %5949 = vmatprep.subr.bf16.mxu0 %v7781_v10 }
 0x7ea   :  { %5979 = vmatpush1.bf16.msra.mxu1 %v7776_v45 }
 0x7eb   :  { %5981 = vmatprep.subr.bf16.mxu1 %v7783_v54  ;;  %5951 = vmatpush1.bf16.msra.mxu0 %v7785_v58 }
 0x7ec   :  { %5953 = vmatprep.subr.bf16.mxu0 %v7793_v3 }
 0x7ee   :  { %5983 = vmatpush1.bf16.msra.mxu1 %v7788_v47 }
 0x7ef   :  { %5985 = vmatprep.subr.bf16.mxu1 %v7795_v18  ;;  %5955 = vmatpush1.bf16.msra.mxu0 %v7797_v39 }
 0x7f0   :  { %5957 = vmatprep.subr.bf16.mxu0 %v7804_v42 }
 0x7f2   :  { %5987 = vmatpush1.bf16.msra.mxu1 %v7800_v7 }
 0x7f3   :  { %5989 = vmatprep.subr.bf16.mxu1 %v7806_v41  ;;  %5959 = vmatpush1.bf16.msra.mxu0 %v7809_v1 }
 0x7f4   :  { %5961 = vmatprep.subr.bf16.mxu0 %v7815_v40 }
 0x7f6   :  { %5991 = vmatpush1.bf16.msra.mxu1 %v7813_v25 }
 0x7f7   :  { %5993 = vmatprep.subr.bf16.mxu1 %v7817_v11  ;;  %5963 = vmatpush1.bf16.msra.mxu0 %v7820_v12 }
 0x7f8   :  { %5965 = vmatprep.subr.bf16.mxu0 %v7826_v27 }
 0x7fa   :  { %5995 = vmatpush1.bf16.msra.mxu1 %v7824_v9 }
 0x7fb   :  { %5997 = vmatprep.subr.bf16.mxu1 %v7829_v26  ;;  %5967 = vmatpush1.bf16.msra.mxu0 %v7832_v56 }
 0x7fc   :  { %5969 = vmatprep.subr.bf16.mxu0 %v7841_v50 }
 0x7fe   :  { %5999 = vmatpush1.bf16.msra.mxu1 %v7836_v4 }
 0x7ff   :  { %6001 = vmatprep.subr.bf16.mxu1 %v7843_v16  ;;  %5971 = vmatpush1.bf16.msra.mxu0 %v7845_v51 }
 0x800   :  { %6005 = vmatprep.subr.bf16.mxu0 %v7757_v29 }
 0x802   :  { %6003 = vmatpush1.bf16.msra.mxu1 %v7848_v32 }
 0x803   :  { %6037 = vmatprep.subr.bf16.mxu1 %v7759_v63 }
 0x87f   :  { %v2309_v43 = vpop.f32.mrb[14].mxu0  ;;  %v2380_v33 = vpop.f32.mrb[14].mxu1 }
 0x880   :  { %v6530_v46 = vadd.f32 %v2309_v43, %v7370_v35  ;;  %v2311_v61 = vpop.f32.mrb[15].mxu0  ;;  %v2382_v13 = vpop.f32.mrb[15].mxu1  ;;  %v6546_v44 = vadd.f32 %v2380_v33, %v7387_v59 }
 0x881   :  { %v6531_v23 = vadd.f32 %v2311_v61, %v7374_v38  ;;  %v6547_v57 = vadd.f32 %v2382_v13, %v7381_v52 }
 0x882   :  { %v5132_v36 = vmul.f32 -1.442695, %v6530_v46 }
 0x883   :  { %v5133_v53 = vmul.f32 -1.442695, %v6531_v23  ;;  %v5134_v15 = vmul.f32 -1.442695, %v6547_v57 }
 0x884   :  { %6767 = vpow2.f32 %v5132_v36 }
 0x885   :  { %6769 = vpow2.f32 %v5133_v53 }
 0x886   :  { %6771 = vpow2.f32 %v5134_v15 }
 0x887   :  { %6773 = vtanh.f32 %v6546_v44 }
 0x88e   :  { %v6768_v48 = vpop.eup %6767 }
 0x88f   :  { %v6770_v17 = vpop.eup %6769  ;;  %v2392_v20 = vadd.f32 1.0, %v6768_v48 }
 0x890   :  { %v2398_v2 = vadd.f32 1.0, %v6770_v17  ;;  %v6772_v35 = vpop.eup %6771 }
 0x891   :  { %6775 = vrcp.f32 %v2392_v20  ;;  %v6774_v24 = vpop.eup %6773  ;;  %v2405_v19 = vadd.f32 1.0, %v6772_v35 }
 0x892   :  { %6777 = vrcp.f32 %v2398_v2 }
 0x893   :  { %6779 = vrcp.f32 %v2405_v19 }
 0x89b   :  { %v6776_v38 = vpop.eup %6775 }
 0x89c   :  { %v6778_v21 = vpop.eup %6777  ;;  %v2409_v5 = vmul.f32 %v6776_v38, %v6774_v24 }
 0x89d   :  { %v2408_v14 = vmul.f32 %v6778_v21, %v7720_v60  ;;  %v6780_v59 = vpop.eup %6779  ;;  %v5135_v60 = vld [vmem:[%s8371_s3 + $0x4] sm:$0xf] }
 0x89e   :  { %v7903_v46 = vrot.slane %v5135_v60, %v196_v31  ;;  %v7907_v61 = vrot.slane %v5135_v60, %v200_v34  ;;  %v7913_v17 = vrot.slane %v5135_v60, %v208_v37  ;;  %v7918_v34 = vrot.slane %v5135_v60, %v204_v55 }
 0x89f   :  { %v2410_v52 = vadd.f32 %v2409_v5, %v2408_v14 }
 0x8a1   :  { %6781 = vtanh.f32 %v2410_v52 }
 0x8ab   :  { %v6782_v43 = vpop.eup %6781 }
 0x8ac   :  { %v2412_v33 = vmul.f32 %v6782_v43, %v6780_v59 }
 0x8ae   :  { %2618 = vmatmul.mubr.f32.gmra.mrb[30].mxu0 %v2412_v33  ;;  %2731 = vmatmul.mubr.f32.gmra.mrb[30].mxu1 %v2412_v33 }
 0x8af   :  { %2902 = vmatprep.mubr.f32.mxu0 %v7076_v0  ;;  %2973 = vmatprep.mubr.f32.mxu1 %v7076_v0 }
 0x8b2   :  { %2903 = vmatmul.mubr.f32.vlgmr.msra.gmra.mrb[16].mxu0 %v7076_v0  ;;  %2974 = vmatmul.mubr.f32.vlgmr.msra.gmra.mrb[16].mxu1 %v7076_v0 }
 0x8b3   :  { %6007 = vmatpush1.bf16.msra.mxu0 %v7761_v6  ;;  %6039 = vmatpush1.bf16.msra.mxu1 %v7764_v22 }
 0x8b4   :  { %6009 = vmatprep.subr.bf16.mxu0 %v7769_v62  ;;  %6041 = vmatprep.subr.bf16.mxu1 %v7771_v49 }
 0x8b5   :  { %3141 = vmatprep.mubr.f32.mxu0 %v7076_v0  ;;  %3212 = vmatprep.mubr.f32.mxu1 %v7076_v0 }
 0x8b7   :  { %6011 = vmatpush1.bf16.msra.mxu0 %v7773_v8  ;;  %6043 = vmatpush1.bf16.msra.mxu1 %v7776_v45 }
 0x8b8   :  { %6013 = vmatprep.subr.bf16.mxu0 %v7781_v10  ;;  %6045 = vmatprep.subr.bf16.mxu1 %v7783_v54 }
 0x8bb   :  { %6015 = vmatpush1.bf16.msra.mxu0 %v7785_v58  ;;  %6047 = vmatpush1.bf16.msra.mxu1 %v7788_v47 }
 0x8bc   :  { %6017 = vmatprep.subr.bf16.mxu0 %v7793_v3  ;;  %6049 = vmatprep.subr.bf16.mxu1 %v7795_v18 }
 0x8bf   :  { %6019 = vmatpush1.bf16.msra.mxu0 %v7797_v39  ;;  %6051 = vmatpush1.bf16.msra.mxu1 %v7800_v7 }
 0x8c0   :  { %6021 = vmatprep.subr.bf16.mxu0 %v7804_v42  ;;  %6053 = vmatprep.subr.bf16.mxu1 %v7806_v41 }
 0x8c3   :  { %6023 = vmatpush1.bf16.msra.mxu0 %v7809_v1  ;;  %6055 = vmatpush1.bf16.msra.mxu1 %v7813_v25 }
 0x8c4   :  { %6025 = vmatprep.subr.bf16.mxu0 %v7815_v40  ;;  %6057 = vmatprep.subr.bf16.mxu1 %v7817_v11 }
 0x8c7   :  { %6027 = vmatpush1.bf16.msra.mxu0 %v7820_v12  ;;  %6059 = vmatpush1.bf16.msra.mxu1 %v7824_v9 }
 0x8c8   :  { %6029 = vmatprep.subr.bf16.mxu0 %v7826_v27  ;;  %6061 = vmatprep.subr.bf16.mxu1 %v7829_v26 }
 0x8cb   :  { %6031 = vmatpush1.bf16.msra.mxu0 %v7832_v56  ;;  %6063 = vmatpush1.bf16.msra.mxu1 %v7836_v4 }
 0x8cc   :  { %6033 = vmatprep.subr.bf16.mxu0 %v7841_v50  ;;  %6065 = vmatprep.subr.bf16.mxu1 %v7843_v16 }
 0x8cf   :  { %6035 = vmatpush1.bf16.msra.mxu0 %v7845_v51  ;;  %6067 = vmatpush1.bf16.msra.mxu1 %v7848_v32 }
 0x8d0   :  { %6069 = vmatprep.subr.bf16.mxu0 %v7757_v29  ;;  %6101 = vmatprep.subr.bf16.mxu1 %v7759_v63 }
 0x985   :  { %v2904_v13 = vpop.f32.mrb[16].mxu0  ;;  %v2975_v23 = vpop.f32.mrb[16].mxu1 }
 0x986   :  { %v6548_v36 = vadd.f32 %v2904_v13, %v7903_v46  ;;  %v2906_v53 = vpop.f32.mrb[17].mxu0  ;;  %v2977_v57 = vpop.f32.mrb[17].mxu1  ;;  %v6564_v2 = vadd.f32 %v2975_v23, %v7918_v34 }
 0x987   :  { %v6549_v15 = vadd.f32 %v2906_v53, %v7907_v61  ;;  %v6565_v31 = vadd.f32 %v2977_v57, %v7913_v17 }
 0x988   :  { %v5136_v44 = vmul.f32 -1.442695, %v6548_v36 }
 0x989   :  { %v5137_v48 = vmul.f32 -1.442695, %v6549_v15  ;;  %v5138_v20 = vmul.f32 -1.442695, %v6565_v31 }
 0x98a   :  { %6783 = vpow2.f32 %v5136_v44 }
 0x98b   :  { %6785 = vpow2.f32 %v5137_v48 }
 0x98c   :  { %6787 = vpow2.f32 %v5138_v20 }
 0x98d   :  { %6789 = vtanh.f32 %v6564_v2 }
 0x994   :  { %v6784_v35 = vpop.eup %6783 }
 0x995   :  { %v6786_v24 = vpop.eup %6785  ;;  %v2987_v38 = vadd.f32 1.0, %v6784_v35 }
 0x996   :  { %v2993_v21 = vadd.f32 1.0, %v6786_v24  ;;  %v6788_v37 = vpop.eup %6787 }
 0x997   :  { %6791 = vrcp.f32 %v2987_v38  ;;  %v6790_v5 = vpop.eup %6789  ;;  %v3000_v59 = vadd.f32 1.0, %v6788_v37 }
 0x998   :  { %6793 = vrcp.f32 %v2993_v21 }
 0x999   :  { %6795 = vrcp.f32 %v3000_v59 }
 0x9a1   :  { %v6792_v19 = vpop.eup %6791 }
 0x9a2   :  { %v6794_v14 = vpop.eup %6793  ;;  %v3004_v52 = vmul.f32 %v6792_v19, %v6790_v5 }
 0x9a3   :  { %v3003_v30 = vmul.f32 0.0, %v6794_v14  ;;  %v6796_v43 = vpop.eup %6795 }
 0x9a5   :  { %v7921_v55 = vadd.f32 %v3004_v52, %v3003_v30 }
 0x9a7   :  { %6797 = vtanh.f32 %v7921_v55 }
 0x9b1   :  { %v6798_v33 = vpop.eup %6797 }
 0x9b2   :  { %v7924_v60 = vmul.f32 %v6798_v33, %v6796_v43 }
 0x9b4   :  { %3142 = vmatmul.mubr.f32.vlgmr.msra.gmra.mrb[18].mxu0 %v7924_v60  ;;  %3213 = vmatmul.mubr.f32.vlgmr.msra.gmra.mrb[18].mxu1 %v7924_v60 }
 0x9b5   :  { %6071 = vmatpush1.bf16.msra.mxu0 %v7761_v6  ;;  %6103 = vmatpush1.bf16.msra.mxu1 %v7764_v22 }
 0x9b6   :  { %6073 = vmatprep.subr.bf16.mxu0 %v7769_v62  ;;  %6105 = vmatprep.subr.bf16.mxu1 %v7771_v49 }
 0x9b7   :  { %3380 = vmatprep.mubr.f32.mxu0 %v7076_v0  ;;  %3451 = vmatprep.mubr.f32.mxu1 %v7076_v0 }
 0x9b9   :  { %6075 = vmatpush1.bf16.msra.mxu0 %v7773_v8  ;;  %6107 = vmatpush1.bf16.msra.mxu1 %v7776_v45 }
 0x9ba   :  { %6077 = vmatprep.subr.bf16.mxu0 %v7781_v10  ;;  %6109 = vmatprep.subr.bf16.mxu1 %v7783_v54 }
 0x9bd   :  { %6079 = vmatpush1.bf16.msra.mxu0 %v7785_v58  ;;  %6111 = vmatpush1.bf16.msra.mxu1 %v7788_v47 }
 0x9be   :  { %6081 = vmatprep.subr.bf16.mxu0 %v7793_v3  ;;  %6113 = vmatprep.subr.bf16.mxu1 %v7795_v18 }
 0x9c1   :  { %6083 = vmatpush1.bf16.msra.mxu0 %v7797_v39  ;;  %6115 = vmatpush1.bf16.msra.mxu1 %v7800_v7 }
 0x9c2   :  { %6085 = vmatprep.subr.bf16.mxu0 %v7804_v42  ;;  %6117 = vmatprep.subr.bf16.mxu1 %v7806_v41 }
 0x9c5   :  { %6087 = vmatpush1.bf16.msra.mxu0 %v7809_v1  ;;  %6119 = vmatpush1.bf16.msra.mxu1 %v7813_v25 }
 0x9c6   :  { %6089 = vmatprep.subr.bf16.mxu0 %v7815_v40  ;;  %6121 = vmatprep.subr.bf16.mxu1 %v7817_v11 }
 0x9c9   :  { %6091 = vmatpush1.bf16.msra.mxu0 %v7820_v12  ;;  %6123 = vmatpush1.bf16.msra.mxu1 %v7824_v9 }
 0x9ca   :  { %6093 = vmatprep.subr.bf16.mxu0 %v7826_v27  ;;  %6125 = vmatprep.subr.bf16.mxu1 %v7829_v26 }
 0x9cd   :  { %6095 = vmatpush1.bf16.msra.mxu0 %v7832_v56  ;;  %6127 = vmatpush1.bf16.msra.mxu1 %v7836_v4 }
 0x9ce   :  { %6097 = vmatprep.subr.bf16.mxu0 %v7841_v50  ;;  %6129 = vmatprep.subr.bf16.mxu1 %v7843_v16 }
 0x9d1   :  { %6099 = vmatpush1.bf16.msra.mxu0 %v7845_v51  ;;  %6131 = vmatpush1.bf16.msra.mxu1 %v7848_v32 }
 0x9d2   :  { %6133 = vmatprep.subr.bf16.mxu0 %v7757_v29  ;;  %6165 = vmatprep.subr.bf16.mxu1 %v7759_v63 }
 0xa87   :  { %v3143_v13 = vpop.f32.mrb[18].mxu0  ;;  %v3214_v23 = vpop.f32.mrb[18].mxu1 }
 0xa88   :  { %v6550_v36 = vadd.f32 %v3143_v13, %v7903_v46  ;;  %v3145_v53 = vpop.f32.mrb[19].mxu0  ;;  %v3216_v57 = vpop.f32.mrb[19].mxu1  ;;  %v6566_v2 = vadd.f32 %v3214_v23, %v7918_v34  ;;  %v3730_v13 = vld [vmem:[#allocation9 + $0x200] sm:$0xff] }
 0xa89   :  { %v6551_v15 = vadd.f32 %v3145_v53, %v7907_v61  ;;  %v6567_v31 = vadd.f32 %v3216_v57, %v7913_v17  ;;  %v3734_v23 = vld [vmem:[#allocation9 + $0x220] sm:$0xff]  ;;  %v3732_v57 = vld [vmem:[#allocation9 + $0x210] sm:$0xff] }
 0xa8a   :  { %v5139_v44 = vmul.f32 -1.442695, %v6550_v36  ;;  %v8024_v53 = vpack.c.bf16 %v3734_v23, %v3730_v13  ;;  %v3768_v13 = vld [vmem:[#allocation9 + $0x330] sm:$0xff] }
 0xa8b   :  { %v5140_v48 = vmul.f32 -1.442695, %v6551_v15  ;;  %v5141_v20 = vmul.f32 -1.442695, %v6567_v31  ;;  %v3736_v15 = vld [vmem:[#allocation9 + $0x230] sm:$0xff]  ;;  %v3743_v31 = vld [vmem:[#allocation9 + $0x268] sm:$0xff] }
 0xa8c   :  { %6799 = vpow2.f32 %v5139_v44  ;;  %v8027_v44 = vpack.c.bf16 %v3736_v15, %v3732_v57  ;;  %v3771_v57 = vld [vmem:[#allocation9 + $0x348] sm:$0xff] }
 0xa8d   :  { %6801 = vpow2.f32 %v5140_v48  ;;  %v3739_v48 = vld [vmem:[#allocation9 + $0x248] sm:$0xff] }
 0xa8e   :  { %6803 = vpow2.f32 %v5141_v20  ;;  %v3741_v20 = vld [vmem:[#allocation9 + $0x258] sm:$0xff]  ;;  %v3775_v15 = vld [vmem:[#allocation9 + $0x368] sm:$0xff] }
 0xa8f   :  { %6805 = vtanh.f32 %v6566_v2  ;;  %v8032_v2 = vpack.c.bf16 %v3743_v31, %v3739_v48  ;;  %v3773_v48 = vld [vmem:[#allocation9 + $0x358] sm:$0xff]  ;;  %v8079_v31 = vpack.c.bf16 %v3775_v15, %v3771_v57 }
 0xa96   :  { %v6800_v29 = vpop.eup %6799 }
 0xa97   :  { %v6802_v35 = vpop.eup %6801  ;;  %v3226_v63 = vadd.f32 1.0, %v6800_v29  ;;  %v3745_v29 = vld [vmem:[#allocation9 + $0x278] sm:$0xff] }
 0xa98   :  { %v3232_v24 = vadd.f32 1.0, %v6802_v35  ;;  %v6804_v38 = vpop.eup %6803  ;;  %v3738_v35 = vld [vmem:[#allocation9 + $0x240] sm:$0xff] }
 0xa99   :  { %6807 = vrcp.f32 %v3226_v63  ;;  %v6806_v21 = vpop.eup %6805  ;;  %v3239_v14 = vadd.f32 1.0, %v6804_v38  ;;  %v3742_v63 = vld [vmem:[#allocation9 + $0x260] sm:$0xff] }
 0xa9a   :  { %6809 = vrcp.f32 %v3232_v24  ;;  %v8034_v24 = vpack.c.bf16 %v3745_v29, %v3741_v20  ;;  %v8036_v38 = vpack.c.bf16 %v3742_v63, %v3738_v35  ;;  %v3777_v20 = vld [vmem:[#allocation9 + $0x378] sm:$0xff]  ;;  %v3770_v29 = vld [vmem:[#allocation9 + $0x340] sm:$0xff] }
 0xa9b   :  { %6811 = vrcp.f32 %v3239_v14  ;;  %v3751_v14 = vld [vmem:[#allocation9 + $0x2a8] sm:$0xff]  ;;  %v3774_v35 = vld [vmem:[#allocation9 + $0x360] sm:$0xff]  ;;  %v8082_v63 = vpack.c.bf16 %v3777_v20, %v3773_v48 }
 0xaa3   :  { %v6808_v37 = vpop.eup %6807 }
 0xaa4   :  { %v6810_v5 = vpop.eup %6809  ;;  %v3243_v19 = vmul.f32 %v6808_v37, %v6806_v21  ;;  %v3740_v21 = vld [vmem:[#allocation9 + $0x250] sm:$0xff] }
 0xaa5   :  { %v3242_v52 = vmul.f32 %v6810_v5, %v7921_v55  ;;  %v6812_v30 = vpop.eup %6811  ;;  %v3737_v55 = vld [vmem:[#allocation9 + $0x238] sm:$0xff]  ;;  %v3744_v37 = vld [vmem:[#allocation9 + $0x270] sm:$0xff] }
 0xaa6   :  { %v8039_v5 = vpack.c.bf16 %v3744_v37, %v3740_v21  ;;  %v8084_v21 = vpack.c.bf16 %v3774_v35, %v3770_v29  ;;  %v3772_v37 = vld [vmem:[#allocation9 + $0x350] sm:$0xff] }
 0xaa7   :  { %v7967_v59 = vadd.f32 %v3243_v19, %v3242_v52  ;;  %v3747_v19 = vld [vmem:[#allocation9 + $0x288] sm:$0xff]  ;;  %v3749_v52 = vld [vmem:[#allocation9 + $0x298] sm:$0xff] }
 0xaa9   :  { %6813 = vtanh.f32 %v7967_v59 }
 0xab3   :  { %v6814_v43 = vpop.eup %6813 }
 0xab4   :  { %v7970_v33 = vmul.f32 %v6814_v43, %v6812_v30  ;;  %v3753_v30 = vld [vmem:[#allocation9 + $0x2b8] sm:$0xff]  ;;  %v3746_v43 = vld [vmem:[#allocation9 + $0x280] sm:$0xff] }
 0xab6   :  { %3381 = vmatmul.mubr.f32.vlgmr.msra.gmra.mrb[20].mxu0 %v7970_v33  ;;  %3452 = vmatmul.mubr.f32.vlgmr.msra.gmra.mrb[20].mxu1 %v7970_v33 }
 0xab7   :  { %6135 = vmatpush1.bf16.msra.mxu0 %v7761_v6  ;;  %6167 = vmatpush1.bf16.msra.mxu1 %v7764_v22 }
 0xab8   :  { %6137 = vmatprep.subr.bf16.mxu0 %v7769_v62  ;;  %6169 = vmatprep.subr.bf16.mxu1 %v7771_v49 }
 0xab9   :  { %3619 = vmatprep.mubr.f32.mxu0 %v7076_v0  ;;  %3690 = vmatprep.mubr.f32.mxu1 %v7076_v0 }
 0xabb   :  { %6139 = vmatpush1.bf16.msra.mxu0 %v7773_v8  ;;  %6171 = vmatpush1.bf16.msra.mxu1 %v7776_v45 }
 0xabc   :  { %6141 = vmatprep.subr.bf16.mxu0 %v7781_v10  ;;  %6173 = vmatprep.subr.bf16.mxu1 %v7783_v54 }
 0xabf   :  { %6143 = vmatpush1.bf16.msra.mxu0 %v7785_v58  ;;  %6175 = vmatpush1.bf16.msra.mxu1 %v7788_v47 }
 0xac0   :  { %6145 = vmatprep.subr.bf16.mxu0 %v7793_v3  ;;  %6177 = vmatprep.subr.bf16.mxu1 %v7795_v18 }
 0xac3   :  { %6147 = vmatpush1.bf16.msra.mxu0 %v7797_v39  ;;  %6179 = vmatpush1.bf16.msra.mxu1 %v7800_v7 }
 0xac4   :  { %6149 = vmatprep.subr.bf16.mxu0 %v7804_v42  ;;  %6181 = vmatprep.subr.bf16.mxu1 %v7806_v41 }
 0xac7   :  { %6151 = vmatpush1.bf16.msra.mxu0 %v7809_v1  ;;  %6183 = vmatpush1.bf16.msra.mxu1 %v7813_v25 }
 0xac8   :  { %6153 = vmatprep.subr.bf16.mxu0 %v7815_v40  ;;  %6185 = vmatprep.subr.bf16.mxu1 %v7817_v11 }
 0xacb   :  { %6155 = vmatpush1.bf16.msra.mxu0 %v7820_v12  ;;  %6187 = vmatpush1.bf16.msra.mxu1 %v7824_v9 }
 0xacc   :  { %6157 = vmatprep.subr.bf16.mxu0 %v7826_v27  ;;  %6189 = vmatprep.subr.bf16.mxu1 %v7829_v26 }
 0xacf   :  { %6159 = vmatpush1.bf16.msra.mxu0 %v7832_v56  ;;  %6191 = vmatpush1.bf16.msra.mxu1 %v7836_v4 }
 0xad0   :  { %6161 = vmatprep.subr.bf16.mxu0 %v7841_v50  ;;  %6193 = vmatprep.subr.bf16.mxu1 %v7843_v16  ;;  %v3731_v50 = vld [vmem:[#allocation9 + $0x208] sm:$0xff] }
 0xad1   :  { %v3735_v16 = vld [vmem:[#allocation9 + $0x228] sm:$0xff] }
 0xad3   :  { %6163 = vmatpush1.bf16.msra.mxu0 %v7845_v51  ;;  %6195 = vmatpush1.bf16.msra.mxu1 %v7848_v32  ;;  %v3733_v51 = vld [vmem:[#allocation9 + $0x218] sm:$0xff]  ;;  %v8020_v32 = vpack.c.bf16 %v3735_v16, %v3731_v50  ;;  %v3766_v50 = vld [vmem:[#allocation9 + $0x320] sm:$0xff] }
 0xad4   :  { %v8022_v36 = vpack.c.bf16 %v3737_v55, %v3733_v51  ;;  %v3764_v55 = vld [vmem:[#allocation9 + $0x310] sm:$0xff] }
 0xad5   :  { %6197 = vmatprep.subr.bf16.mxu0 %v8020_v32  ;;  %v8075_v23 = vpack.c.bf16 %v3768_v13, %v3764_v55  ;;  %v3788_v55 = vld [vmem:[#allocation9 + $0x3d0] sm:$0xff] }
 0xad6   :  { %6229 = vmatprep.subr.bf16.mxu1 %v8022_v36  ;;  %v3792_v13 = vld [vmem:[#allocation9 + $0x3f0] sm:$0xff] }
 0xad7   :  { %v8111_v15 = vpack.c.bf16 %v3792_v13, %v3788_v55 }
 0xb89   :  { %v3382_v6 = vpop.f32.mrb[20].mxu0  ;;  %v3453_v22 = vpop.f32.mrb[20].mxu1 }
 0xb8a   :  { %v6552_v62 = vadd.f32 %v3382_v6, %v7903_v46  ;;  %v3384_v49 = vpop.f32.mrb[21].mxu0  ;;  %v3455_v8 = vpop.f32.mrb[21].mxu1  ;;  %v6568_v3 = vadd.f32 %v3453_v22, %v7918_v34  ;;  %v3750_v6 = vld [vmem:[#allocation9 + $0x2a0] sm:$0xff]  ;;  %v8046_v22 = vpack.c.bf16 %v3753_v30, %v3749_v52  ;;  %v3783_v30 = vld [vmem:[#allocation9 + $0x3a8] sm:$0xff] }
 0xb8b   :  { %v6553_v45 = vadd.f32 %v3384_v49, %v7907_v61  ;;  %v6569_v58 = vadd.f32 %v3455_v8, %v7913_v17  ;;  %v3748_v49 = vld [vmem:[#allocation9 + $0x290] sm:$0xff] }
 0xb8c   :  { %v5142_v10 = vmul.f32 -1.442695, %v6552_v62  ;;  %v8048_v62 = vpack.c.bf16 %v3750_v6, %v3746_v43  ;;  %v3752_v8 = vld [vmem:[#allocation9 + $0x2b0] sm:$0xff]  ;;  %v3781_v43 = vld [vmem:[#allocation9 + $0x398] sm:$0xff] }
 0xb8d   :  { %v5143_v54 = vmul.f32 -1.442695, %v6553_v45  ;;  %v5144_v47 = vmul.f32 -1.442695, %v6569_v58  ;;  %v8051_v45 = vpack.c.bf16 %v3752_v8, %v3748_v49  ;;  %v3757_v58 = vld [vmem:[#allocation9 + $0x2d8] sm:$0xff] }
 0xb8e   :  { %6815 = vpow2.f32 %v5142_v10  ;;  %v3755_v10 = vld [vmem:[#allocation9 + $0x2c8] sm:$0xff]  ;;  %v3785_v6 = vld [vmem:[#allocation9 + $0x3b8] sm:$0xff] }
 0xb8f   :  { %6817 = vpow2.f32 %v5143_v54  ;;  %v3759_v54 = vld [vmem:[#allocation9 + $0x2e8] sm:$0xff]  ;;  %v8092_v8 = vpack.c.bf16 %v3785_v6, %v3781_v43 }
 0xb90   :  { %6819 = vpow2.f32 %v5144_v47  ;;  %v8056_v47 = vpack.c.bf16 %v3759_v54, %v3755_v10  ;;  %v3778_v10 = vld [vmem:[#allocation9 + $0x380] sm:$0xff] }
 0xb91   :  { %6821 = vtanh.f32 %v6568_v3  ;;  %v3761_v3 = vld [vmem:[#allocation9 + $0x2f8] sm:$0xff]  ;;  %v3782_v54 = vld [vmem:[#allocation9 + $0x3a0] sm:$0xff] }
 0xb98   :  { %v6816_v18 = vpop.eup %6815 }
 0xb99   :  { %v6818_v39 = vpop.eup %6817  ;;  %v3465_v7 = vadd.f32 1.0, %v6816_v18  ;;  %v3754_v18 = vld [vmem:[#allocation9 + $0x2c0] sm:$0xff] }
 0xb9a   :  { %v3471_v42 = vadd.f32 1.0, %v6818_v39  ;;  %v6820_v41 = vpop.eup %6819  ;;  %v3758_v39 = vld [vmem:[#allocation9 + $0x2e0] sm:$0xff] }
 0xb9b   :  { %6823 = vrcp.f32 %v3465_v7  ;;  %v6822_v1 = vpop.eup %6821  ;;  %v3478_v12 = vadd.f32 1.0, %v6820_v41  ;;  %v8058_v7 = vpack.c.bf16 %v3761_v3, %v3757_v58  ;;  %v3756_v41 = vld [vmem:[#allocation9 + $0x2d0] sm:$0xff]  ;;  %v8095_v3 = vpack.c.bf16 %v3782_v54, %v3778_v10 }
 0xb9c   :  { %6825 = vrcp.f32 %v3471_v42  ;;  %v8060_v42 = vpack.c.bf16 %v3758_v39, %v3754_v18  ;;  %v3780_v58 = vld [vmem:[#allocation9 + $0x390] sm:$0xff]  ;;  %v3787_v39 = vld [vmem:[#allocation9 + $0x3c8] sm:$0xff] }
 0xb9d   :  { %6827 = vrcp.f32 %v3478_v12  ;;  %v3765_v12 = vld [vmem:[#allocation9 + $0x318] sm:$0xff]  ;;  %v3784_v18 = vld [vmem:[#allocation9 + $0x3b0] sm:$0xff] }
 0xba5   :  { %v6824_v25 = vpop.eup %6823 }
 0xba6   :  { %v6826_v40 = vpop.eup %6825  ;;  %v3482_v11 = vmul.f32 %v6824_v25, %v6822_v1  ;;  %v3760_v1 = vld [vmem:[#allocation9 + $0x2f0] sm:$0xff] }
 0xba7   :  { %v3481_v9 = vmul.f32 %v6826_v40, %v7967_v59  ;;  %v6828_v26 = vpop.eup %6827  ;;  %v8044_v59 = vpack.c.bf16 %v3751_v14, %v3747_v19  ;;  %v8063_v25 = vpack.c.bf16 %v3760_v1, %v3756_v41  ;;  %v3763_v40 = vld [vmem:[#allocation9 + $0x308] sm:$0xff]  ;;  %v3776_v19 = vld [vmem:[#allocation9 + $0x370] sm:$0xff]  ;;  %v8099_v1 = vpack.c.bf16 %v3784_v18, %v3780_v58 }
 0xba8   :  { %v3779_v14 = vld [vmem:[#allocation9 + $0x388] sm:$0xff]  ;;  %v8087_v52 = vpack.c.bf16 %v3776_v19, %v3772_v37 }
 0xba9   :  { %v8011_v27 = vadd.f32 %v3482_v11, %v3481_v9  ;;  %v3767_v11 = vld [vmem:[#allocation9 + $0x328] sm:$0xff]  ;;  %v8090_v49 = vpack.c.bf16 %v3783_v30, %v3779_v14 }
 0xbaa   :  { %v8068_v9 = vpack.c.bf16 %v3767_v11, %v3763_v40  ;;  %v3791_v41 = vld [vmem:[#allocation9 + $0x3e8] sm:$0xff]  ;;  %v3789_v11 = vld [vmem:[#allocation9 + $0x3d8] sm:$0xff] }
 0xbab   :  { %6829 = vtanh.f32 %v8011_v27  ;;  %v8101_v40 = vpack.c.bf16 %v3791_v41, %v3787_v39 }
 0xbb5   :  { %v6830_v56 = vpop.eup %6829 }
 0xbb6   :  { %v8014_v4 = vmul.f32 %v6830_v56, %v6828_v26  ;;  %v3769_v26 = vld [vmem:[#allocation9 + $0x338] sm:$0xff]  ;;  %v3762_v56 = vld [vmem:[#allocation9 + $0x300] sm:$0xff] }
 0xbb7   :  { %v8070_v16 = vpack.c.bf16 %v3769_v26, %v3765_v12  ;;  %v8072_v51 = vpack.c.bf16 %v3766_v50, %v3762_v56  ;;  %v3793_v12 = vld [vmem:[#allocation9 + $0x3f8] sm:$0xff]  ;;  %v3786_v26 = vld [vmem:[#allocation9 + $0x3c0] sm:$0xff] }
 0xbb8   :  { %3620 = vmatmul.mubr.f32.vlgmr.msra.gmra.mrb[22].mxu0 %v8014_v4  ;;  %3691 = vmatmul.mubr.f32.vlgmr.msra.gmra.mrb[22].mxu1 %v8014_v4  ;;  %v8104_v56 = vpack.c.bf16 %v3793_v12, %v3789_v11  ;;  %v3790_v50 = vld [vmem:[#allocation9 + $0x3e0] sm:$0xff] }
 0xbb9   :  { %3858 = vmatprep.mubr.f32.mxu0 %v7076_v0  ;;  %3929 = vmatprep.mubr.f32.mxu1 %v7076_v0  ;;  %v8107_v57 = vpack.c.bf16 %v3790_v50, %v3786_v26 }
 0xbba   :  { %6199 = vmatpush1.bf16.msra.mxu0 %v8024_v53  ;;  %6231 = vmatpush1.bf16.msra.mxu1 %v8027_v44 }
 0xbbb   :  { %6201 = vmatprep.subr.bf16.mxu0 %v8032_v2  ;;  %6233 = vmatprep.subr.bf16.mxu1 %v8034_v24 }
 0xbbe   :  { %6203 = vmatpush1.bf16.msra.mxu0 %v8036_v38  ;;  %6235 = vmatpush1.bf16.msra.mxu1 %v8039_v5 }
 0xbbf   :  { %6205 = vmatprep.subr.bf16.mxu0 %v8044_v59  ;;  %6237 = vmatprep.subr.bf16.mxu1 %v8046_v22 }
 0xbc2   :  { %6207 = vmatpush1.bf16.msra.mxu0 %v8048_v62  ;;  %6239 = vmatpush1.bf16.msra.mxu1 %v8051_v45 }
 0xbc3   :  { %6209 = vmatprep.subr.bf16.mxu0 %v8056_v47  ;;  %6241 = vmatprep.subr.bf16.mxu1 %v8058_v7 }
 0xbc6   :  { %6211 = vmatpush1.bf16.msra.mxu0 %v8060_v42  ;;  %6243 = vmatpush1.bf16.msra.mxu1 %v8063_v25 }
 0xbc7   :  { %6213 = vmatprep.subr.bf16.mxu0 %v8068_v9  ;;  %6245 = vmatprep.subr.bf16.mxu1 %v8070_v16 }
 0xbca   :  { %6215 = vmatpush1.bf16.msra.mxu0 %v8072_v51  ;;  %6247 = vmatpush1.bf16.msra.mxu1 %v8075_v23 }
 0xbcb   :  { %6217 = vmatprep.subr.bf16.mxu0 %v8079_v31  ;;  %6249 = vmatprep.subr.bf16.mxu1 %v8082_v63 }
 0xbce   :  { %6219 = vmatpush1.bf16.msra.mxu0 %v8084_v21  ;;  %6251 = vmatpush1.bf16.msra.mxu1 %v8087_v52 }
 0xbcf   :  { %6221 = vmatprep.subr.bf16.mxu0 %v8090_v49  ;;  %6253 = vmatprep.subr.bf16.mxu1 %v8092_v8 }
 0xbd2   :  { %6223 = vmatpush1.bf16.msra.mxu0 %v8095_v3  ;;  %6255 = vmatpush1.bf16.msra.mxu1 %v8099_v1 }
 0xbd3   :  { %6225 = vmatprep.subr.bf16.mxu0 %v8101_v40  ;;  %6257 = vmatprep.subr.bf16.mxu1 %v8104_v56 }
 0xbd6   :  { %6227 = vmatpush1.bf16.msra.mxu0 %v8107_v57  ;;  %6259 = vmatpush1.bf16.msra.mxu1 %v8111_v15 }
 0xbd7   :  { %6261 = vmatprep.subr.bf16.mxu0 %v8020_v32  ;;  %6293 = vmatprep.subr.bf16.mxu1 %v8022_v36 }
 0xc8b   :  { %v3621_v48 = vpop.f32.mrb[22].mxu0  ;;  %v3692_v20 = vpop.f32.mrb[22].mxu1 }
 0xc8c   :  { %v6554_v29 = vadd.f32 %v3621_v48, %v7903_v46  ;;  %v3623_v35 = vpop.f32.mrb[23].mxu0  ;;  %v3694_v37 = vpop.f32.mrb[23].mxu1  ;;  %v6570_v10 = vadd.f32 %v3692_v20, %v7918_v34 }
 0xc8d   :  { %v6555_v19 = vadd.f32 %v3623_v35, %v7907_v61  ;;  %v6571_v43 = vadd.f32 %v3694_v37, %v7913_v17 }
 0xc8e   :  { %v5145_v14 = vmul.f32 -1.442695, %v6554_v29 }
 0xc8f   :  { %v5146_v30 = vmul.f32 -1.442695, %v6555_v19  ;;  %v5147_v6 = vmul.f32 -1.442695, %v6571_v43 }
 0xc90   :  { %6831 = vpow2.f32 %v5145_v14 }
 0xc91   :  { %6833 = vpow2.f32 %v5146_v30 }
 0xc92   :  { %6835 = vpow2.f32 %v5147_v6 }
 0xc93   :  { %6837 = vtanh.f32 %v6570_v10 }
 0xc9a   :  { %v6832_v54 = vpop.eup %6831 }
 0xc9b   :  { %v6834_v58 = vpop.eup %6833  ;;  %v3704_v18 = vadd.f32 1.0, %v6832_v54 }
 0xc9c   :  { %v3710_v39 = vadd.f32 1.0, %v6834_v58  ;;  %v6836_v41 = vpop.eup %6835 }
 0xc9d   :  { %6839 = vrcp.f32 %v3704_v18  ;;  %v6838_v11 = vpop.eup %6837  ;;  %v3717_v55 = vadd.f32 1.0, %v6836_v41 }
 0xc9e   :  { %6841 = vrcp.f32 %v3710_v39 }
 0xc9f   :  { %6843 = vrcp.f32 %v3717_v55 }
 0xca7   :  { %v6840_v12 = vpop.eup %6839 }
 0xca8   :  { %v6842_v26 = vpop.eup %6841  ;;  %v3721_v50 = vmul.f32 %v6840_v12, %v6838_v11 }
 0xca9   :  { %v3720_v13 = vmul.f32 %v6842_v26, %v8011_v27  ;;  %v6844_v20 = vpop.eup %6843 }
 0xcab   :  { %v8123_v48 = vadd.f32 %v3721_v50, %v3720_v13 }
 0xcad   :  { %6845 = vtanh.f32 %v8123_v48 }
 0xcb7   :  { %v6846_v29 = vpop.eup %6845 }
 0xcb8   :  { %v8126_v35 = vmul.f32 %v6846_v29, %v6844_v20 }
 0xcba   :  { %3859 = vmatmul.mubr.f32.vlgmr.msra.gmra.mrb[24].mxu0 %v8126_v35  ;;  %3930 = vmatmul.mubr.f32.vlgmr.msra.gmra.mrb[24].mxu1 %v8126_v35 }
 0xcbb   :  { %6263 = vmatpush1.bf16.msra.mxu0 %v8024_v53  ;;  %6295 = vmatpush1.bf16.msra.mxu1 %v8027_v44 }
 0xcbc   :  { %6265 = vmatprep.subr.bf16.mxu0 %v8032_v2  ;;  %6297 = vmatprep.subr.bf16.mxu1 %v8034_v24 }
 0xcbd   :  { %4097 = vmatprep.mubr.f32.mxu0 %v7076_v0  ;;  %4168 = vmatprep.mubr.f32.mxu1 %v7076_v0 }
 0xcbf   :  { %6267 = vmatpush1.bf16.msra.mxu0 %v8036_v38  ;;  %6299 = vmatpush1.bf16.msra.mxu1 %v8039_v5 }
 0xcc0   :  { %6269 = vmatprep.subr.bf16.mxu0 %v8044_v59  ;;  %6301 = vmatprep.subr.bf16.mxu1 %v8046_v22 }
 0xcc3   :  { %6271 = vmatpush1.bf16.msra.mxu0 %v8048_v62  ;;  %6303 = vmatpush1.bf16.msra.mxu1 %v8051_v45 }
 0xcc4   :  { %6273 = vmatprep.subr.bf16.mxu0 %v8056_v47  ;;  %6305 = vmatprep.subr.bf16.mxu1 %v8058_v7 }
 0xcc7   :  { %6275 = vmatpush1.bf16.msra.mxu0 %v8060_v42  ;;  %6307 = vmatpush1.bf16.msra.mxu1 %v8063_v25 }
 0xcc8   :  { %6277 = vmatprep.subr.bf16.mxu0 %v8068_v9  ;;  %6309 = vmatprep.subr.bf16.mxu1 %v8070_v16 }
 0xccb   :  { %6279 = vmatpush1.bf16.msra.mxu0 %v8072_v51  ;;  %6311 = vmatpush1.bf16.msra.mxu1 %v8075_v23 }
 0xccc   :  { %6281 = vmatprep.subr.bf16.mxu0 %v8079_v31  ;;  %6313 = vmatprep.subr.bf16.mxu1 %v8082_v63 }
 0xccf   :  { %6283 = vmatpush1.bf16.msra.mxu0 %v8084_v21  ;;  %6315 = vmatpush1.bf16.msra.mxu1 %v8087_v52 }
 0xcd0   :  { %6285 = vmatprep.subr.bf16.mxu0 %v8090_v49  ;;  %6317 = vmatprep.subr.bf16.mxu1 %v8092_v8 }
 0xcd3   :  { %6287 = vmatpush1.bf16.msra.mxu0 %v8095_v3  ;;  %6319 = vmatpush1.bf16.msra.mxu1 %v8099_v1 }
 0xcd4   :  { %6289 = vmatprep.subr.bf16.mxu0 %v8101_v40  ;;  %6321 = vmatprep.subr.bf16.mxu1 %v8104_v56 }
 0xcd7   :  { %6291 = vmatpush1.bf16.msra.mxu0 %v8107_v57  ;;  %6323 = vmatpush1.bf16.msra.mxu1 %v8111_v15 }
 0xcd8   :  { %6325 = vmatprep.subr.bf16.mxu0 %v8020_v32  ;;  %6357 = vmatprep.subr.bf16.mxu1 %v8022_v36 }
 0xd8d   :  { %v3860_v27 = vpop.f32.mrb[24].mxu0  ;;  %v3931_v37 = vpop.f32.mrb[24].mxu1 }
 0xd8e   :  { %v6556_v19 = vadd.f32 %v3860_v27, %v7903_v46  ;;  %v3862_v14 = vpop.f32.mrb[25].mxu0  ;;  %v3933_v30 = vpop.f32.mrb[25].mxu1  ;;  %v6572_v18 = vadd.f32 %v3931_v37, %v7918_v34 }
 0xd8f   :  { %v6557_v43 = vadd.f32 %v3862_v14, %v7907_v61  ;;  %v6573_v54 = vadd.f32 %v3933_v30, %v7913_v17 }
 0xd90   :  { %v5148_v6 = vmul.f32 -1.442695, %v6556_v19 }
 0xd91   :  { %v5149_v10 = vmul.f32 -1.442695, %v6557_v43  ;;  %v5150_v58 = vmul.f32 -1.442695, %v6573_v54 }
 0xd92   :  { %6847 = vpow2.f32 %v5148_v6 }
 0xd93   :  { %6849 = vpow2.f32 %v5149_v10 }
 0xd94   :  { %6851 = vpow2.f32 %v5150_v58 }
 0xd95   :  { %6853 = vtanh.f32 %v6572_v18 }
 0xd9c   :  { %v6848_v39 = vpop.eup %6847 }
 0xd9d   :  { %v6850_v41 = vpop.eup %6849  ;;  %v3943_v11 = vadd.f32 1.0, %v6848_v39 }
 0xd9e   :  { %v3949_v12 = vadd.f32 1.0, %v6850_v41  ;;  %v6852_v26 = vpop.eup %6851 }
 0xd9f   :  { %6855 = vrcp.f32 %v3943_v11  ;;  %v6854_v50 = vpop.eup %6853  ;;  %v3956_v29 = vadd.f32 1.0, %v6852_v26 }
 0xda0   :  { %6857 = vrcp.f32 %v3949_v12 }
 0xda1   :  { %6859 = vrcp.f32 %v3956_v29 }
 0xda9   :  { %v6856_v55 = vpop.eup %6855 }
 0xdaa   :  { %v6858_v13 = vpop.eup %6857  ;;  %v3960_v20 = vmul.f32 %v6856_v55, %v6854_v50 }
 0xdab   :  { %v3959_v27 = vmul.f32 %v6858_v13, %v8123_v48  ;;  %v6860_v37 = vpop.eup %6859 }
 0xdad   :  { %v8169_v19 = vadd.f32 %v3960_v20, %v3959_v27 }
 0xdaf   :  { %6861 = vtanh.f32 %v8169_v19 }
 0xdb9   :  { %v6862_v14 = vpop.eup %6861 }
 0xdba   :  { %v8172_v30 = vmul.f32 %v6862_v14, %v6860_v37 }
 0xdbc   :  { %4098 = vmatmul.mubr.f32.vlgmr.msra.gmra.mrb[26].mxu0 %v8172_v30  ;;  %4169 = vmatmul.mubr.f32.vlgmr.msra.gmra.mrb[26].mxu1 %v8172_v30 }
 0xdbd   :  { %6327 = vmatpush1.bf16.msra.mxu0 %v8024_v53  ;;  %6359 = vmatpush1.bf16.msra.mxu1 %v8027_v44 }
 0xdbe   :  { %6329 = vmatprep.subr.bf16.mxu0 %v8032_v2  ;;  %6361 = vmatprep.subr.bf16.mxu1 %v8034_v24 }
 0xdbf   :  { %4336 = vmatprep.mubr.f32.mxu0 %v7076_v0  ;;  %4407 = vmatprep.mubr.f32.mxu1 %v7076_v0 }
 0xdc1   :  { %6331 = vmatpush1.bf16.msra.mxu0 %v8036_v38  ;;  %6363 = vmatpush1.bf16.msra.mxu1 %v8039_v5 }
 0xdc2   :  { %6333 = vmatprep.subr.bf16.mxu0 %v8044_v59  ;;  %6365 = vmatprep.subr.bf16.mxu1 %v8046_v22 }
 0xdc5   :  { %6335 = vmatpush1.bf16.msra.mxu0 %v8048_v62  ;;  %6367 = vmatpush1.bf16.msra.mxu1 %v8051_v45 }
 0xdc6   :  { %6337 = vmatprep.subr.bf16.mxu0 %v8056_v47  ;;  %6369 = vmatprep.subr.bf16.mxu1 %v8058_v7 }
 0xdc9   :  { %6339 = vmatpush1.bf16.msra.mxu0 %v8060_v42  ;;  %6371 = vmatpush1.bf16.msra.mxu1 %v8063_v25 }
 0xdca   :  { %6341 = vmatprep.subr.bf16.mxu0 %v8068_v9  ;;  %6373 = vmatprep.subr.bf16.mxu1 %v8070_v16 }
 0xdcd   :  { %6343 = vmatpush1.bf16.msra.mxu0 %v8072_v51  ;;  %6375 = vmatpush1.bf16.msra.mxu1 %v8075_v23 }
 0xdce   :  { %6345 = vmatprep.subr.bf16.mxu0 %v8079_v31  ;;  %6377 = vmatprep.subr.bf16.mxu1 %v8082_v63 }
 0xdd1   :  { %6347 = vmatpush1.bf16.msra.mxu0 %v8084_v21  ;;  %6379 = vmatpush1.bf16.msra.mxu1 %v8087_v52 }
 0xdd2   :  { %6349 = vmatprep.subr.bf16.mxu0 %v8090_v49  ;;  %6381 = vmatprep.subr.bf16.mxu1 %v8092_v8 }
 0xdd5   :  { %6351 = vmatpush1.bf16.msra.mxu0 %v8095_v3  ;;  %6383 = vmatpush1.bf16.msra.mxu1 %v8099_v1 }
 0xdd6   :  { %6353 = vmatprep.subr.bf16.mxu0 %v8101_v40  ;;  %6385 = vmatprep.subr.bf16.mxu1 %v8104_v56 }
 0xdd9   :  { %6355 = vmatpush1.bf16.msra.mxu0 %v8107_v57  ;;  %6387 = vmatpush1.bf16.msra.mxu1 %v8111_v15 }
 0xdda   :  { %6389 = vmatprep.subr.bf16.mxu0 %v8020_v32  ;;  %6421 = vmatprep.subr.bf16.mxu1 %v8022_v36 }
 0xe8f   :  { %v4099_v48 = vpop.f32.mrb[26].mxu0  ;;  %v4170_v43 = vpop.f32.mrb[26].mxu1 }
 0xe90   :  { %v6558_v6 = vadd.f32 %v4099_v48, %v7903_v46  ;;  %v4101_v10 = vpop.f32.mrb[27].mxu0  ;;  %v4172_v54 = vpop.f32.mrb[27].mxu1  ;;  %v6574_v12 = vadd.f32 %v4170_v43, %v7918_v34 }
 0xe91   :  { %v6559_v58 = vadd.f32 %v4101_v10, %v7907_v61  ;;  %v6575_v41 = vadd.f32 %v4172_v54, %v7913_v17  ;;  %v4694_v54 = vld [vmem:[#allocation10 + $0x20] sm:$0xff] }
 0xe92   :  { %v5151_v18 = vmul.f32 -1.442695, %v6558_v6 }
 0xe93   :  { %v5152_v39 = vmul.f32 -1.442695, %v6559_v58  ;;  %v5153_v11 = vmul.f32 -1.442695, %v6575_v41  ;;  %v4695_v58 = vld [vmem:[#allocation10 + $0x28] sm:$0xff]  ;;  %v4697_v41 = vld [vmem:[#allocation10 + $0x38] sm:$0xff] }
 0xe94   :  { %6863 = vpow2.f32 %v5151_v18  ;;  %v6460_v18 = vpack.c.bf16 %v4695_v58, %v4694_v54 }
 0xe95   :  { %6865 = vpow2.f32 %v5152_v39  ;;  %v4696_v39 = vld [vmem:[#allocation10 + $0x30] sm:$0xff] }
 0xe96   :  { %6867 = vpow2.f32 %v5153_v11  ;;  %v6464_v11 = vpack.c.bf16 %v4697_v41, %v4696_v39 }
 0xe97   :  { %6869 = vtanh.f32 %v6574_v12  ;;  %v4698_v12 = vld [vmem:[#allocation10 + $0x40] sm:$0xff] }
 0xe9e   :  { %v6864_v32 = vpop.eup %6863 }
 0xe9f   :  { %v6866_v26 = vpop.eup %6865  ;;  %v4182_v36 = vadd.f32 1.0, %v6864_v32  ;;  %v4699_v32 = vld [vmem:[#allocation10 + $0x48] sm:$0xff] }
 0xea0   :  { %v4188_v50 = vadd.f32 1.0, %v6866_v26  ;;  %v6868_v55 = vpop.eup %6867  ;;  %v6468_v26 = vpack.c.bf16 %v4699_v32, %v4698_v12  ;;  %v8277_v12 = vand.u32 127, %v194_v28 }
 0xea1   :  { %6871 = vrcp.f32 %v4182_v36  ;;  %v6870_v13 = vpop.eup %6869  ;;  %v4195_v37 = vadd.f32 1.0, %v6868_v55  ;;  %v4700_v36 = vld [vmem:[#allocation10 + $0x50] sm:$0xff] }
 0xea2   :  { %6873 = vrcp.f32 %v4188_v50  ;;  %v4701_v50 = vld [vmem:[#allocation10 + $0x58] sm:$0xff]  ;;  %vm4844_vm0 = vcmp.lt.s32.totalorder %v8277_v12, 16 }
 0xea3   :  { %6875 = vrcp.f32 %v4195_v37  ;;  %v6472_v55 = vpack.c.bf16 %v4701_v50, %v4700_v36 }
 0xeab   :  { %v6872_v20 = vpop.eup %6871 }
 0xeac   :  { %v6874_v29 = vpop.eup %6873  ;;  %v4199_v27 = vmul.f32 %v6872_v20, %v6870_v13  ;;  %v4702_v13 = vld [vmem:[#allocation10 + $0x60] sm:$0xff]  ;;  %v4703_v20 = vld [vmem:[#allocation10 + $0x68] sm:$0xff] }
 0xead   :  { %v4198_v14 = vmul.f32 %v6874_v29, %v8169_v19  ;;  %v6876_v43 = vpop.eup %6875  ;;  %v4704_v29 = vld [vmem:[#allocation10 + $0x70] sm:$0xff] }
 0xeaf   :  { %v8215_v48 = vadd.f32 %v4199_v27, %v4198_v14  ;;  %v4705_v27 = vld [vmem:[#allocation10 + $0x78] sm:$0xff] }
 0xeb0   :  { %v6480_v37 = vpack.c.bf16 %v4705_v27, %v4704_v29 }
 0xeb1   :  { %6877 = vtanh.f32 %v8215_v48 }
 0xebb   :  { %v6878_v6 = vpop.eup %6877 }
 0xebc   :  { %v8218_v10 = vmul.f32 %v6878_v6, %v6876_v43 }
 0xebe   :  { %4337 = vmatmul.mubr.f32.vlgmr.msra.gmra.mrb[28].mxu0 %v8218_v10  ;;  %4408 = vmatmul.mubr.f32.vlgmr.msra.gmra.mrb[28].mxu1 %v8218_v10 }
 0xebf   :  { %6391 = vmatpush1.bf16.msra.mxu0 %v8024_v53  ;;  %6423 = vmatpush1.bf16.msra.mxu1 %v8027_v44  ;;  %v4691_v53 = vld [vmem:[#allocation10 + $0x8] sm:$0xff] }
 0xec0   :  { %6393 = vmatprep.subr.bf16.mxu0 %v8032_v2  ;;  %6425 = vmatprep.subr.bf16.mxu1 %v8034_v24 }
 0xec1   :  { %4575 = vmatprep.mubr.f32.mxu0 %v7076_v0  ;;  %4646 = vmatprep.mubr.f32.mxu1 %v7076_v0  ;;  %v4690_v0 = vld [vmem:[#allocation10] sm:$0xff] }
 0xec2   :  { %v6452_v44 = vpack.c.bf16 %v4691_v53, %v4690_v0 }
 0xec3   :  { %6395 = vmatpush1.bf16.msra.mxu0 %v8036_v38  ;;  %6427 = vmatpush1.bf16.msra.mxu1 %v8039_v5 }
 0xec4   :  { %6397 = vmatprep.subr.bf16.mxu0 %v8044_v59  ;;  %6429 = vmatprep.subr.bf16.mxu1 %v8046_v22 }
 0xec7   :  { %6399 = vmatpush1.bf16.msra.mxu0 %v8048_v62  ;;  %6431 = vmatpush1.bf16.msra.mxu1 %v8051_v45 }
 0xec8   :  { %6401 = vmatprep.subr.bf16.mxu0 %v8056_v47  ;;  %6433 = vmatprep.subr.bf16.mxu1 %v8058_v7 }
 0xecb   :  { %6403 = vmatpush1.bf16.msra.mxu0 %v8060_v42  ;;  %6435 = vmatpush1.bf16.msra.mxu1 %v8063_v25 }
 0xecc   :  { %6405 = vmatprep.subr.bf16.mxu0 %v8068_v9  ;;  %6437 = vmatprep.subr.bf16.mxu1 %v8070_v16 }
 0xecf   :  { %6407 = vmatpush1.bf16.msra.mxu0 %v8072_v51  ;;  %6439 = vmatpush1.bf16.msra.mxu1 %v8075_v23 }
 0xed0   :  { %6409 = vmatprep.subr.bf16.mxu0 %v8079_v31  ;;  %6441 = vmatprep.subr.bf16.mxu1 %v8082_v63 }
 0xed3   :  { %6411 = vmatpush1.bf16.msra.mxu0 %v8084_v21  ;;  %6443 = vmatpush1.bf16.msra.mxu1 %v8087_v52 }
 0xed4   :  { %6413 = vmatprep.subr.bf16.mxu0 %v8090_v49  ;;  %6445 = vmatprep.subr.bf16.mxu1 %v8092_v8 }
 0xed7   :  { %6415 = vmatpush1.bf16.msra.mxu0 %v8095_v3  ;;  %6447 = vmatpush1.bf16.msra.mxu1 %v8099_v1  ;;  %v4692_v1 = vld [vmem:[#allocation10 + $0x10] sm:$0xff] }
 0xed8   :  { %6417 = vmatprep.subr.bf16.mxu0 %v8101_v40  ;;  %6449 = vmatprep.subr.bf16.mxu1 %v8104_v56  ;;  %v4693_v40 = vld [vmem:[#allocation10 + $0x18] sm:$0xff] }
 0xed9   :  { %v6456_v19 = vpack.c.bf16 %v4693_v40, %v4692_v1  ;;  %v4949_v1 = vld [vmem:[#allocation12] sm:$0xff]  ;;  %v4950_v40 = vld [vmem:[#allocation12 + $0x8] sm:$0xff] }
 0xedb   :  { %6419 = vmatpush1.bf16.msra.mxu0 %v8107_v57  ;;  %6451 = vmatpush1.bf16.msra.mxu1 %v8111_v15 }
 0xedc   :  { %6453 = vmatprep.subr.bf16.mxu0 %v6452_v44 }
 0xf91   :  { %v4338_v2 = vpop.f32.mrb[28].mxu0  ;;  %v4409_v24 = vpop.f32.mrb[28].mxu1 }
 0xf92   :  { %v6560_v38 = vadd.f32 %v4338_v2, %v7903_v46  ;;  %v4340_v5 = vpop.f32.mrb[29].mxu0  ;;  %v4411_v59 = vpop.f32.mrb[29].mxu1  ;;  %v6576_v42 = vadd.f32 %v4409_v24, %v7918_v34 }
 0xf93   :  { %v6561_v22 = vadd.f32 %v4340_v5, %v7907_v61  ;;  %v6577_v47 = vadd.f32 %v4411_v59, %v7913_v17 }
 0xf94   :  { %v5154_v62 = vmul.f32 -1.442695, %v6560_v38 }
 0xf95   :  { %v5155_v45 = vmul.f32 -1.442695, %v6561_v22  ;;  %v5156_v7 = vmul.f32 -1.442695, %v6577_v47 }
 0xf96   :  { %6879 = vpow2.f32 %v5154_v62 }
 0xf97   :  { %6881 = vpow2.f32 %v5155_v45 }
 0xf98   :  { %6883 = vpow2.f32 %v5156_v7 }
 0xf99   :  { %6885 = vtanh.f32 %v6576_v42 }
 0xfa0   :  { %v6880_v25 = vpop.eup %6879 }
 0xfa1   :  { %v6882_v9 = vpop.eup %6881  ;;  %v4421_v16 = vadd.f32 1.0, %v6880_v25 }
 0xfa2   :  { %v4427_v51 = vadd.f32 1.0, %v6882_v9  ;;  %v6884_v23 = vpop.eup %6883 }
 0xfa3   :  { %6887 = vrcp.f32 %v4421_v16  ;;  %v6886_v31 = vpop.eup %6885  ;;  %v4434_v49 = vadd.f32 1.0, %v6884_v23 }
 0xfa4   :  { %6889 = vrcp.f32 %v4427_v51 }
 0xfa5   :  { %6891 = vrcp.f32 %v4434_v49 }
 0xfad   :  { %v6888_v63 = vpop.eup %6887 }
 0xfae   :  { %v6890_v21 = vpop.eup %6889  ;;  %v4438_v52 = vmul.f32 %v6888_v63, %v6886_v31 }
 0xfaf   :  { %v4437_v8 = vmul.f32 %v6890_v21, %v8215_v48  ;;  %v6892_v56 = vpop.eup %6891 }
 0xfb1   :  { %v8259_v3 = vadd.f32 %v4438_v52, %v4437_v8 }
 0xfb3   :  { %6893 = vtanh.f32 %v8259_v3 }
 0xfbd   :  { %v6894_v57 = vpop.eup %6893 }
 0xfbe   :  { %v4441_v15 = vmul.f32 %v6894_v57, %v6892_v56  ;;  %v4951_v56 = vld [vmem:[#allocation12 + $0x10] sm:$0xff]  ;;  %v6484_v57 = vpack.c.bf16 %v4950_v40, %v4949_v1 }
 0xfc0   :  { %4576 = vmatmul.mubr.f32.vlgmr.msra.gmra.mrb[30].mxu0 %v4441_v15  ;;  %4647 = vmatmul.mubr.f32.vlgmr.msra.gmra.mrb[30].mxu1 %v4441_v15 }
 0xfc1   :  { %6455 = vmatpush3.bf16.msra.mxu0 %v6452_v44  ;;  %5244 = vmatprep.mubr.f32.mxu0 %v7924_v60  ;;  %v6476_v60 = vpack.c.bf16 %v4703_v20, %v4702_v13 }
 0xfc2   :  { %6457 = vmatprep.subr.bf16.mxu0 %v6456_v19  ;;  %6485 = vmatprep.subr.bf16.mxu1 %v6484_v57 }
 0xfc3   :  { %6487 = vmatpush3.bf16.msra.mxu1 %v6484_v57 }
 0xfc5   :  { %6459 = vmatpush3.bf16.msra.mxu0 %v6456_v19 }
 0xfc6   :  { %6461 = vmatprep.subr.bf16.mxu0 %v6460_v18 }
 0xfc9   :  { %6463 = vmatpush3.bf16.msra.mxu0 %v6460_v18 }
 0xfca   :  { %6465 = vmatprep.subr.bf16.mxu0 %v6464_v11 }
 0xfcd   :  { %6467 = vmatpush3.bf16.msra.mxu0 %v6464_v11 }
 0xfce   :  { %6469 = vmatprep.subr.bf16.mxu0 %v6468_v26 }
 0xfd1   :  { %6471 = vmatpush3.bf16.msra.mxu0 %v6468_v26 }
 0xfd2   :  { %6473 = vmatprep.subr.bf16.mxu0 %v6472_v55 }
 0xfd5   :  { %6475 = vmatpush3.bf16.msra.mxu0 %v6472_v55 }
 0xfd6   :  { %6477 = vmatprep.subr.bf16.mxu0 %v6476_v60 }
 0xfd9   :  { %6479 = vmatpush3.bf16.msra.mxu0 %v6476_v60 }
 0xfda   :  { %6481 = vmatprep.subr.bf16.mxu0 %v6480_v37 }
 0xfdd   :  { %6483 = vmatpush3.bf16.msra.mxu0 %v6480_v37 }
 0xfe0   :  { %5245 = vmatmul.mubr.f32.vlgmr.msra.gmra.mrb[32].mxu0 %v7970_v33 }
 0xfe1   :  { %5247 = vmatprep.mubr.f32.mxu0 %v8014_v4 }
 0xfe4   :  { %5248 = vmatmul.mubr.f32.gmra.mrb[34].mxu0 %v8126_v35 }
 0xfe5   :  { %5250 = vmatprep.mubr.f32.mxu0 %v8172_v30 }
 0xfe8   :  { %5251 = vmatmul.mubr.f32.gmra.mrb[36].mxu0 %v8218_v10 }
 0xfe9   :  { %5253 = vmatprep.mubr.f32.mxu0 %v4441_v15  ;;  %v4952_v15 = vld [vmem:[#allocation12 + $0x18] sm:$0xff] }
 0xfea   :  { %v6488_v19 = vpack.c.bf16 %v4952_v15, %v4951_v56 }
 0xfec   :  { %6489 = vmatprep.subr.bf16.mxu1 %v6488_v19 }
 0xfed   :  { %6491 = vmatpush3.bf16.msra.mxu1 %v6488_v19 }
0x1093   :  { %v4577_v14 = vpop.f32.mrb[30].mxu0  ;;  %v4648_v48 = vpop.f32.mrb[30].mxu1 }
0x1094   :  { %v6562_v43 = vadd.f32 %v4577_v14, %v7903_v46  ;;  %v4579_v6 = vpop.f32.mrb[31].mxu0  ;;  %v4650_v0 = vpop.f32.mrb[31].mxu1  ;;  %v6578_v35 = vadd.f32 %v4648_v48, %v7918_v34 }
0x1095   :  { %v6563_v53 = vadd.f32 %v4579_v6, %v7907_v61  ;;  %v6579_v33 = vadd.f32 %v4650_v0, %v7913_v17  ;;  %v5160_v17 = vld [vmem:[%s8373_s5] ss:$0 sm:$0xff] }
0x1096   :  { %v5157_v44 = vmul.f32 -1.442695, %v6562_v43 }
0x1097   :  { %v5158_v2 = vmul.f32 -1.442695, %v6563_v53  ;;  %v5159_v4 = vmul.f32 -1.442695, %v6579_v33 }
0x1098   :  { %6895 = vpow2.f32 %v5157_v44 }
0x1099   :  { %6897 = vpow2.f32 %v5158_v2 }
0x109a   :  { %6899 = vpow2.f32 %v5159_v4 }
0x109b   :  { %6901 = vtanh.f32 %v6578_v35 }
0x10a2   :  { %v6896_v30 = vpop.eup %6895 }
0x10a3   :  { %v6898_v10 = vpop.eup %6897  ;;  %v4660_v24 = vadd.f32 1.0, %v6896_v30 }
0x10a4   :  { %v4666_v38 = vadd.f32 1.0, %v6898_v10  ;;  %v6900_v46 = vpop.eup %6899 }
0x10a5   :  { %6903 = vrcp.f32 %v4660_v24  ;;  %v6902_v5 = vpop.eup %6901  ;;  %v4673_v62 = vadd.f32 1.0, %v6900_v46 }
0x10a6   :  { %6905 = vrcp.f32 %v4666_v38 }
0x10a7   :  { %6907 = vrcp.f32 %v4673_v62  ;;  %v4956_v62 = vld [vmem:[#allocation12 + $0x38] sm:$0xff] }
0x10af   :  { %v6904_v61 = vpop.eup %6903 }
0x10b0   :  { %v6906_v59 = vpop.eup %6905  ;;  %v4677_v22 = vmul.f32 %v6904_v61, %v6902_v5  ;;  %v4953_v5 = vld [vmem:[#allocation12 + $0x20] sm:$0xff]  ;;  %v4954_v61 = vld [vmem:[#allocation12 + $0x28] sm:$0xff] }
0x10b1   :  { %v4676_v45 = vmul.f32 %v6906_v59, %v8259_v3  ;;  %v6908_v52 = vpop.eup %6907  ;;  %v6492_v59 = vpack.c.bf16 %v4954_v61, %v4953_v5 }
0x10b3   :  { %v5246_v34 = vpop.f32.mrb[32].mxu0  ;;  %v4678_v47 = vadd.f32 %v4677_v22, %v4676_v45  ;;  %6493 = vmatprep.subr.bf16.mxu1 %v6492_v59  ;;  %v4955_v22 = vld [vmem:[#allocation12 + $0x30] sm:$0xff] }
0x10b4   :  { %v4779_v7 = vpop.f32.mrb[33].mxu0  ;;  %v4785_v16 = vadd.f32 %v5246_v34, %v5160_v17  ;;  %6495 = vmatpush3.bf16.msra.mxu1 %v6492_v59  ;;  %v6496_v45 = vpack.c.bf16 %v4956_v62, %v4955_v22  ;;  %v4958_v34 = vld [vmem:[#allocation12 + $0x48] sm:$0xff] }
0x10b5   :  { %v4780_v42 = vadd.f32 %v5160_v17, %v4779_v7  ;;  %6909 = vtanh.f32 %v4678_v47  ;;  %v4959_v7 = vld [vmem:[#allocation12 + $0x50] sm:$0xff] }
0x10b6   :  { %6497 = vmatprep.subr.bf16.mxu1 %v6496_v45 }
0x10b7   :  { %v5249_v25 = vpop.f32.mrb[34].mxu0  ;;  %4818 = vadd.xlane.f32.xlu0 %v4780_v42 }
0x10b8   :  { %v4789_v9 = vpop.f32.mrb[35].mxu0  ;;  %v4795_v63 = vadd.f32 %v5249_v25, %v5160_v17  ;;  %6499 = vmatpush3.bf16.msra.mxu1 %v6496_v45 }
0x10b9   :  { %v4790_v51 = vadd.f32 %v5160_v17, %v4789_v9  ;;  %v4961_v9 = vld [vmem:[#allocation12 + $0x60] sm:$0xff] }
0x10bb   :  { %v5252_v23 = vpop.f32.mrb[36].mxu0  ;;  %4822 = vadd.xlane.f32.xlu1 %v4790_v51  ;;  %4820 = vadd.xlane.f32.xlu0 %v4785_v16 }
0x10bc   :  { %v4799_v31 = vpop.f32.mrb[37].mxu0  ;;  %v4805_v3 = vadd.f32 %v5252_v23, %v5160_v17 }
0x10bd   :  { %v4800_v21 = vadd.f32 %v5160_v17, %v4799_v31  ;;  %v4964_v31 = vld [vmem:[#allocation12 + $0x78] sm:$0xff] }
0x10bf   :  { %v6910_v49 = vpop.eup %6909  ;;  %4824 = vadd.xlane.f32.xlu1 %v4795_v63  ;;  %4826 = vadd.xlane.f32.xlu0 %v4800_v21 }
0x10c0   :  { %v4680_v8 = vmul.f32 %v6910_v49, %v6908_v52 }
0x10c2   :  { %5254 = vmatmul.mubr.f32.gmra.mrb[38].mxu0 %v4680_v8 }
0x10c3   :  { %4828 = vadd.xlane.f32.xlu1 %v4805_v3 }
0x1144   :  { %v4819_v54 = vpop.xlane.xlu0 %4818 }
0x1145   :  { %v4834_v11 = vmul.f32 0.0625, %v4819_v54 }
0x1147   :  { %v4845_v36 = vsub.f32 %v4780_v42, %v4834_v11  ;;  %v4960_v42 = vld [vmem:[#allocation12 + $0x58] sm:$0xff] }
0x1148   :  { %v4823_v58 = vpop.xlane.xlu1 %4822  ;;  %v4821_v18 = vpop.xlane.xlu0 %4820  ;;  %v6504_v25 = vpack.c.bf16 %v4960_v42, %v4959_v7 }
0x1149   :  { %v4835_v41 = vmul.f32 0.0625, %v4821_v18  ;;  %v4836_v50 = vmul.f32 0.0625, %v4823_v58  ;;  %v8291_v6 = vsel %vm4844_vm0, %v4845_v36, 0.0 }
0x114a   :  { %v4863_v44 = vmul.f32 %v8291_v6, %v8291_v6 }
0x114b   :  { %v4846_v32 = vsub.f32 %v4785_v16, %v4835_v41  ;;  %v4847_v48 = vsub.f32 %v4790_v51, %v4836_v50  ;;  %v4962_v16 = vld [vmem:[#allocation12 + $0x68] sm:$0xff]  ;;  %v4963_v51 = vld [vmem:[#allocation12 + $0x70] sm:$0xff] }
0x114c   :  { %v4825_v39 = vpop.xlane.xlu1 %4824  ;;  %v4827_v13 = vpop.xlane.xlu0 %4826  ;;  %v6508_v23 = vpack.c.bf16 %v4962_v16, %v4961_v9 }
0x114d   :  { %v4837_v26 = vmul.f32 0.0625, %v4825_v39  ;;  %v8286_v28 = vsel %vm4844_vm0, %v4846_v32, 0.0  ;;  %v4838_v43 = vmul.f32 0.0625, %v4827_v13  ;;  %v8304_v4 = vsel %vm4844_vm0, %v4847_v48, 0.0 }
0x114e   :  { %v4864_v0 = vmul.f32 %v8286_v28, %v8286_v28  ;;  %v4865_v30 = vmul.f32 %v8304_v4, %v8304_v4 }
0x114f   :  { %v4848_v27 = vsub.f32 %v4795_v63, %v4837_v26  ;;  %v4849_v33 = vsub.f32 %v4800_v21, %v4838_v43  ;;  %v6512_v63 = vpack.c.bf16 %v4964_v31, %v4963_v51 }
0x1150   :  { %v4829_v55 = vpop.xlane.xlu1 %4828 }
0x1151   :  { %v4839_v37 = vmul.f32 0.0625, %v4829_v55  ;;  %v8300_v2 = vsel %vm4844_vm0, %v4848_v27, 0.0  ;;  %v8316_v24 = vsel %vm4844_vm0, %v4849_v33, 0.0 }
0x1152   :  { %v4866_v35 = vmul.f32 %v8300_v2, %v8300_v2  ;;  %v4867_v46 = vmul.f32 %v8316_v24, %v8316_v24 }
0x1153   :  { %v4850_v53 = vsub.f32 %v4805_v3, %v4839_v37 }
0x1155   :  { %v8312_v10 = vsel %vm4844_vm0, %v4850_v53, 0.0  ;;  %v5162_v53 = vld [vmem:[%s8375_s7] ss:$0 sm:$0xff] }
0x1156   :  { %v4868_v38 = vmul.f32 %v8312_v10, %v8312_v10 }
0x1195   :  { %v5255_v20 = vpop.f32.mrb[38].mxu0 }
0x1196   :  { %v8280_v60 = vadd.f32 %v5255_v20, %v5160_v17  ;;  %v4809_v29 = vpop.f32.mrb[39].mxu0 }
0x1197   :  { %v8282_v14 = vadd.f32 %v5160_v17, %v4809_v29  ;;  %v4957_v17 = vld [vmem:[#allocation12 + $0x40] sm:$0xff] }
0x1198   :  { %4832 = vadd.xlane.f32.xlu1 %v8280_v60  ;;  %v6500_v47 = vpack.c.bf16 %v4958_v34, %v4957_v17 }
0x1199   :  { %4830 = vadd.xlane.f32.xlu0 %v8282_v14 }
0x119a   :  { %6501 = vmatprep.subr.bf16.mxu1 %v6500_v47 }
0x119b   :  { %6503 = vmatpush3.bf16.msra.mxu1 %v6500_v47 }
0x119c   :  { %4873 = vadd.xlane.f32.xlu1 %v4864_v0  ;;  %6505 = vmatprep.subr.bf16.mxu1 %v6504_v25 }
0x119d   :  { %4871 = vadd.xlane.f32.xlu0 %v4863_v44 }
0x119f   :  { %6507 = vmatpush3.bf16.msra.mxu1 %v6504_v25 }
0x11a0   :  { %4877 = vadd.xlane.f32.xlu1 %v4866_v35  ;;  %6509 = vmatprep.subr.bf16.mxu1 %v6508_v23 }
0x11a1   :  { %4875 = vadd.xlane.f32.xlu0 %v4865_v30 }
0x11a3   :  { %6511 = vmatpush3.bf16.msra.mxu1 %v6508_v23 }
0x11a4   :  { %4881 = vadd.xlane.f32.xlu1 %v4868_v38  ;;  %6513 = vmatprep.subr.bf16.mxu1 %v6512_v63 }
0x11a5   :  { %4879 = vadd.xlane.f32.xlu0 %v4867_v46 }
0x11a7   :  { %6515 = vmatpush3.bf16.msra.mxu1 %v6512_v63 }
0x1225   :  { %v4833_v21 = vpop.xlane.xlu1 %4832 }
0x1226   :  { %v4841_v52 = vmul.f32 0.0625, %v4833_v21  ;;  %v4831_v49 = vpop.xlane.xlu0 %4830 }
0x1227   :  { %v4840_v8 = vmul.f32 0.0625, %v4831_v49 }
0x1228   :  { %v4852_v3 = vsub.f32 %v8280_v60, %v4841_v52 }
0x1229   :  { %v4851_v1 = vsub.f32 %v8282_v14, %v4840_v8  ;;  %v4874_v40 = vpop.xlane.xlu1 %4873  ;;  %v5161_v14 = vld [vmem:[%s8374_s6] ss:$0 sm:$0xff] }
0x122a   :  { %v4888_v56 = vmul.f32 0.0625, %v4874_v40  ;;  %v4872_v57 = vpop.xlane.xlu0 %4871  ;;  %v8326_v15 = vsel %vm4844_vm0, %v4852_v3, 0.0  ;;  %v5163_v3 = vld [vmem:[%s8377_s9] ss:$0 sm:$0xff]  ;;  %s5090_s9 = sshll.u32 %s7077_s26, 4  ;;  %s5091_s9 = int_to_ptr.vmem [resolvable:$true] %s5090_s9 }
0x122b   :  { %v4887_v19 = vmul.f32 0.0625, %v4872_v57  ;;  %v4870_v54 = vmul.f32 %v8326_v15, %v8326_v15  ;;  %v8332_v58 = vsel %vm4844_vm0, %v4851_v1, 0.0  ;;  %s7037_s27 = scalar_lea.vmem %s5091_s9, 1024  ;;  %p7042_p13 = scmp.lt.s32.totalorder %s5091_s9, %s5091_s9 }
0x122c   :  { %v4896_v18 = vadd.f32 1e-05, %v4888_v56  ;;  %v4869_v39 = vmul.f32 %v8332_v58, %v8332_v58  ;;  %p7038_p12 = scmp.ne.s32.totalorder %s5091_s9, %s7037_s27  ;;  %p7043_p0 = scmp.lt.s32.totalorder %s7037_s27, %s7037_s27 }
0x122d   :  { %v4895_v41 = vadd.f32 1e-05, %v4887_v19  ;;  %4885 = vadd.xlane.f32.xlu1 %v4870_v54  ;;  %v4878_v11 = vpop.xlane.xlu1 %4877 }
0x122e   :  { %6911 = vrsqrt.f32 %v4896_v18  ;;  %v4890_v32 = vmul.f32 0.0625, %v4878_v11  ;;  %4883 = vadd.xlane.f32.xlu0 %v4869_v39  ;;  %v4876_v26 = vpop.xlane.xlu0 %4875  ;;  %p7044_p1 = por %p7043_p0, %p7042_p13 }
0x122f   :  { %6913 = vrsqrt.f32 %v4895_v41  ;;  %v4889_v36 = vmul.f32 0.0625, %v4876_v26 }
0x1230   :  { %v4898_v50 = vadd.f32 1e-05, %v4890_v32  ;;  %p7045_p2 = pnand %p7044_p1, %p7038_p12 }
0x1231   :  { %v4897_v55 = vadd.f32 1e-05, %v4889_v36  ;;  %v4882_v13 = vpop.xlane.xlu1 %4881 }
0x1232   :  { %6915 = vrsqrt.f32 %v4898_v50  ;;  %v4892_v12 = vmul.f32 0.0625, %v4882_v13  ;;  %v4880_v20 = vpop.xlane.xlu0 %4879 }
0x1233   :  { %6917 = vrsqrt.f32 %v4897_v55  ;;  %v4891_v60 = vmul.f32 0.0625, %v4880_v20 }
0x1234   :  { %v4900_v29 = vadd.f32 1e-05, %v4892_v12 }
0x1235   :  { %v4899_v27 = vadd.f32 1e-05, %v4891_v60 }
0x1236   :  { %6919 = vrsqrt.f32 %v4900_v29 }
0x1237   :  { %6921 = vrsqrt.f32 %v4899_v27 }
0x1238   :  { %v6912_v37 = vpop.eup %6911 }
0x1239   :  { %v6914_v48 = vpop.eup %6913  ;;  %v4912_v43 = vmul.f32 %v6912_v37, %v8286_v28 }
0x123a   :  { %v4911_v0 = vmul.f32 %v6914_v48, %v8291_v6 }
0x123b   :  { %v4927_v44 = vmul.f32 %v5161_v14, %v4912_v43 }
0x123c   :  { %v6916_v33 = vpop.eup %6915  ;;  %v4926_v35 = vmul.f32 %v5161_v14, %v4911_v0 }
0x123d   :  { %v6918_v30 = vpop.eup %6917  ;;  %v4914_v38 = vmul.f32 %v6916_v33, %v8300_v2  ;;  %v4942_v61 = vadd.f32 %v5162_v53, %v4927_v44 }
0x123e   :  { %v4941_v46 = vadd.f32 %v5162_v53, %v4926_v35  ;;  %v4913_v5 = vmul.f32 %v6918_v30, %v8304_v4 }
0x123f   :  { %v4929_v59 = vmul.f32 %v5161_v14, %v4914_v38 }
0x1240   :  { %v6920_v22 = vpop.eup %6919  ;;  %5288 = vmatprep.mubr.f32.mxu1 %v4941_v46  ;;  %v4928_v28 = vmul.f32 %v5161_v14, %v4913_v5 }
0x1241   :  { %v6922_v62 = vpop.eup %6921  ;;  %5289 = vmatmul.mubr.f32.vlgmr.msra.gmra.mrb[32].mxu1 %v4942_v61  ;;  %v4916_v6 = vmul.f32 %v6920_v22, %v8312_v10  ;;  %v4944_v34 = vadd.f32 %v5162_v53, %v4929_v59 }
0x1242   :  { %v4943_v45 = vadd.f32 %v5162_v53, %v4928_v28  ;;  %v4915_v17 = vmul.f32 %v6922_v62, %v8316_v24 }
0x1243   :  { %v4931_v47 = vmul.f32 %v5161_v14, %v4916_v6 }
0x1244   :  { %5291 = vmatprep.mubr.f32.mxu1 %v4943_v45  ;;  %v4930_v7 = vmul.f32 %v5161_v14, %v4915_v17 }
0x1245   :  { %5292 = vmatmul.mubr.f32.gmra.mrb[34].mxu1 %v4944_v34  ;;  %v4946_v42 = vadd.f32 %v5162_v53, %v4931_v47 }
0x1246   :  { %v4945_v2 = vadd.f32 %v5162_v53, %v4930_v7 }
0x1248   :  { %5294 = vmatprep.mubr.f32.mxu1 %v4945_v2 }
0x1249   :  { %5295 = vmatmul.mubr.f32.gmra.mrb[36].mxu1 %v4946_v42 }
0x12ba   :  { %v4886_v4 = vpop.xlane.xlu1 %4885 }
0x12bb   :  { %v4894_v25 = vmul.f32 0.0625, %v4886_v4  ;;  %v4884_v9 = vpop.xlane.xlu0 %4883 }
0x12bc   :  { %v4893_v16 = vmul.f32 0.0625, %v4884_v9 }
0x12bd   :  { %v4902_v51 = vadd.f32 1e-05, %v4894_v25 }
0x12be   :  { %v4901_v23 = vadd.f32 1e-05, %v4893_v16 }
0x12bf   :  { %6923 = vrsqrt.f32 %v4902_v51 }
0x12c0   :  { %6925 = vrsqrt.f32 %v4901_v23 }
0x12c9   :  { %v6924_v10 = vpop.eup %6923 }
0x12ca   :  { %v6926_v31 = vpop.eup %6925  ;;  %v4918_v24 = vmul.f32 %v6924_v10, %v8326_v15 }
0x12cb   :  { %v4917_v63 = vmul.f32 %v6926_v31, %v8332_v58 }
0x12cc   :  { %v4933_v21 = vmul.f32 %v5161_v14, %v4918_v24 }
0x12cd   :  { %v4932_v52 = vmul.f32 %v5161_v14, %v4917_v63 }
0x12ce   :  { %v4948_v8 = vadd.f32 %v5162_v53, %v4933_v21 }
0x12cf   :  { %v4947_v49 = vadd.f32 %v5162_v53, %v4932_v52 }
0x12d1   :  { %5297 = vmatprep.mubr.f32.mxu1 %v4947_v49 }
0x12d2   :  { %5298 = vmatmul.mubr.f32.gmra.mrb[38].mxu1 %v4948_v8 }
0x1314   :  { %v5290_v1 = vpop.f32.mrb[32].mxu1 }
0x1315   :  { %v5044_v40 = vadd.f32 %v5290_v1, %v5163_v3  ;;  %v5038_v56 = vpop.f32.mrb[33].mxu1 }
0x1316   :  { %v5039_v57 = vadd.f32 %v5163_v3, %v5038_v56 }
0x1317   :  { %5078 = vst [vmem:[#allocation13 + $0x8] sm:$0xff] %v5044_v40 }
0x1318   :  { %5077 = vst [vmem:[#allocation13] sm:$0xff] %v5039_v57  ;;  %v5293_v19 = vpop.f32.mrb[34].mxu1 }
0x1319   :  { %v5054_v15 = vadd.f32 %v5293_v19, %v5163_v3  ;;  %v5048_v54 = vpop.f32.mrb[35].mxu1 }
0x131a   :  { %v5049_v58 = vadd.f32 %v5163_v3, %v5048_v54 }
0x131b   :  { %5080 = vst [vmem:[#allocation13 + $0x18] sm:$0xff] %v5054_v15 }
0x131c   :  { %5079 = vst [vmem:[#allocation13 + $0x10] sm:$0xff] %v5049_v58  ;;  %v5296_v18 = vpop.f32.mrb[36].mxu1 }
0x131d   :  { %v5064_v39 = vadd.f32 %v5296_v18, %v5163_v3  ;;  %v5058_v41 = vpop.f32.mrb[37].mxu1 }
0x131e   :  { %v5059_v11 = vadd.f32 %v5163_v3, %v5058_v41 }
0x131f   :  { %5082 = vst [vmem:[#allocation13 + $0x28] sm:$0xff] %v5064_v39 }
0x1320   :  { %5081 = vst [vmem:[#allocation13 + $0x20] sm:$0xff] %v5059_v11 }
0x13a5   :  { %v5299_v32 = vpop.f32.mrb[38].mxu1 }
0x13a6   :  { %v5074_v26 = vadd.f32 %v5299_v32, %v5163_v3  ;;  %v5068_v36 = vpop.f32.mrb[39].mxu1 }
0x13a7   :  { %v5069_v50 = vadd.f32 %v5163_v3, %v5068_v36 }
0x13a8   :  { %5084 = vst [vmem:[#allocation13 + $0x38] sm:$0xff] %v5074_v26 }
0x13a9   :  { %5083 = vst [vmem:[#allocation13 + $0x30] sm:$0xff] %v5069_v50 }
0x13aa   :  { %7048 = shalt.err (!%p7045_p2)
}
0x13ab   :  { %s7049_s29 = scalar_lea.hbm %s8378_s10, 1024 }
0x13ac   :  { %p7050_p3 = scmp.ne.s32.totalorder %s8378_s10, %s7049_s29  ;;  %p7053_p4 = scmp.lt.u32.totalorder %s7049_s29, %s8378_s10 }
0x13ae   :  { %p7055_p5 = pnand %p7053_p4, %p7050_p3 }
0x13b0   :  { %7058 = shalt.err (!%p7055_p5)
}
0x13b1   :  { %5096 = dma.vmem_to_hbm [thread:$0]  %s5091_s9, 1024, %s8378_s10, [#allocation6], %s7072_s14, %s7072_s14, %s7073_s19  }
0x13b2   :  { %7065 = dma.done.wait [#allocation6], 1024  }
0x13b3   :  { %7066 = vsyncadd [#allocation6], 4294966272 }
0x13b4   :  { %5100 = vsyncpa [#allocation5], 1 }
0x13b5   :  { %5101 = vsyncpa [#allocation8], 1 }
0x13b6   :  { %5102 = vsyncpa [#allocation11], 1 }
0x13b7   :  { %5103 = vsyncpa [#allocation6], 1 }

</bundles_post_ra>
